<compile_context>
chip_gen: v6e
topology: v6e:2x2x1
jax: 0.10.0
libtpu: 0.0.40
codegen_flags: <defaults>
</compile_context>

<pallas_src>
import jax
import jax.numpy as jnp
from jax.experimental import pallas as pl
from jax.experimental.pallas import tpu as pltpu


def _prod(shape):
    p = 1
    for d in shape:
        p *= d
    return p


def _round_up(n, m):
    return ((n + m - 1) // m) * m


def _vmem_limit_bytes():
    # v7x: 64 MiB VMEM/TensorCore; v5e/v6e: 128 MiB.  Keep ~25% headroom for the
    # compiler's internal scratch; never request more than 96 MiB.
    try:
        cap = int(pltpu.get_tpu_info().vmem_capacity_bytes)
    except Exception:
        cap = 64 << 20  # conservative default that fits every generation
    return min((cap * 3) // 4, 96 << 20)


def _mlp3_kernel(x_ref, w1_ref, b1_ref, w2_ref, b2_ref, w3_ref, b3_ref, o_ref):
    # bf16 operands into the MXU, f32 accumulation, f32 bias-add + ReLU on the VPU.
    x = x_ref[...].astype(jnp.bfloat16)
    h = jnp.dot(x, w1_ref[...], preferred_element_type=jnp.float32)
    h = jnp.maximum(h + b1_ref[...], 0.0)
    h = jnp.dot(h.astype(jnp.bfloat16), w2_ref[...], preferred_element_type=jnp.float32)
    h = jnp.maximum(h + b2_ref[...], 0.0)
    h = jnp.dot(h.astype(jnp.bfloat16), w3_ref[...], preferred_element_type=jnp.float32)
    o_ref[...] = jnp.maximum(h + b3_ref[...], 0.0)


def embedding_feedforward(x, params, input_shape, output_shape, *, tile_m=256):
    """3-layer MLP forward pass as a single batch-tiled Pallas kernel.

    x: any array whose trailing dims multiply to prod(input_shape)
       (mirrors torch's x.view(-1, input_dim)).
    params: dict with w1,b1,w2,b2,w3,b3; weights in (in, out) layout, biases (1, out),
            all float32 (cast/padding for the TPU is handled here).
    """
    input_dim = _prod(input_shape)
    output_dim = _prod(output_shape)
    H = params["w1"].shape[1]

    # Lane-aligned padded dims. Extra weight columns / bias entries are exactly
    # zero, so padded lanes stay 0 through ReLU and contribute nothing downstream.
    Hp = _round_up(H, 128)
    Op = _round_up(output_dim, 128)

    def pad2(a, rows, cols, dtype=None):
        a = jnp.pad(a, ((0, rows - a.shape[0]), (0, cols - a.shape[1])))
        return a.astype(dtype) if dtype is not None else a

    w1 = pad2(params["w1"], input_dim, Hp, jnp.bfloat16)
    b1 = pad2(params["b1"], 1, Hp)
    w2 = pad2(params["w2"], Hp, Hp, jnp.bfloat16)
    b2 = pad2(params["b2"], 1, Hp)
    w3 = pad2(params["w3"], Hp, Op, jnp.bfloat16)
    b3 = pad2(params["b3"], 1, Op)

    # Flatten like torch's x.view(-1, input_dim); dtype cast happens in-kernel.
    x2d = jnp.reshape(x, (-1, input_dim))
    B = x2d.shape[0]

    # Batch tile: multiple of 8 sublanes, at most tile_m rows; pad B up to a
    # whole number of tiles (padded rows are discarded after the call).
    tm = min(tile_m, max(8, _round_up(B, 8)))
    Bp = _round_up(B, tm)
    if Bp != B:
        x2d = jnp.pad(x2d, ((0, Bp - B), (0, 0)))

    const = lambda i: (0, 0)  # weights/biases: same block every step -> VMEM resident

    out_padded = pl.pallas_call(
        _mlp3_kernel,
        out_shape=jax.ShapeDtypeStruct((Bp, Op), jnp.float32),
        grid=(Bp // tm,),
        in_specs=[
            pl.BlockSpec((tm, input_dim), lambda i: (i, 0)),  # x tile: streamed
            pl.BlockSpec((input_dim, Hp), const),
            pl.BlockSpec((1, Hp), const),
            pl.BlockSpec((Hp, Hp), const),
            pl.BlockSpec((1, Hp), const),
            pl.BlockSpec((Hp, Op), const),
            pl.BlockSpec((1, Op), const),
        ],
        out_specs=pl.BlockSpec((tm, Op), lambda i: (i, 0)),  # lane-dense (Op mult of 128)
        compiler_params=pltpu.CompilerParams(
            dimension_semantics=("parallel",),        # megacore sharding on v7x
            vmem_limit_bytes=_vmem_limit_bytes(),
        ),
    )(x2d, w1, b1, w2, b2, w3, b3)

    out2d = out_padded[:B, :output_dim]
    return jnp.reshape(out2d, (-1,) + tuple(output_shape))


def init_params(key, input_shape, output_shape):
    """Deterministic init matching torch.nn.Linear default (uniform +-1/sqrt(fan_in)).

    Weights stored as (in_dim, out_dim); num_layers = 3 so hidden_dim = input_dim + output_dim.
    """
    input_dim = _prod(input_shape)
    output_dim = _prod(output_shape)
    hidden_dim = input_dim + output_dim

    dims = [(input_dim, hidden_dim), (hidden_dim, hidden_dim), (hidden_dim, output_dim)]
    params = {}
    keys = jax.random.split(key, 6)
    for i, (fan_in, fan_out) in enumerate(dims):
        bound = 1.0 / (fan_in ** 0.5)
        params[f"w{i+1}"] = jax.random.uniform(
            keys[2 * i], (fan_in, fan_out), jnp.float32, -bound, bound)
        params[f"b{i+1}"] = jax.random.uniform(
            keys[2 * i + 1], (1, fan_out), jnp.float32, -bound, bound)
    return params


def _reference(x, params, input_shape, output_shape):
    """Pure-JAX f32 reference of the PyTorch forward pass (for sanity check)."""
    input_dim = _prod(input_shape)
    h = jnp.reshape(x, (-1, input_dim)).astype(jnp.float32)
    h = jnp.maximum(h @ params["w1"] + params["b1"], 0.0)
    h = jnp.maximum(h @ params["w2"] + params["b2"], 0.0)
    h = jnp.maximum(h @ params["w3"] + params["b3"], 0.0)
    return jnp.reshape(h, (-1,) + tuple(output_shape))


if __name__ == "__main__":
    key = jax.random.PRNGKey(0)
    k_x, k_p = jax.random.split(key)

    # input_shape=(4,16,16) -> input_dim=1024; output_shape=(32,) -> output_dim=32
    input_shape = (4, 16, 16)
    output_shape = (32,)
    batch = 2

    x = jax.random.normal(k_x, (batch,) + input_shape, dtype=jnp.float32)
    params = init_params(k_p, input_shape, output_shape)

    out = embedding_feedforward(x, params, input_shape, output_shape)
    out = jax.block_until_ready(out)

    ref = _reference(x, params, input_shape, output_shape)
    assert out.shape == (batch,) + output_shape, out.shape
    # bf16 MXU operands with f32 accumulation -> small, bounded deviation vs f32 ref.
    assert jnp.allclose(out, ref, atol=5e-2, rtol=5e-2), "mismatch vs reference"

    print("KERNEL_OK")
</pallas_src>

<mosaic_0001>
module attributes {stable_mosaic.version = 11 : i64} {
  func.func @_mlp3_kernel(%arg0: i32, %arg1: memref<8x1024xf32, #tpu.memory_space<vmem>>, %arg2: memref<1024x1152xbf16, #tpu.memory_space<vmem>>, %arg3: memref<1x1152xf32, #tpu.memory_space<vmem>>, %arg4: memref<1152x1152xbf16, #tpu.memory_space<vmem>>, %arg5: memref<1x1152xf32, #tpu.memory_space<vmem>>, %arg6: memref<1152x128xbf16, #tpu.memory_space<vmem>>, %arg7: memref<1x128xf32, #tpu.memory_space<vmem>>, %arg8: memref<8x128xf32, #tpu.memory_space<vmem>>) attributes {dimension_semantics = [#tpu.dimension_semantics<parallel>], iteration_bounds = array<i64: 1>, scalar_prefetch = 0 : i64, scratch_operands = 0 : i64, tpu.core_type = #tpu.core_type<tc>, window_params = [{transform_indices = @transform_0, window_bounds = array<i64: 8, 1024>}, {pipeline_mode = #tpu.pipeline_mode<synchronous>, transform_indices = @transform_1, window_bounds = array<i64: 1024, 1152>}, {pipeline_mode = #tpu.pipeline_mode<synchronous>, transform_indices = @transform_2, window_bounds = array<i64: 1, 1152>}, {pipeline_mode = #tpu.pipeline_mode<synchronous>, transform_indices = @transform_3, window_bounds = array<i64: 1152, 1152>}, {pipeline_mode = #tpu.pipeline_mode<synchronous>, transform_indices = @transform_4, window_bounds = array<i64: 1, 1152>}, {pipeline_mode = #tpu.pipeline_mode<synchronous>, transform_indices = @transform_5, window_bounds = array<i64: 1152, 128>}, {pipeline_mode = #tpu.pipeline_mode<synchronous>, transform_indices = @transform_6, window_bounds = array<i64: 1, 128>}, {transform_indices = @transform_7, window_bounds = array<i64: 8, 128>}]} {
    %c0 = arith.constant 0 : index
    %c0_0 = arith.constant 0 : index
    %0 = vector.load %arg1[%c0, %c0_0] : memref<8x1024xf32, #tpu.memory_space<vmem>>, vector<8x1024xf32>
    %1 = arith.truncf %0 : vector<8x1024xf32> to vector<8x1024xbf16>
    %c0_1 = arith.constant 0 : index
    %c0_2 = arith.constant 0 : index
    %2 = vector.load %arg2[%c0_1, %c0_2] : memref<1024x1152xbf16, #tpu.memory_space<vmem>>, vector<1024x1152xbf16>
    %cst = arith.constant dense<0.000000e+00> : vector<8x1152xf32>
    %3 = tpu.matmul %1, %2, %cst {dimension_numbers = #tpu.dot_dimension_numbers<[1], [0], [0], [1], [0, 0, 1, 1], [], []>} : vector<8x1024xbf16>, vector<1024x1152xbf16>, vector<8x1152xf32> -> vector<8x1152xf32>
    %c0_3 = arith.constant 0 : index
    %c0_4 = arith.constant 0 : index
    %4 = vector.load %arg3[%c0_3, %c0_4] : memref<1x1152xf32, #tpu.memory_space<vmem>>, vector<1x1152xf32>
    %5 = vector.broadcast %4 : vector<1x1152xf32> to vector<8x1152xf32>
    %6 = arith.addf %3, %5 : vector<8x1152xf32>
    %cst_5 = arith.constant 0.000000e+00 : f32
    %7 = vector.broadcast %cst_5 : f32 to vector<8x1152xf32>
    %8 = arith.maximumf %6, %7 : vector<8x1152xf32>
    %9 = arith.truncf %8 : vector<8x1152xf32> to vector<8x1152xbf16>
    %c0_6 = arith.constant 0 : index
    %c0_7 = arith.constant 0 : index
    %10 = vector.load %arg4[%c0_6, %c0_7] : memref<1152x1152xbf16, #tpu.memory_space<vmem>>, vector<1152x1152xbf16>
    %cst_8 = arith.constant dense<0.000000e+00> : vector<8x1152xf32>
    %11 = tpu.matmul %9, %10, %cst_8 {dimension_numbers = #tpu.dot_dimension_numbers<[1], [0], [0], [1], [0, 0, 1, 1], [], []>} : vector<8x1152xbf16>, vector<1152x1152xbf16>, vector<8x1152xf32> -> vector<8x1152xf32>
    %c0_9 = arith.constant 0 : index
    %c0_10 = arith.constant 0 : index
    %12 = vector.load %arg5[%c0_9, %c0_10] : memref<1x1152xf32, #tpu.memory_space<vmem>>, vector<1x1152xf32>
    %13 = vector.broadcast %12 : vector<1x1152xf32> to vector<8x1152xf32>
    %14 = arith.addf %11, %13 : vector<8x1152xf32>
    %cst_11 = arith.constant 0.000000e+00 : f32
    %15 = vector.broadcast %cst_11 : f32 to vector<8x1152xf32>
    %16 = arith.maximumf %14, %15 : vector<8x1152xf32>
    %17 = arith.truncf %16 : vector<8x1152xf32> to vector<8x1152xbf16>
    %c0_12 = arith.constant 0 : index
    %c0_13 = arith.constant 0 : index
    %18 = vector.load %arg6[%c0_12, %c0_13] : memref<1152x128xbf16, #tpu.memory_space<vmem>>, vector<1152x128xbf16>
    %cst_14 = arith.constant dense<0.000000e+00> : vector<8x128xf32>
    %19 = tpu.matmul %17, %18, %cst_14 {dimension_numbers = #tpu.dot_dimension_numbers<[1], [0], [0], [1], [0, 0, 1, 1], [], []>} : vector<8x1152xbf16>, vector<1152x128xbf16>, vector<8x128xf32> -> vector<8x128xf32>
    %c0_15 = arith.constant 0 : index
    %c0_16 = arith.constant 0 : index
    %20 = vector.load %arg7[%c0_15, %c0_16] : memref<1x128xf32, #tpu.memory_space<vmem>>, vector<1x128xf32>
    %21 = vector.broadcast %20 : vector<1x128xf32> to vector<8x128xf32>
    %22 = arith.addf %19, %21 : vector<8x128xf32>
    %cst_17 = arith.constant 0.000000e+00 : f32
    %23 = vector.broadcast %cst_17 : f32 to vector<8x128xf32>
    %24 = arith.maximumf %22, %23 : vector<8x128xf32>
    %c0_18 = arith.constant 0 : index
    %c0_19 = arith.constant 0 : index
    %25 = vector.load %arg8[%c0_18, %c0_19] : memref<8x128xf32, #tpu.memory_space<vmem>>, vector<8x128xf32>
    tpu.vector_store %arg8[%c0_18, %c0_19], %24 {strides = array<i32>} : memref<8x128xf32, #tpu.memory_space<vmem>>, vector<8x128xf32>,
    return
  }
  func.func @transform_0(%arg0: i32) -> (i32, i32) {
    %c0_i32 = arith.constant 0 : i32
    %c0_i32_0 = arith.constant 0 : i32
    return %arg0, %c0_i32 : i32, i32
  }
  func.func @transform_1(%arg0: i32) -> (i32, i32) {
    %c0_i32 = arith.constant 0 : i32
    %c0_i32_0 = arith.constant 0 : i32
    %c0_i32_1 = arith.constant 0 : i32
    return %c0_i32, %c0_i32_0 : i32, i32
  }
  func.func @transform_2(%arg0: i32) -> (i32, i32) {
    %c0_i32 = arith.constant 0 : i32
    %c0_i32_0 = arith.constant 0 : i32
    %c0_i32_1 = arith.constant 0 : i32
    return %c0_i32, %c0_i32_0 : i32, i32
  }
  func.func @transform_3(%arg0: i32) -> (i32, i32) {
    %c0_i32 = arith.constant 0 : i32
    %c0_i32_0 = arith.constant 0 : i32
    %c0_i32_1 = arith.constant 0 : i32
    return %c0_i32, %c0_i32_0 : i32, i32
  }
  func.func @transform_4(%arg0: i32) -> (i32, i32) {
    %c0_i32 = arith.constant 0 : i32
    %c0_i32_0 = arith.constant 0 : i32
    %c0_i32_1 = arith.constant 0 : i32
    return %c0_i32, %c0_i32_0 : i32, i32
  }
  func.func @transform_5(%arg0: i32) -> (i32, i32) {
    %c0_i32 = arith.constant 0 : i32
    %c0_i32_0 = arith.constant 0 : i32
    %c0_i32_1 = arith.constant 0 : i32
    return %c0_i32, %c0_i32_0 : i32, i32
  }
  func.func @transform_6(%arg0: i32) -> (i32, i32) {
    %c0_i32 = arith.constant 0 : i32
    %c0_i32_0 = arith.constant 0 : i32
    %c0_i32_1 = arith.constant 0 : i32
    return %c0_i32, %c0_i32_0 : i32, i32
  }
  func.func @transform_7(%arg0: i32) -> (i32, i32) {
    %c0_i32 = arith.constant 0 : i32
    %c0_i32_0 = arith.constant 0 : i32
    return %arg0, %c0_i32 : i32, i32
  }
}

</mosaic_0001>

<bundles_post_ra>
// kernel: tpu_custom_call.1
= control target key start
LH: loop header
LB: loop body
LE: loop exit
PB: predicated region body
PF: predicated region fallthrough
CT: control target
= control target key end

     0   :  { %12 = vsyncpa [#allocation3], 0  ;;  %s14569_s0 = inlined_call_operand.hbm [shape: f32[8,1024], index: 0, kind: input, shape index: {}]   ;;  %s14570_s1 = inlined_call_operand.hbm [shape: bf16[1024,1152], index: 1, kind: input, shape index: {}]   ;;  %s14571_s2 = inlined_call_operand.hbm [shape: f32[1,1152], index: 2, kind: input, shape index: {}]   ;;  %s14572_s3 = inlined_call_operand.hbm [shape: bf16[1152,1152], index: 3, kind: input, shape index: {}]   ;;  %s14573_s4 = inlined_call_operand.hbm [shape: f32[1,1152], index: 4, kind: input, shape index: {}]   ;;  %s14574_s5 = inlined_call_operand.hbm [shape: bf16[1152,128], index: 5, kind: input, shape index: {}]   ;;  %s14575_s6 = inlined_call_operand.hbm [shape: f32[1,128], index: 6, kind: input, shape index: {}]   ;;  %s14576_s7 = inlined_call_operand.hbm [shape: f32[8,128], index: 7, kind: output, shape index: {}]  }
   0x1   :  { %13 = vsyncpa [#allocation6], 0 }
   0x2   :  { %14 = vsyncpa [#allocation9], 0 }
   0x3   :  { %15 = vsyncpa [#allocation12], 0 }
   0x4   :  { %16 = vsyncpa [#allocation4], 0  ;;  %s14170_s24 = smov [#allocation5]  }
   0x5   :  { %s32_s25 = sshll.u32 %s14170_s24, 4  ;;  %s33_s25 = int_to_ptr.vmem [resolvable:$true] %s32_s25 }
   0x6   :  { %s14008_s26 = scalar_lea.vmem %s33_s25, 73728  ;;  %p14013_p1 = scmp.lt.s32.totalorder %s33_s25, %s33_s25 }
   0x7   :  { %p14009_p0 = scmp.ne.s32.totalorder %s33_s25, %s14008_s26  ;;  %p14014_p2 = scmp.lt.s32.totalorder %s14008_s26, %s14008_s26 }
   0x9   :  { %p14015_p3 = por %p14014_p2, %p14013_p1 }
   0xb   :  { %p14016_p4 = pnand %p14015_p3, %p14009_p0 }
   0xd   :  { %14019 = shalt.err (!%p14016_p4)
}
   0xe   :  { %s14171_s27 = smov 576   ;;  %s14172_s28 = smov 36  }
   0xf   :  { %38 = dma.hbm_to_vmem [thread:$0]  %s14570_s1, 73728, %s33_s25, [#allocation6], %s14171_s27, %s14171_s27, %s14172_s28  }
  0x10   :  { %s14173_s8 = smov [#allocation8]   ;;  %s14174_s10 = smov [#allocation11]  }
  0x11   :  { %s54_s9 = sshll.u32 %s14173_s8, 4  ;;  %s76_s11 = sshll.u32 %s14174_s10, 4  ;;  %s55_s9 = int_to_ptr.vmem [resolvable:$true] %s54_s9  ;;  %s77_s11 = int_to_ptr.vmem [resolvable:$true] %s76_s11 }
  0x12   :  { %s14028_s12 = scalar_lea.vmem %s55_s9, 82944  ;;  %p14033_p6 = scmp.lt.s32.totalorder %s55_s9, %s55_s9 }
  0x13   :  { %p14029_p5 = scmp.ne.s32.totalorder %s55_s9, %s14028_s12  ;;  %p14034_p7 = scmp.lt.s32.totalorder %s14028_s12, %s14028_s12 }
  0x15   :  { %p14035_p8 = por %p14034_p7, %p14033_p6 }
  0x17   :  { %p14036_p9 = pnand %p14035_p8, %p14029_p5 }
  0x19   :  { %14039 = shalt.err (!%p14036_p9)
}
  0x1a   :  { %60 = dma.hbm_to_vmem [thread:$0]  %s14572_s3, 82944, %s55_s9, [#allocation9], %s14171_s27, %s14171_s27, %s14172_s28  }
  0x1b   :  { %s14048_s15 = scalar_lea.vmem %s77_s11, 9216  ;;  %p14053_p11 = scmp.lt.s32.totalorder %s77_s11, %s77_s11 }
  0x1c   :  { %p14049_p10 = scmp.ne.s32.totalorder %s77_s11, %s14048_s15  ;;  %p14054_p12 = scmp.lt.s32.totalorder %s14048_s15, %s14048_s15 }
  0x1e   :  { %p14055_p13 = por %p14054_p12, %p14053_p11 }
  0x20   :  { %p14056_p0 = pnand %p14055_p13, %p14049_p10 }
  0x22   :  { %14059 = shalt.err (!%p14056_p0)
}
  0x23   :  { %s14175_s1 = smov 64   ;;  %s14176_s16 = smov 4  }
  0x24   :  { %82 = dma.hbm_to_vmem [thread:$0]  %s14574_s5, 9216, %s77_s11, [#allocation12], %s14175_s1, %s14175_s1, %s14176_s16  }
  0x25   :  { %s14177_s19 = smov [#allocation2]   ;;  %s14178_s21 = smov [#allocation7]  }
  0x26   :  { %s23_s20 = sshll.u32 %s14177_s19, 4  ;;  %s45_s22 = sshll.u32 %s14178_s21, 4  ;;  %s24_s20 = int_to_ptr.vmem [resolvable:$true] %s23_s20  ;;  %s46_s22 = int_to_ptr.vmem [resolvable:$true] %s45_s22 }
  0x27   :  { %s14068_s3 = scalar_lea.vmem %s24_s20, 1024  ;;  %p14073_p2 = scmp.lt.s32.totalorder %s24_s20, %s24_s20 }
  0x28   :  { %p14069_p1 = scmp.ne.s32.totalorder %s24_s20, %s14068_s3  ;;  %p14074_p3 = scmp.lt.s32.totalorder %s14068_s3, %s14068_s3 }
  0x2a   :  { %p14075_p4 = por %p14074_p3, %p14073_p2 }
  0x2c   :  { %p14076_p5 = pnand %p14075_p4, %p14069_p1 }
  0x2e   :  { %14079 = shalt.err (!%p14076_p5)
}
  0x2f   :  { %26 = dma.hbm_to_vmem [thread:$0]  %s14569_s0, 1024, %s24_s20, [#allocation3]  }
  0x30   :  { %s14088_s25 = scalar_lea.vmem %s46_s22, 144  ;;  %s14092_s5 = scalar_lea.vmem %s46_s22, 160 }
  0x31   :  { %p14089_p6 = scmp.ne.s32.totalorder %s46_s22, %s14088_s25  ;;  %p14093_p7 = scmp.lt.s32.totalorder %s46_s22, %s46_s22 }
  0x32   :  { %p14094_p8 = scmp.lt.s32.totalorder %s14092_s5, %s14088_s25 }
  0x34   :  { %p14095_p9 = por %p14094_p8, %p14093_p7 }
  0x36   :  { %p14096_p10 = pnand %p14095_p9, %p14089_p6 }
  0x38   :  { %14099 = shalt.err (!%p14096_p10)
}
  0x39   :  { %48 = dma.hbm_to_vmem [thread:$0]  %s14571_s2, 144, %s46_s22, [#allocation6]  }
  0x3a   :  { %s14179_s28 = smov [#allocation10]   ;;  %s14180_s30 = smov [#allocation13]  }
  0x3b   :  { %s67_s29 = sshll.u32 %s14179_s28, 4  ;;  %s89_s8 = sshll.u32 %s14180_s30, 4  ;;  %s68_s29 = int_to_ptr.vmem [resolvable:$true] %s67_s29  ;;  %s90_s8 = int_to_ptr.vmem [resolvable:$true] %s89_s8 }
  0x3c   :  { %s14108_s9 = scalar_lea.vmem %s68_s29, 144  ;;  %s14112_s0 = scalar_lea.vmem %s68_s29, 160 }
  0x3d   :  { %p14109_p11 = scmp.ne.s32.totalorder %s68_s29, %s14108_s9  ;;  %p14113_p12 = scmp.lt.s32.totalorder %s68_s29, %s68_s29 }
  0x3e   :  { %p14114_p13 = scmp.lt.s32.totalorder %s14112_s0, %s14108_s9 }
  0x40   :  { %p14115_p0 = por %p14114_p13, %p14113_p12 }
  0x42   :  { %p14116_p1 = pnand %p14115_p0, %p14109_p11 }
  0x44   :  { %14119 = shalt.err (!%p14116_p1)
}
  0x45   :  { %70 = dma.hbm_to_vmem [thread:$0]  %s14573_s4, 144, %s68_s29, [#allocation9]  }
  0x46   :  { %s14128_s12 = scalar_lea.vmem %s90_s8, 16  ;;  %s14132_s2 = scalar_lea.vmem %s90_s8, 32 }
  0x47   :  { %p14129_p2 = scmp.ne.s32.totalorder %s90_s8, %s14128_s12  ;;  %p14133_p3 = scmp.lt.s32.totalorder %s90_s8, %s90_s8 }
  0x48   :  { %p14134_p4 = scmp.lt.s32.totalorder %s14132_s2, %s14128_s12 }
  0x4a   :  { %p14135_p5 = por %p14134_p4, %p14133_p3 }
  0x4c   :  { %p14136_p6 = pnand %p14135_p5, %p14129_p2 }
  0x4e   :  { %14139 = shalt.err (!%p14136_p6)
}
  0x4f   :  { %92 = dma.hbm_to_vmem [thread:$0]  %s14575_s6, 16, %s90_s8, [#allocation12]  }
  0x50   :  { %14160 = dma.done.wait [#allocation3], 1024  }
  0x51   :  { %14161 = vsyncadd [#allocation3], 4294966272 }
  0x52   :  { %14162 = dma.done.wait [#allocation6], 73872  }
  0x53   :  { %14163 = vsyncadd [#allocation6], 4294893424 }
  0x54   :  { %14164 = dma.done.wait [#allocation9], 83088  }
  0x55   :  { %14165 = vsyncadd [#allocation9], 4294884208 }
  0x56   :  { %14166 = dma.done.wait [#allocation12], 9232  }
  0x57   :  { %14167 = vsyncadd [#allocation12], 4294958064  ;;  %v12156_v0 = vld [vmem:[#allocation5 + $0x1fc] ss:$36 sps:$4 sm:$0xff]   ;;  %v12162_v4 = vld [vmem:[#allocation5 + $0x1b4] ss:$36 sps:$4 sm:$0xff]  }
  0x58   :  { %v12158_v1 = vld [vmem:[#allocation5 + $0x67c] ss:$36 sps:$4 sm:$0xff]   ;;  %3764 = vmatprep.subr.bf16.mxu0 %v12156_v0  ;;  %v12164_v5 = vld [vmem:[#allocation5 + $0x634] ss:$36 sps:$4 sm:$0xff]   ;;  %v12168_v8 = vld [vmem:[#allocation5 + $0x16c] ss:$36 sps:$4 sm:$0xff]  }
  0x59   :  { %v12160_v2 = vld [vmem:[#allocation5 + $0x1f8] ss:$36 sps:$4 sm:$0xff]   ;;  %3805 = vmatprep.subr.bf16.mxu1 %v12158_v1  ;;  %v12166_v6 = vld [vmem:[#allocation5 + $0x1b0] ss:$36 sps:$4 sm:$0xff]   ;;  %v12172_v10 = vld [vmem:[#allocation5 + $0x168] ss:$36 sps:$4 sm:$0xff]  }
  0x5a   :  { %v12161_v3 = vld [vmem:[#allocation5 + $0x678] ss:$36 sps:$4 sm:$0xff]   ;;  %3765 = vmatpush1.bf16.msra.mxu0 %v12160_v2  ;;  %v12167_v7 = vld [vmem:[#allocation5 + $0x630] ss:$36 sps:$4 sm:$0xff]   ;;  %v12173_v11 = vld [vmem:[#allocation5 + $0x5e8] ss:$36 sps:$4 sm:$0xff]  }
  0x5b   :  { %3806 = vmatpush1.bf16.msra.mxu1 %v12161_v3  ;;  %3766 = vmatprep.subr.bf16.mxu0 %v12162_v4  ;;  %v12170_v9 = vld [vmem:[#allocation5 + $0x5ec] ss:$36 sps:$4 sm:$0xff]   ;;  %v12174_v12 = vld [vmem:[#allocation5 + $0x124] ss:$36 sps:$4 sm:$0xff]   ;;  %v12180_v16 = vld [vmem:[#allocation5 + $0xdc] ss:$36 sps:$4 sm:$0xff]  }
  0x5c   :  { %3807 = vmatprep.subr.bf16.mxu1 %v12164_v5  ;;  %v12176_v13 = vld [vmem:[#allocation5 + $0x5a4] ss:$36 sps:$4 sm:$0xff]   ;;  %v12182_v17 = vld [vmem:[#allocation5 + $0x55c] ss:$36 sps:$4 sm:$0xff]   ;;  %v12186_v20 = vld [vmem:[#allocation5 + $0x94] ss:$36 sps:$4 sm:$0xff]  }
  0x5d   :  { %v12178_v14 = vld [vmem:[#allocation5 + $0x120] ss:$36 sps:$4 sm:$0xff]   ;;  %v12184_v18 = vld [vmem:[#allocation5 + $0xd8] ss:$36 sps:$4 sm:$0xff]   ;;  %v12190_v22 = vld [vmem:[#allocation5 + $0x90] ss:$36 sps:$4 sm:$0xff]  }
  0x5e   :  { %3767 = vmatpush1.bf16.msra.mxu0 %v12166_v6  ;;  %v12179_v15 = vld [vmem:[#allocation5 + $0x5a0] ss:$36 sps:$4 sm:$0xff]   ;;  %v12185_v19 = vld [vmem:[#allocation5 + $0x558] ss:$36 sps:$4 sm:$0xff]   ;;  %v12191_v23 = vld [vmem:[#allocation5 + $0x510] ss:$36 sps:$4 sm:$0xff]  }
  0x5f   :  { %3808 = vmatpush1.bf16.msra.mxu1 %v12167_v7  ;;  %3768 = vmatprep.subr.bf16.mxu0 %v12168_v8  ;;  %v12188_v21 = vld [vmem:[#allocation5 + $0x514] ss:$36 sps:$4 sm:$0xff]   ;;  %v12192_v24 = vld [vmem:[#allocation5 + $0x4c] ss:$36 sps:$4 sm:$0xff]   ;;  %v12198_v28 = vld [vmem:[#allocation5 + $0x4] ss:$36 sps:$4 sm:$0xff]  }
  0x60   :  { %3809 = vmatprep.subr.bf16.mxu1 %v12170_v9  ;;  %v12194_v25 = vld [vmem:[#allocation5 + $0x4cc] ss:$36 sps:$4 sm:$0xff]   ;;  %v12200_v29 = vld [vmem:[#allocation5 + $0x484] ss:$36 sps:$4 sm:$0xff]   ;;  %v12204_v32 = vld [vmem:[#allocation5 + $0x43c] ss:$36 sps:$4 sm:$0xff]  }
  0x61   :  { %v12196_v26 = vld [vmem:[#allocation5 + $0x48] ss:$36 sps:$4 sm:$0xff]   ;;  %v12202_v30 = vld [vmem:[#allocation5] ss:$36 sps:$4 sm:$0xff]   ;;  %v12208_v34 = vld [vmem:[#allocation5 + $0x438] ss:$36 sps:$4 sm:$0xff]  }
  0x62   :  { %3769 = vmatpush1.bf16.msra.mxu0 %v12172_v10  ;;  %v12197_v27 = vld [vmem:[#allocation5 + $0x4c8] ss:$36 sps:$4 sm:$0xff]   ;;  %v12203_v31 = vld [vmem:[#allocation5 + $0x480] ss:$36 sps:$4 sm:$0xff]   ;;  %v12209_v35 = vld [vmem:[#allocation5 + $0x8b8] ss:$36 sps:$4 sm:$0xff]  }
  0x63   :  { %3810 = vmatpush1.bf16.msra.mxu1 %v12173_v11  ;;  %3770 = vmatprep.subr.bf16.mxu0 %v12174_v12  ;;  %v12206_v33 = vld [vmem:[#allocation5 + $0x8bc] ss:$36 sps:$4 sm:$0xff]   ;;  %v12210_v36 = vld [vmem:[#allocation5 + $0x3f4] ss:$36 sps:$4 sm:$0xff]   ;;  %v12216_v40 = vld [vmem:[#allocation5 + $0x3ac] ss:$36 sps:$4 sm:$0xff]  }
  0x64   :  { %3811 = vmatprep.subr.bf16.mxu1 %v12176_v13  ;;  %v12212_v37 = vld [vmem:[#allocation5 + $0x874] ss:$36 sps:$4 sm:$0xff]   ;;  %v12218_v41 = vld [vmem:[#allocation5 + $0x82c] ss:$36 sps:$4 sm:$0xff]   ;;  %v12222_v44 = vld [vmem:[#allocation5 + $0x364] ss:$36 sps:$4 sm:$0xff]  }
  0x65   :  { %v12214_v38 = vld [vmem:[#allocation5 + $0x3f0] ss:$36 sps:$4 sm:$0xff]   ;;  %v12220_v42 = vld [vmem:[#allocation5 + $0x3a8] ss:$36 sps:$4 sm:$0xff]   ;;  %v12226_v47 = vld [vmem:[#allocation5 + $0x360] ss:$36 sps:$4 sm:$0xff]  }
  0x66   :  { %3771 = vmatpush1.bf16.msra.mxu0 %v12178_v14  ;;  %v12215_v39 = vld [vmem:[#allocation5 + $0x870] ss:$36 sps:$4 sm:$0xff]   ;;  %v12221_v43 = vld [vmem:[#allocation5 + $0x828] ss:$36 sps:$4 sm:$0xff]   ;;  %v12227_v48 = vld [vmem:[#allocation5 + $0x7e0] ss:$36 sps:$4 sm:$0xff]  }
  0x67   :  { %3812 = vmatpush1.bf16.msra.mxu1 %v12179_v15  ;;  %3772 = vmatprep.subr.bf16.mxu0 %v12180_v16  ;;  %v12224_v45 = vld [vmem:[#allocation5 + $0x7e4] ss:$36 sps:$4 sm:$0xff]   ;;  %v118_v50 = vld [vmem:[#allocation2 + $0x18] sm:$0xff]  ;;  %v12238_v58 = vld [vmem:[#allocation5 + $0x2d0] ss:$36 sps:$4 sm:$0xff]   ;;  %vm14183_vm0 = vmmov 0  }
  0x68   :  { %3813 = vmatprep.subr.bf16.mxu1 %v12182_v17  ;;  %v116_v46 = vld [vmem:[#allocation2 + $0x8] sm:$0xff]  ;;  %v12228_v51 = vld [vmem:[#allocation5 + $0x31c] ss:$36 sps:$4 sm:$0xff]   ;;  %v14248_v52 = vpack.c.bf16 %v118_v50, %v118_v50  ;;  %v12234_v56 = vld [vmem:[#allocation5 + $0x2d4] ss:$36 sps:$4 sm:$0xff]   ;;  %s14184_s4 = smov [#allocation14]  }
  0x69   :  { %v14246_v49 = vpack.c.bf16 %v116_v46, %v116_v46  ;;  %v12230_v53 = vld [vmem:[#allocation5 + $0x79c] ss:$36 sps:$4 sm:$0xff]   ;;  %v12236_v57 = vld [vmem:[#allocation5 + $0x754] ss:$36 sps:$4 sm:$0xff]   ;;  %v12240_v60 = vld [vmem:[#allocation5 + $0x28c] ss:$36 sps:$4 sm:$0xff]  }
  0x6a   :  { %3773 = vmatpush1.bf16.msra.mxu0 %v12184_v18  ;;  %3837 = vmatprep.mubr.bf16.mxu1 %v14248_v52  ;;  %v12232_v54 = vld [vmem:[#allocation5 + $0x318] ss:$36 sps:$4 sm:$0xff]   ;;  %v12239_v59 = vld [vmem:[#allocation5 + $0x750] ss:$36 sps:$4 sm:$0xff]   ;;  %v12244_v62 = vld [vmem:[#allocation5 + $0x288] ss:$36 sps:$4 sm:$0xff]  }
  0x6b   :  { %3814 = vmatpush1.bf16.msra.mxu1 %v12185_v19  ;;  %3774 = vmatprep.subr.bf16.mxu0 %v12186_v20  ;;  %v12233_v55 = vld [vmem:[#allocation5 + $0x798] ss:$36 sps:$4 sm:$0xff]   ;;  %v12242_v61 = vld [vmem:[#allocation5 + $0x70c] ss:$36 sps:$4 sm:$0xff]   ;;  %v12246_v0 = vld [vmem:[#allocation5 + $0x244] ss:$36 sps:$4 sm:$0xff]  }
  0x6c   :  { %3815 = vmatprep.subr.bf16.mxu1 %v12188_v21  ;;  %3796 = vmatprep.mubr.bf16.mxu0 %v14246_v49  ;;  %v12245_v63 = vld [vmem:[#allocation5 + $0x708] ss:$36 sps:$4 sm:$0xff]   ;;  %v12250_v2 = vld [vmem:[#allocation5 + $0x240] ss:$36 sps:$4 sm:$0xff]   ;;  %v117_v5 = vld [vmem:[#allocation2 + $0x10] sm:$0xff]  ;;  %s10508_s6 = sshll.u32 %s14184_s4, 4  ;;  %s10509_s6 = int_to_ptr.vmem [resolvable:$true] %s10508_s6 }
  0x6d   :  { %v12248_v1 = vld [vmem:[#allocation5 + $0x6c4] ss:$36 sps:$4 sm:$0xff]   ;;  %v12254_v6 = vld [vmem:[#allocation5 + $0xafc] ss:$36 sps:$4 sm:$0xff]   ;;  %v14254_v9 = vpack.c.bf16 %v117_v5, %v117_v5  ;;  %v12260_v12 = vld [vmem:[#allocation5 + $0xab4] ss:$36 sps:$4 sm:$0xff]   ;;  %p14145_p8 = scmp.lt.s32.totalorder %s10509_s6, %s10509_s6 }
  0x6e   :  { %3775 = vmatpush1.bf16.msra.mxu0 %v12190_v22  ;;  %v12251_v3 = vld [vmem:[#allocation5 + $0x6c0] ss:$36 sps:$4 sm:$0xff]   ;;  %v12252_v10 = vld [vmem:[#allocation5 + $0xaf8] ss:$36 sps:$4 sm:$0xff]   ;;  %v12258_v14 = vld [vmem:[#allocation5 + $0xab0] ss:$36 sps:$4 sm:$0xff]  }
  0x6f   :  { %3816 = vmatpush1.bf16.msra.mxu1 %v12191_v23  ;;  %3776 = vmatprep.subr.bf16.mxu0 %v12192_v24  ;;  %v115_v4 = vld [vmem:[#allocation2] sm:$0xff]  ;;  %v12255_v11 = vld [vmem:[#allocation5 + $0xf78] ss:$36 sps:$4 sm:$0xff]   ;;  %v12261_v15 = vld [vmem:[#allocation5 + $0xf30] ss:$36 sps:$4 sm:$0xff]   ;;  %s14140_s15 = scalar_lea.vmem %s10509_s6, 128 }
  0x70   :  { %3817 = vmatprep.subr.bf16.mxu1 %v12194_v25  ;;  %v12257_v7 = vld [vmem:[#allocation5 + $0xf7c] ss:$36 sps:$4 sm:$0xff]   ;;  %v14252_v8 = vpack.c.bf16 %v115_v4, %v115_v4  ;;  %v12263_v13 = vld [vmem:[#allocation5 + $0xf34] ss:$36 sps:$4 sm:$0xff]   ;;  %v12266_v16 = vld [vmem:[#allocation5 + $0xa6c] ss:$36 sps:$4 sm:$0xff]   ;;  %p14141_p7 = scmp.ne.s32.totalorder %s10509_s6, %s14140_s15  ;;  %p14146_p9 = scmp.lt.s32.totalorder %s14140_s15, %s14140_s15 }
  0x71   :  { %v12269_v17 = vld [vmem:[#allocation5 + $0xeec] ss:$36 sps:$4 sm:$0xff]   ;;  %v12272_v20 = vld [vmem:[#allocation5 + $0xa24] ss:$36 sps:$4 sm:$0xff]   ;;  %v12278_v24 = vld [vmem:[#allocation5 + $0x9dc] ss:$36 sps:$4 sm:$0xff]  }
  0x72   :  { %3777 = vmatpush1.bf16.msra.mxu0 %v12196_v26  ;;  %v12264_v18 = vld [vmem:[#allocation5 + $0xa68] ss:$36 sps:$4 sm:$0xff]   ;;  %v12270_v22 = vld [vmem:[#allocation5 + $0xa20] ss:$36 sps:$4 sm:$0xff]   ;;  %v12276_v26 = vld [vmem:[#allocation5 + $0x9d8] ss:$36 sps:$4 sm:$0xff]   ;;  %p14147_p10 = por %p14146_p9, %p14145_p8 }
  0x73   :  { %3818 = vmatpush1.bf16.msra.mxu1 %v12197_v27  ;;  %3778 = vmatprep.subr.bf16.mxu0 %v12198_v28  ;;  %v12267_v19 = vld [vmem:[#allocation5 + $0xee8] ss:$36 sps:$4 sm:$0xff]   ;;  %v12273_v23 = vld [vmem:[#allocation5 + $0xea0] ss:$36 sps:$4 sm:$0xff]   ;;  %v12279_v27 = vld [vmem:[#allocation5 + $0xe58] ss:$36 sps:$4 sm:$0xff]  }
  0x74   :  { %3819 = vmatprep.subr.bf16.mxu1 %v12200_v29  ;;  %v12275_v21 = vld [vmem:[#allocation5 + $0xea4] ss:$36 sps:$4 sm:$0xff]   ;;  %v12281_v25 = vld [vmem:[#allocation5 + $0xe5c] ss:$36 sps:$4 sm:$0xff]   ;;  %v12284_v28 = vld [vmem:[#allocation5 + $0x994] ss:$36 sps:$4 sm:$0xff]   ;;  %p14148_p11 = pnand %p14147_p10, %p14141_p7 }
  0x75   :  { %v12287_v29 = vld [vmem:[#allocation5 + $0xe14] ss:$36 sps:$4 sm:$0xff]  }
  0x76   :  { %3779 = vmatpush1.bf16.msra.mxu0 %v12202_v30  ;;  %v12282_v30 = vld [vmem:[#allocation5 + $0x990] ss:$36 sps:$4 sm:$0xff]   ;;  %v12300_v46 = vld [vmem:[#allocation5 + $0xd38] ss:$36 sps:$4 sm:$0xff]  }
  0x77   :  { %3820 = vmatpush1.bf16.msra.mxu1 %v12203_v31  ;;  %3780 = vmatprep.subr.bf16.mxu0 %v12204_v32  ;;  %v12285_v31 = vld [vmem:[#allocation5 + $0xe10] ss:$36 sps:$4 sm:$0xff]  }
  0x78   :  { %3821 = vmatprep.subr.bf16.mxu1 %v12206_v33  ;;  %v12290_v32 = vld [vmem:[#allocation5 + $0x94c] ss:$36 sps:$4 sm:$0xff]   ;;  %v12311_v50 = vld [vmem:[#allocation5 + $0x1174] ss:$36 sps:$4 sm:$0xff]  }
  0x79   :  { %v12293_v33 = vld [vmem:[#allocation5 + $0xdcc] ss:$36 sps:$4 sm:$0xff]  }
  0x7a   :  { %3781 = vmatpush2.bf16.msra.mxu0 %v12208_v34  ;;  %v120_v34 = vld [vmem:[#allocation2 + $0x28] sm:$0xff]  ;;  %v12330_v4 = vld [vmem:[#allocation5 + $0xbd0] ss:$36 sps:$4 sm:$0xff]  }
  0x7b   :  { %3822 = vmatpush2.bf16.msra.mxu1 %v12209_v35  ;;  %3782 = vmatprep.subr.bf16.mxu0 %v12210_v36  ;;  %v12288_v35 = vld [vmem:[#allocation5 + $0x948] ss:$36 sps:$4 sm:$0xff]   ;;  %v12333_v5 = vld [vmem:[#allocation5 + $0x1050] ss:$36 sps:$4 sm:$0xff]  }
  0x7c   :  { %3823 = vmatprep.subr.bf16.mxu1 %v12212_v37  ;;  %v12291_v36 = vld [vmem:[#allocation5 + $0xdc8] ss:$36 sps:$4 sm:$0xff]   ;;  %v14258_v37 = vpack.c.bf16 %v120_v34, %v120_v34 }
  0x7d   :  { %v12366_v34 = vld [vmem:[#allocation5 + $0x128] ss:$36 sps:$4 sm:$0xff]  }
  0x7e   :  { %3783 = vmatpush2.bf16.msra.mxu0 %v12214_v38  ;;  %v122_v38 = vld [vmem:[#allocation2 + $0x38] sm:$0xff] }
  0x7f   :  { %3824 = vmatpush2.bf16.msra.mxu1 %v12215_v39  ;;  %3784 = vmatprep.subr.bf16.mxu0 %v12216_v40  ;;  %v12296_v39 = vld [vmem:[#allocation5 + $0x904] ss:$36 sps:$4 sm:$0xff]   ;;  %v14260_v40 = vpack.c.bf16 %v122_v38, %v122_v38 }
  0x80   :  { %3825 = vmatprep.subr.bf16.mxu1 %v12218_v41  ;;  %v12299_v41 = vld [vmem:[#allocation5 + $0xd84] ss:$36 sps:$4 sm:$0xff]  }
  0x81   :  { %v12377_v38 = vld [vmem:[#allocation5 + $0x564] ss:$36 sps:$4 sm:$0xff]  }
  0x82   :  { %3785 = vmatpush2.bf16.msra.mxu0 %v12220_v42  ;;  %v12294_v42 = vld [vmem:[#allocation5 + $0x900] ss:$36 sps:$4 sm:$0xff]  }
  0x83   :  { %3826 = vmatpush2.bf16.msra.mxu1 %v12221_v43  ;;  %3786 = vmatprep.subr.bf16.mxu0 %v12222_v44  ;;  %v12297_v43 = vld [vmem:[#allocation5 + $0xd80] ss:$36 sps:$4 sm:$0xff]  }
  0x84   :  { %3827 = vmatprep.subr.bf16.mxu1 %v12224_v45  ;;  %v12302_v44 = vld [vmem:[#allocation5 + $0xd3c] ss:$36 sps:$4 sm:$0xff]  }
  0x85   :  { %v12305_v45 = vld [vmem:[#allocation5 + $0x11bc] ss:$36 sps:$4 sm:$0xff]  }
  0x86   :  { %3787 = vmatpush2.bf16.msra.mxu0 %v12226_v47  ;;  %v12303_v47 = vld [vmem:[#allocation5 + $0x11b8] ss:$36 sps:$4 sm:$0xff]  }
  0x87   :  { %3828 = vmatpush2.bf16.msra.mxu1 %v12227_v48  ;;  %3788 = vmatprep.subr.bf16.mxu0 %v12228_v51  ;;  %v12308_v48 = vld [vmem:[#allocation5 + $0xcf4] ss:$36 sps:$4 sm:$0xff]  }
  0x88   :  { %3829 = vmatprep.subr.bf16.mxu1 %v12230_v53  ;;  %v12306_v51 = vld [vmem:[#allocation5 + $0xcf0] ss:$36 sps:$4 sm:$0xff]  }
  0x89   :  { %v12309_v53 = vld [vmem:[#allocation5 + $0x1170] ss:$36 sps:$4 sm:$0xff]  }
  0x8a   :  { %3789 = vmatpush2.bf16.msra.mxu0 %v12232_v54  ;;  %v12314_v54 = vld [vmem:[#allocation5 + $0xcac] ss:$36 sps:$4 sm:$0xff]  }
  0x8b   :  { %3830 = vmatpush2.bf16.msra.mxu1 %v12233_v55  ;;  %3790 = vmatprep.subr.bf16.mxu0 %v12234_v56  ;;  %v12317_v55 = vld [vmem:[#allocation5 + $0x112c] ss:$36 sps:$4 sm:$0xff]  }
  0x8c   :  { %3831 = vmatprep.subr.bf16.mxu1 %v12236_v57  ;;  %v12312_v56 = vld [vmem:[#allocation5 + $0xca8] ss:$36 sps:$4 sm:$0xff]  }
  0x8d   :  { %v12315_v57 = vld [vmem:[#allocation5 + $0x1128] ss:$36 sps:$4 sm:$0xff]  }
  0x8e   :  { %3791 = vmatpush2.bf16.msra.mxu0 %v12238_v58  ;;  %v12320_v58 = vld [vmem:[#allocation5 + $0xc64] ss:$36 sps:$4 sm:$0xff]  }
  0x8f   :  { %3832 = vmatpush2.bf16.msra.mxu1 %v12239_v59  ;;  %3792 = vmatprep.subr.bf16.mxu0 %v12240_v60  ;;  %v12323_v59 = vld [vmem:[#allocation5 + $0x10e4] ss:$36 sps:$4 sm:$0xff]  }
  0x90   :  { %3833 = vmatprep.subr.bf16.mxu1 %v12242_v61  ;;  %v12318_v60 = vld [vmem:[#allocation5 + $0xc60] ss:$36 sps:$4 sm:$0xff]  }
  0x91   :  { %v12321_v61 = vld [vmem:[#allocation5 + $0x10e0] ss:$36 sps:$4 sm:$0xff]  }
  0x92   :  { %3793 = vmatpush2.bf16.msra.mxu0 %v12244_v62  ;;  %v12326_v62 = vld [vmem:[#allocation5 + $0xc1c] ss:$36 sps:$4 sm:$0xff]  }
  0x93   :  { %3834 = vmatpush2.bf16.msra.mxu1 %v12245_v63  ;;  %3794 = vmatprep.subr.bf16.mxu0 %v12246_v0  ;;  %v12329_v63 = vld [vmem:[#allocation5 + $0x109c] ss:$36 sps:$4 sm:$0xff]  }
  0x94   :  { %3835 = vmatprep.subr.bf16.mxu1 %v12248_v1  ;;  %v12324_v0 = vld [vmem:[#allocation5 + $0xc18] ss:$36 sps:$4 sm:$0xff]  }
  0x95   :  { %v12327_v1 = vld [vmem:[#allocation5 + $0x1098] ss:$36 sps:$4 sm:$0xff]  }
  0x96   :  { %3795 = vmatpush2.bf16.msra.mxu0 %v12250_v2  ;;  %v12332_v2 = vld [vmem:[#allocation5 + $0xbd4] ss:$36 sps:$4 sm:$0xff]  }
  0x97   :  { %3836 = vmatpush2.bf16.msra.mxu1 %v12251_v3  ;;  %3846 = vmatprep.subr.bf16.mxu0 %v12254_v6  ;;  %v12335_v3 = vld [vmem:[#allocation5 + $0x1054] ss:$36 sps:$4 sm:$0xff]   ;;  %v12338_v6 = vld [vmem:[#allocation5 + $0xb8c] ss:$36 sps:$4 sm:$0xff]  }
  0x98   :  { %3887 = vmatprep.subr.bf16.mxu1 %v12257_v7  ;;  %v12341_v7 = vld [vmem:[#allocation5 + $0x100c] ss:$36 sps:$4 sm:$0xff]  }
  0x99   :  { %3797 = vmatmul.mubr.bf16.vlgmr.msra.gmra.mxu0 %v14252_v8 }
  0x9a   :  { %3838 = vmatmul.mubr.bf16.vlgmr.msra.gmra.mxu1 %v14254_v9  ;;  %3847 = vmatpush1.bf16.msra.mxu0 %v12252_v10  ;;  %v12336_v10 = vld [vmem:[#allocation5 + $0xb88] ss:$36 sps:$4 sm:$0xff]  }
  0x9b   :  { %3888 = vmatpush1.bf16.msra.mxu1 %v12255_v11  ;;  %3848 = vmatprep.subr.bf16.mxu0 %v12260_v12  ;;  %v12339_v11 = vld [vmem:[#allocation5 + $0x1008] ss:$36 sps:$4 sm:$0xff]  }
  0x9c   :  { %3889 = vmatprep.subr.bf16.mxu1 %v12263_v13  ;;  %3878 = vmatprep.mubr.bf16.mxu0 %v14258_v37  ;;  %v12344_v12 = vld [vmem:[#allocation5 + $0xb44] ss:$36 sps:$4 sm:$0xff]  }
  0x9d   :  { %3919 = vmatprep.mubr.bf16.mxu1 %v14260_v40  ;;  %v12347_v13 = vld [vmem:[#allocation5 + $0xfc4] ss:$36 sps:$4 sm:$0xff]  }
  0x9e   :  { %3849 = vmatpush1.bf16.msra.mxu0 %v12258_v14  ;;  %v12342_v14 = vld [vmem:[#allocation5 + $0xb40] ss:$36 sps:$4 sm:$0xff]  }
  0x9f   :  { %3890 = vmatpush1.bf16.msra.mxu1 %v12261_v15  ;;  %3850 = vmatprep.subr.bf16.mxu0 %v12266_v16  ;;  %v12345_v15 = vld [vmem:[#allocation5 + $0xfc0] ss:$36 sps:$4 sm:$0xff]  }
  0xa0   :  { %3891 = vmatprep.subr.bf16.mxu1 %v12269_v17  ;;  %v119_v16 = vld [vmem:[#allocation2 + $0x20] sm:$0xff]  ;;  %v121_v17 = vld [vmem:[#allocation2 + $0x30] sm:$0xff] }
  0xa2   :  { %3851 = vmatpush1.bf16.msra.mxu0 %v12264_v18  ;;  %v12350_v18 = vld [vmem:[#allocation5 + $0x204] ss:$36 sps:$4 sm:$0xff]  }
  0xa3   :  { %3892 = vmatpush1.bf16.msra.mxu1 %v12267_v19  ;;  %3852 = vmatprep.subr.bf16.mxu0 %v12272_v20  ;;  %v12353_v19 = vld [vmem:[#allocation5 + $0x684] ss:$36 sps:$4 sm:$0xff]   ;;  %v14264_v20 = vpack.c.bf16 %v119_v16, %v119_v16  ;;  %v12426_v16 = vld [vmem:[#allocation5 + $0x2d8] ss:$36 sps:$4 sm:$0xff]  }
  0xa4   :  { %3893 = vmatprep.subr.bf16.mxu1 %v12275_v21  ;;  %v14266_v21 = vpack.c.bf16 %v121_v17, %v121_v17  ;;  %v12429_v17 = vld [vmem:[#allocation5 + $0x758] ss:$36 sps:$4 sm:$0xff]  }
  0xa6   :  { %3853 = vmatpush1.bf16.msra.mxu0 %v12270_v22  ;;  %v12348_v22 = vld [vmem:[#allocation5 + $0x200] ss:$36 sps:$4 sm:$0xff]  }
  0xa7   :  { %3894 = vmatpush1.bf16.msra.mxu1 %v12273_v23  ;;  %3854 = vmatprep.subr.bf16.mxu0 %v12278_v24  ;;  %v12351_v23 = vld [vmem:[#allocation5 + $0x680] ss:$36 sps:$4 sm:$0xff]  }
  0xa8   :  { %3895 = vmatprep.subr.bf16.mxu1 %v12281_v25  ;;  %v12356_v24 = vld [vmem:[#allocation5 + $0x1bc] ss:$36 sps:$4 sm:$0xff]  }
  0xa9   :  { %v12359_v25 = vld [vmem:[#allocation5 + $0x63c] ss:$36 sps:$4 sm:$0xff]  }
  0xaa   :  { %3855 = vmatpush1.bf16.msra.mxu0 %v12276_v26  ;;  %v12354_v26 = vld [vmem:[#allocation5 + $0x1b8] ss:$36 sps:$4 sm:$0xff]  }
  0xab   :  { %3896 = vmatpush1.bf16.msra.mxu1 %v12279_v27  ;;  %3856 = vmatprep.subr.bf16.mxu0 %v12284_v28  ;;  %v12357_v27 = vld [vmem:[#allocation5 + $0x638] ss:$36 sps:$4 sm:$0xff]  }
  0xac   :  { %3897 = vmatprep.subr.bf16.mxu1 %v12287_v29  ;;  %v12362_v28 = vld [vmem:[#allocation5 + $0x174] ss:$36 sps:$4 sm:$0xff]  }
  0xad   :  { %v12365_v29 = vld [vmem:[#allocation5 + $0x5f4] ss:$36 sps:$4 sm:$0xff]  }
  0xae   :  { %3857 = vmatpush1.bf16.msra.mxu0 %v12282_v30  ;;  %v12360_v30 = vld [vmem:[#allocation5 + $0x170] ss:$36 sps:$4 sm:$0xff]  }
  0xaf   :  { %3898 = vmatpush1.bf16.msra.mxu1 %v12285_v31  ;;  %3858 = vmatprep.subr.bf16.mxu0 %v12290_v32  ;;  %v12363_v31 = vld [vmem:[#allocation5 + $0x5f0] ss:$36 sps:$4 sm:$0xff]  }
  0xb0   :  { %3899 = vmatprep.subr.bf16.mxu1 %v12293_v33  ;;  %v12368_v32 = vld [vmem:[#allocation5 + $0x12c] ss:$36 sps:$4 sm:$0xff]  }
  0xb1   :  { %v12371_v33 = vld [vmem:[#allocation5 + $0x5ac] ss:$36 sps:$4 sm:$0xff]  }
  0xb2   :  { %3859 = vmatpush1.bf16.msra.mxu0 %v12288_v35  ;;  %v12369_v35 = vld [vmem:[#allocation5 + $0x5a8] ss:$36 sps:$4 sm:$0xff]  }
  0xb3   :  { %3900 = vmatpush1.bf16.msra.mxu1 %v12291_v36  ;;  %3860 = vmatprep.subr.bf16.mxu0 %v12296_v39  ;;  %v12374_v36 = vld [vmem:[#allocation5 + $0xe4] ss:$36 sps:$4 sm:$0xff]  }
  0xb4   :  { %3901 = vmatprep.subr.bf16.mxu1 %v12299_v41  ;;  %v12372_v39 = vld [vmem:[#allocation5 + $0xe0] ss:$36 sps:$4 sm:$0xff]  }
  0xb5   :  { %v12375_v41 = vld [vmem:[#allocation5 + $0x560] ss:$36 sps:$4 sm:$0xff]  }
  0xb6   :  { %3861 = vmatpush1.bf16.msra.mxu0 %v12294_v42  ;;  %v12380_v42 = vld [vmem:[#allocation5 + $0x9c] ss:$36 sps:$4 sm:$0xff]  }
  0xb7   :  { %3902 = vmatpush1.bf16.msra.mxu1 %v12297_v43  ;;  %3862 = vmatprep.subr.bf16.mxu0 %v12302_v44  ;;  %v12383_v43 = vld [vmem:[#allocation5 + $0x51c] ss:$36 sps:$4 sm:$0xff]  }
  0xb8   :  { %3903 = vmatprep.subr.bf16.mxu1 %v12305_v45  ;;  %v12378_v44 = vld [vmem:[#allocation5 + $0x98] ss:$36 sps:$4 sm:$0xff]  }
  0xb9   :  { %v12381_v45 = vld [vmem:[#allocation5 + $0x518] ss:$36 sps:$4 sm:$0xff]  }
  0xba   :  { %3863 = vmatpush2.bf16.msra.mxu0 %v12300_v46  ;;  %v12386_v46 = vld [vmem:[#allocation5 + $0x54] ss:$36 sps:$4 sm:$0xff]  }
  0xbb   :  { %3904 = vmatpush2.bf16.msra.mxu1 %v12303_v47  ;;  %3864 = vmatprep.subr.bf16.mxu0 %v12308_v48  ;;  %v12389_v47 = vld [vmem:[#allocation5 + $0x4d4] ss:$36 sps:$4 sm:$0xff]  }
  0xbc   :  { %3905 = vmatprep.subr.bf16.mxu1 %v12311_v50  ;;  %v12384_v48 = vld [vmem:[#allocation5 + $0x50] ss:$36 sps:$4 sm:$0xff]  }
  0xbd   :  { %v12387_v50 = vld [vmem:[#allocation5 + $0x4d0] ss:$36 sps:$4 sm:$0xff]  }
  0xbe   :  { %3865 = vmatpush2.bf16.msra.mxu0 %v12306_v51  ;;  %v12392_v51 = vld [vmem:[#allocation5 + $0xc] ss:$36 sps:$4 sm:$0xff]  }
  0xbf   :  { %3906 = vmatpush2.bf16.msra.mxu1 %v12309_v53  ;;  %3866 = vmatprep.subr.bf16.mxu0 %v12314_v54  ;;  %v12395_v53 = vld [vmem:[#allocation5 + $0x48c] ss:$36 sps:$4 sm:$0xff]  }
  0xc0   :  { %3907 = vmatprep.subr.bf16.mxu1 %v12317_v55  ;;  %v12390_v54 = vld [vmem:[#allocation5 + $0x8] ss:$36 sps:$4 sm:$0xff]  }
  0xc1   :  { %v12393_v55 = vld [vmem:[#allocation5 + $0x488] ss:$36 sps:$4 sm:$0xff]  }
  0xc2   :  { %3867 = vmatpush2.bf16.msra.mxu0 %v12312_v56  ;;  %v12398_v56 = vld [vmem:[#allocation5 + $0x444] ss:$36 sps:$4 sm:$0xff]  }
  0xc3   :  { %3908 = vmatpush2.bf16.msra.mxu1 %v12315_v57  ;;  %3868 = vmatprep.subr.bf16.mxu0 %v12320_v58  ;;  %v12401_v57 = vld [vmem:[#allocation5 + $0x8c4] ss:$36 sps:$4 sm:$0xff]  }
  0xc4   :  { %3909 = vmatprep.subr.bf16.mxu1 %v12323_v59  ;;  %v12396_v58 = vld [vmem:[#allocation5 + $0x440] ss:$36 sps:$4 sm:$0xff]  }
  0xc5   :  { %v12399_v59 = vld [vmem:[#allocation5 + $0x8c0] ss:$36 sps:$4 sm:$0xff]  }
  0xc6   :  { %3869 = vmatpush2.bf16.msra.mxu0 %v12318_v60  ;;  %v12404_v60 = vld [vmem:[#allocation5 + $0x3fc] ss:$36 sps:$4 sm:$0xff]  }
  0xc7   :  { %3910 = vmatpush2.bf16.msra.mxu1 %v12321_v61  ;;  %3870 = vmatprep.subr.bf16.mxu0 %v12326_v62  ;;  %v12407_v61 = vld [vmem:[#allocation5 + $0x87c] ss:$36 sps:$4 sm:$0xff]  }
  0xc8   :  { %3911 = vmatprep.subr.bf16.mxu1 %v12329_v63  ;;  %v12402_v62 = vld [vmem:[#allocation5 + $0x3f8] ss:$36 sps:$4 sm:$0xff]  }
  0xc9   :  { %v12405_v63 = vld [vmem:[#allocation5 + $0x878] ss:$36 sps:$4 sm:$0xff]  }
  0xca   :  { %3871 = vmatpush2.bf16.msra.mxu0 %v12324_v0  ;;  %v12410_v0 = vld [vmem:[#allocation5 + $0x3b4] ss:$36 sps:$4 sm:$0xff]  }
  0xcb   :  { %3912 = vmatpush2.bf16.msra.mxu1 %v12327_v1  ;;  %3872 = vmatprep.subr.bf16.mxu0 %v12332_v2  ;;  %v12413_v1 = vld [vmem:[#allocation5 + $0x834] ss:$36 sps:$4 sm:$0xff]  }
  0xcc   :  { %3913 = vmatprep.subr.bf16.mxu1 %v12335_v3  ;;  %v12408_v2 = vld [vmem:[#allocation5 + $0x3b0] ss:$36 sps:$4 sm:$0xff]  }
  0xcd   :  { %v12411_v3 = vld [vmem:[#allocation5 + $0x830] ss:$36 sps:$4 sm:$0xff]  }
  0xce   :  { %3873 = vmatpush2.bf16.msra.mxu0 %v12330_v4  ;;  %v12416_v4 = vld [vmem:[#allocation5 + $0x36c] ss:$36 sps:$4 sm:$0xff]  }
  0xcf   :  { %3914 = vmatpush2.bf16.msra.mxu1 %v12333_v5  ;;  %3874 = vmatprep.subr.bf16.mxu0 %v12338_v6  ;;  %v12419_v5 = vld [vmem:[#allocation5 + $0x7ec] ss:$36 sps:$4 sm:$0xff]  }
  0xd0   :  { %3915 = vmatprep.subr.bf16.mxu1 %v12341_v7  ;;  %v12414_v6 = vld [vmem:[#allocation5 + $0x368] ss:$36 sps:$4 sm:$0xff]  }
  0xd1   :  { %v12417_v7 = vld [vmem:[#allocation5 + $0x7e8] ss:$36 sps:$4 sm:$0xff]  }
  0xd2   :  { %3875 = vmatpush2.bf16.msra.mxu0 %v12336_v10  ;;  %v12422_v10 = vld [vmem:[#allocation5 + $0x324] ss:$36 sps:$4 sm:$0xff]  }
  0xd3   :  { %3916 = vmatpush2.bf16.msra.mxu1 %v12339_v11  ;;  %3876 = vmatprep.subr.bf16.mxu0 %v12344_v12  ;;  %v12425_v11 = vld [vmem:[#allocation5 + $0x7a4] ss:$36 sps:$4 sm:$0xff]  }
  0xd4   :  { %3917 = vmatprep.subr.bf16.mxu1 %v12347_v13  ;;  %v12420_v12 = vld [vmem:[#allocation5 + $0x320] ss:$36 sps:$4 sm:$0xff]  }
  0xd5   :  { %v12423_v13 = vld [vmem:[#allocation5 + $0x7a0] ss:$36 sps:$4 sm:$0xff]  }
  0xd6   :  { %3877 = vmatpush2.bf16.msra.mxu0 %v12342_v14  ;;  %v12428_v14 = vld [vmem:[#allocation5 + $0x2dc] ss:$36 sps:$4 sm:$0xff]  }
  0xd7   :  { %3918 = vmatpush2.bf16.msra.mxu1 %v12345_v15  ;;  %3928 = vmatprep.subr.bf16.mxu0 %v12350_v18  ;;  %v12431_v15 = vld [vmem:[#allocation5 + $0x75c] ss:$36 sps:$4 sm:$0xff]   ;;  %v12434_v18 = vld [vmem:[#allocation5 + $0x294] ss:$36 sps:$4 sm:$0xff]  }
  0xd8   :  { %3969 = vmatprep.subr.bf16.mxu1 %v12353_v19  ;;  %v12437_v19 = vld [vmem:[#allocation5 + $0x714] ss:$36 sps:$4 sm:$0xff]  }
  0xd9   :  { %3879 = vmatmul.mubr.bf16.vlgmr.msra.gmra.mxu0 %v14264_v20 }
  0xda   :  { %3920 = vmatmul.mubr.bf16.vlgmr.msra.gmra.mxu1 %v14266_v21  ;;  %3929 = vmatpush1.bf16.msra.mxu0 %v12348_v22  ;;  %v12432_v22 = vld [vmem:[#allocation5 + $0x290] ss:$36 sps:$4 sm:$0xff]  }
  0xdb   :  { %3970 = vmatpush1.bf16.msra.mxu1 %v12351_v23  ;;  %3930 = vmatprep.subr.bf16.mxu0 %v12356_v24  ;;  %v12435_v23 = vld [vmem:[#allocation5 + $0x710] ss:$36 sps:$4 sm:$0xff]  }
  0xdc   :  { %3971 = vmatprep.subr.bf16.mxu1 %v12359_v25  ;;  %3960 = vmatprep.mubr.bf16.mxu0 %v14246_v49  ;;  %v12440_v24 = vld [vmem:[#allocation5 + $0x24c] ss:$36 sps:$4 sm:$0xff]  }
  0xdd   :  { %4001 = vmatprep.mubr.bf16.mxu1 %v14248_v52  ;;  %v12443_v25 = vld [vmem:[#allocation5 + $0x6cc] ss:$36 sps:$4 sm:$0xff]  }
  0xde   :  { %3931 = vmatpush1.bf16.msra.mxu0 %v12354_v26  ;;  %v12438_v26 = vld [vmem:[#allocation5 + $0x248] ss:$36 sps:$4 sm:$0xff]  }
  0xdf   :  { %3972 = vmatpush1.bf16.msra.mxu1 %v12357_v27  ;;  %3932 = vmatprep.subr.bf16.mxu0 %v12362_v28  ;;  %v12441_v27 = vld [vmem:[#allocation5 + $0x6c8] ss:$36 sps:$4 sm:$0xff]  }
  0xe0   :  { %3973 = vmatprep.subr.bf16.mxu1 %v12365_v29  ;;  %v12446_v28 = vld [vmem:[#allocation5 + $0xb04] ss:$36 sps:$4 sm:$0xff]  }
  0xe1   :  { %v12449_v29 = vld [vmem:[#allocation5 + $0xf84] ss:$36 sps:$4 sm:$0xff]  }
  0xe2   :  { %3933 = vmatpush1.bf16.msra.mxu0 %v12360_v30  ;;  %v12444_v30 = vld [vmem:[#allocation5 + $0xb00] ss:$36 sps:$4 sm:$0xff]  }
  0xe3   :  { %3974 = vmatpush1.bf16.msra.mxu1 %v12363_v31  ;;  %3934 = vmatprep.subr.bf16.mxu0 %v12368_v32  ;;  %v12447_v31 = vld [vmem:[#allocation5 + $0xf80] ss:$36 sps:$4 sm:$0xff]  }
  0xe4   :  { %3975 = vmatprep.subr.bf16.mxu1 %v12371_v33  ;;  %v12452_v32 = vld [vmem:[#allocation5 + $0xabc] ss:$36 sps:$4 sm:$0xff]  }
  0xe5   :  { %v12455_v33 = vld [vmem:[#allocation5 + $0xf3c] ss:$36 sps:$4 sm:$0xff]  }
  0xe6   :  { %3935 = vmatpush1.bf16.msra.mxu0 %v12366_v34  ;;  %v12450_v34 = vld [vmem:[#allocation5 + $0xab8] ss:$36 sps:$4 sm:$0xff]  }
  0xe7   :  { %3976 = vmatpush1.bf16.msra.mxu1 %v12369_v35  ;;  %3936 = vmatprep.subr.bf16.mxu0 %v12374_v36  ;;  %v12453_v35 = vld [vmem:[#allocation5 + $0xf38] ss:$36 sps:$4 sm:$0xff]  }
  0xe8   :  { %3977 = vmatprep.subr.bf16.mxu1 %v12377_v38  ;;  %v12458_v36 = vld [vmem:[#allocation5 + $0xa74] ss:$36 sps:$4 sm:$0xff]  }
  0xe9   :  { %v12461_v38 = vld [vmem:[#allocation5 + $0xef4] ss:$36 sps:$4 sm:$0xff]  }
  0xea   :  { %3937 = vmatpush1.bf16.msra.mxu0 %v12372_v39  ;;  %v12456_v39 = vld [vmem:[#allocation5 + $0xa70] ss:$36 sps:$4 sm:$0xff]  }
  0xeb   :  { %3978 = vmatpush1.bf16.msra.mxu1 %v12375_v41  ;;  %3938 = vmatprep.subr.bf16.mxu0 %v12380_v42  ;;  %v12459_v41 = vld [vmem:[#allocation5 + $0xef0] ss:$36 sps:$4 sm:$0xff]  }
  0xec   :  { %3979 = vmatprep.subr.bf16.mxu1 %v12383_v43  ;;  %v12464_v42 = vld [vmem:[#allocation5 + $0xa2c] ss:$36 sps:$4 sm:$0xff]  }
  0xed   :  { %v12467_v43 = vld [vmem:[#allocation5 + $0xeac] ss:$36 sps:$4 sm:$0xff]  }
  0xee   :  { %3939 = vmatpush1.bf16.msra.mxu0 %v12378_v44  ;;  %v12462_v44 = vld [vmem:[#allocation5 + $0xa28] ss:$36 sps:$4 sm:$0xff]  }
  0xef   :  { %3980 = vmatpush1.bf16.msra.mxu1 %v12381_v45  ;;  %3940 = vmatprep.subr.bf16.mxu0 %v12386_v46  ;;  %v12465_v45 = vld [vmem:[#allocation5 + $0xea8] ss:$36 sps:$4 sm:$0xff]  }
  0xf0   :  { %3981 = vmatprep.subr.bf16.mxu1 %v12389_v47  ;;  %v12470_v46 = vld [vmem:[#allocation5 + $0x9e4] ss:$36 sps:$4 sm:$0xff]  }
  0xf1   :  { %v12473_v47 = vld [vmem:[#allocation5 + $0xe64] ss:$36 sps:$4 sm:$0xff]  }
  0xf2   :  { %3941 = vmatpush1.bf16.msra.mxu0 %v12384_v48  ;;  %v12468_v48 = vld [vmem:[#allocation5 + $0x9e0] ss:$36 sps:$4 sm:$0xff]  }
  0xf3   :  { %3982 = vmatpush1.bf16.msra.mxu1 %v12387_v50  ;;  %3942 = vmatprep.subr.bf16.mxu0 %v12392_v51  ;;  %v12471_v50 = vld [vmem:[#allocation5 + $0xe60] ss:$36 sps:$4 sm:$0xff]  }
  0xf4   :  { %3983 = vmatprep.subr.bf16.mxu1 %v12395_v53  ;;  %v12476_v51 = vld [vmem:[#allocation5 + $0x99c] ss:$36 sps:$4 sm:$0xff]  }
  0xf5   :  { %v12479_v53 = vld [vmem:[#allocation5 + $0xe1c] ss:$36 sps:$4 sm:$0xff]  }
  0xf6   :  { %3943 = vmatpush1.bf16.msra.mxu0 %v12390_v54  ;;  %v12474_v54 = vld [vmem:[#allocation5 + $0x998] ss:$36 sps:$4 sm:$0xff]  }
  0xf7   :  { %3984 = vmatpush1.bf16.msra.mxu1 %v12393_v55  ;;  %3944 = vmatprep.subr.bf16.mxu0 %v12398_v56  ;;  %v12477_v55 = vld [vmem:[#allocation5 + $0xe18] ss:$36 sps:$4 sm:$0xff]  }
  0xf8   :  { %3985 = vmatprep.subr.bf16.mxu1 %v12401_v57  ;;  %v12482_v56 = vld [vmem:[#allocation5 + $0x954] ss:$36 sps:$4 sm:$0xff]  }
  0xf9   :  { %v12485_v57 = vld [vmem:[#allocation5 + $0xdd4] ss:$36 sps:$4 sm:$0xff]  }
  0xfa   :  { %3945 = vmatpush2.bf16.msra.mxu0 %v12396_v58  ;;  %v12480_v58 = vld [vmem:[#allocation5 + $0x950] ss:$36 sps:$4 sm:$0xff]  }
  0xfb   :  { %3986 = vmatpush2.bf16.msra.mxu1 %v12399_v59  ;;  %3946 = vmatprep.subr.bf16.mxu0 %v12404_v60  ;;  %v12483_v59 = vld [vmem:[#allocation5 + $0xdd0] ss:$36 sps:$4 sm:$0xff]  }
  0xfc   :  { %3987 = vmatprep.subr.bf16.mxu1 %v12407_v61  ;;  %v12488_v60 = vld [vmem:[#allocation5 + $0x90c] ss:$36 sps:$4 sm:$0xff]  }
  0xfd   :  { %v12491_v61 = vld [vmem:[#allocation5 + $0xd8c] ss:$36 sps:$4 sm:$0xff]  }
  0xfe   :  { %3947 = vmatpush2.bf16.msra.mxu0 %v12402_v62  ;;  %v12486_v62 = vld [vmem:[#allocation5 + $0x908] ss:$36 sps:$4 sm:$0xff]  }
  0xff   :  { %3988 = vmatpush2.bf16.msra.mxu1 %v12405_v63  ;;  %3948 = vmatprep.subr.bf16.mxu0 %v12410_v0  ;;  %v12489_v63 = vld [vmem:[#allocation5 + $0xd88] ss:$36 sps:$4 sm:$0xff]  }
 0x100   :  { %3989 = vmatprep.subr.bf16.mxu1 %v12413_v1  ;;  %v12494_v0 = vld [vmem:[#allocation5 + $0xd44] ss:$36 sps:$4 sm:$0xff]  }
 0x101   :  { %v12497_v1 = vld [vmem:[#allocation5 + $0x11c4] ss:$36 sps:$4 sm:$0xff]  }
 0x102   :  { %3949 = vmatpush2.bf16.msra.mxu0 %v12408_v2  ;;  %v12492_v2 = vld [vmem:[#allocation5 + $0xd40] ss:$36 sps:$4 sm:$0xff]  }
 0x103   :  { %3990 = vmatpush2.bf16.msra.mxu1 %v12411_v3  ;;  %3950 = vmatprep.subr.bf16.mxu0 %v12416_v4  ;;  %v12495_v3 = vld [vmem:[#allocation5 + $0x11c0] ss:$36 sps:$4 sm:$0xff]  }
 0x104   :  { %3991 = vmatprep.subr.bf16.mxu1 %v12419_v5  ;;  %v12500_v4 = vld [vmem:[#allocation5 + $0xcfc] ss:$36 sps:$4 sm:$0xff]  }
 0x105   :  { %v12503_v5 = vld [vmem:[#allocation5 + $0x117c] ss:$36 sps:$4 sm:$0xff]  }
 0x106   :  { %3951 = vmatpush2.bf16.msra.mxu0 %v12414_v6  ;;  %v12498_v6 = vld [vmem:[#allocation5 + $0xcf8] ss:$36 sps:$4 sm:$0xff]  }
 0x107   :  { %3992 = vmatpush2.bf16.msra.mxu1 %v12417_v7  ;;  %3952 = vmatprep.subr.bf16.mxu0 %v12422_v10  ;;  %v12501_v7 = vld [vmem:[#allocation5 + $0x1178] ss:$36 sps:$4 sm:$0xff]  }
 0x108   :  { %3993 = vmatprep.subr.bf16.mxu1 %v12425_v11  ;;  %v12506_v10 = vld [vmem:[#allocation5 + $0xcb4] ss:$36 sps:$4 sm:$0xff]  }
 0x109   :  { %v12509_v11 = vld [vmem:[#allocation5 + $0x1134] ss:$36 sps:$4 sm:$0xff]  }
 0x10a   :  { %3953 = vmatpush2.bf16.msra.mxu0 %v12420_v12  ;;  %v12504_v12 = vld [vmem:[#allocation5 + $0xcb0] ss:$36 sps:$4 sm:$0xff]  }
 0x10b   :  { %3994 = vmatpush2.bf16.msra.mxu1 %v12423_v13  ;;  %3954 = vmatprep.subr.bf16.mxu0 %v12428_v14  ;;  %v12507_v13 = vld [vmem:[#allocation5 + $0x1130] ss:$36 sps:$4 sm:$0xff]  }
 0x10c   :  { %3995 = vmatprep.subr.bf16.mxu1 %v12431_v15  ;;  %v12512_v14 = vld [vmem:[#allocation5 + $0xc6c] ss:$36 sps:$4 sm:$0xff]  }
 0x10d   :  { %v12515_v15 = vld [vmem:[#allocation5 + $0x10ec] ss:$36 sps:$4 sm:$0xff]  }
 0x10e   :  { %3955 = vmatpush2.bf16.msra.mxu0 %v12426_v16  ;;  %v12510_v16 = vld [vmem:[#allocation5 + $0xc68] ss:$36 sps:$4 sm:$0xff]  }
 0x10f   :  { %3996 = vmatpush2.bf16.msra.mxu1 %v12429_v17  ;;  %3956 = vmatprep.subr.bf16.mxu0 %v12434_v18  ;;  %v12513_v17 = vld [vmem:[#allocation5 + $0x10e8] ss:$36 sps:$4 sm:$0xff]  }
 0x110   :  { %3997 = vmatprep.subr.bf16.mxu1 %v12437_v19  ;;  %v12518_v18 = vld [vmem:[#allocation5 + $0xc24] ss:$36 sps:$4 sm:$0xff]  }
 0x111   :  { %v12521_v19 = vld [vmem:[#allocation5 + $0x10a4] ss:$36 sps:$4 sm:$0xff]  }
 0x112   :  { %3957 = vmatpush2.bf16.msra.mxu0 %v12432_v22  ;;  %v12516_v22 = vld [vmem:[#allocation5 + $0xc20] ss:$36 sps:$4 sm:$0xff]  }
 0x113   :  { %3998 = vmatpush2.bf16.msra.mxu1 %v12435_v23  ;;  %3958 = vmatprep.subr.bf16.mxu0 %v12440_v24  ;;  %v12519_v23 = vld [vmem:[#allocation5 + $0x10a0] ss:$36 sps:$4 sm:$0xff]  }
 0x114   :  { %3999 = vmatprep.subr.bf16.mxu1 %v12443_v25  ;;  %v12524_v24 = vld [vmem:[#allocation5 + $0xbdc] ss:$36 sps:$4 sm:$0xff]  }
 0x115   :  { %v12527_v25 = vld [vmem:[#allocation5 + $0x105c] ss:$36 sps:$4 sm:$0xff]  }
 0x116   :  { %3959 = vmatpush2.bf16.msra.mxu0 %v12438_v26  ;;  %v12522_v26 = vld [vmem:[#allocation5 + $0xbd8] ss:$36 sps:$4 sm:$0xff]  }
 0x117   :  { %4000 = vmatpush2.bf16.msra.mxu1 %v12441_v27  ;;  %4010 = vmatprep.subr.bf16.mxu0 %v12446_v28  ;;  %v12525_v27 = vld [vmem:[#allocation5 + $0x1058] ss:$36 sps:$4 sm:$0xff]   ;;  %v775_v28 = vlaneseq }
 0x118   :  { %4051 = vmatprep.subr.bf16.mxu1 %v12449_v29  ;;  %v12530_v29 = vld [vmem:[#allocation5 + $0xb94] ss:$36 sps:$4 sm:$0xff]  }
 0x119   :  { %3961 = vmatmul.mubr.bf16.vlgmr.msra.gmra.mxu0 %v14252_v8 }
 0x11a   :  { %4002 = vmatmul.mubr.bf16.vlgmr.msra.gmra.mxu1 %v14254_v9  ;;  %4011 = vmatpush1.bf16.msra.mxu0 %v12444_v30  ;;  %v12533_v30 = vld [vmem:[#allocation5 + $0x1014] ss:$36 sps:$4 sm:$0xff]  }
 0x11b   :  { %4052 = vmatpush1.bf16.msra.mxu1 %v12447_v31  ;;  %4012 = vmatprep.subr.bf16.mxu0 %v12452_v32  ;;  %v12528_v31 = vld [vmem:[#allocation5 + $0xb90] ss:$36 sps:$4 sm:$0xff]  }
 0x11c   :  { %4053 = vmatprep.subr.bf16.mxu1 %v12455_v33  ;;  %4042 = vmatprep.mubr.bf16.mxu0 %v14258_v37  ;;  %v12531_v32 = vld [vmem:[#allocation5 + $0x1010] ss:$36 sps:$4 sm:$0xff]   ;;  %v14276_v33 = vshrl.u32 %v775_v28, 7 }
 0x11d   :  { %4083 = vmatprep.mubr.bf16.mxu1 %v14260_v40  ;;  %v12587_v28 = vld [vmem:[#allocation5 + $0x494] ss:$36 sps:$4 sm:$0xff]  }
 0x11e   :  { %4013 = vmatpush1.bf16.msra.mxu0 %v12450_v34  ;;  %v12536_v34 = vld [vmem:[#allocation5 + $0xb4c] ss:$36 sps:$4 sm:$0xff]  }
 0x11f   :  { %4054 = vmatpush1.bf16.msra.mxu1 %v12453_v35  ;;  %4014 = vmatprep.subr.bf16.mxu0 %v12458_v36  ;;  %v12539_v35 = vld [vmem:[#allocation5 + $0xfcc] ss:$36 sps:$4 sm:$0xff]  }
 0x120   :  { %4055 = vmatprep.subr.bf16.mxu1 %v12461_v38  ;;  %v12534_v36 = vld [vmem:[#allocation5 + $0xb48] ss:$36 sps:$4 sm:$0xff]  }
 0x121   :  { %v12537_v38 = vld [vmem:[#allocation5 + $0xfc8] ss:$36 sps:$4 sm:$0xff]  }
 0x122   :  { %4015 = vmatpush1.bf16.msra.mxu0 %v12456_v39  ;;  %v771_v39 = vld [vmem:[#allocation7] sm:$0xff] }
 0x123   :  { %4056 = vmatpush1.bf16.msra.mxu1 %v12459_v41  ;;  %4016 = vmatprep.subr.bf16.mxu0 %v12464_v42  ;;  %v777_v41 = vsub.s32 0, %v14276_v33  ;;  %v12542_v42 = vld [vmem:[#allocation5 + $0x20c] ss:$36 sps:$4 sm:$0xff]  }
 0x124   :  { %4057 = vmatprep.subr.bf16.mxu1 %v12467_v43  ;;  %v12545_v43 = vld [vmem:[#allocation5 + $0x68c] ss:$36 sps:$4 sm:$0xff]  }
 0x126   :  { %4017 = vmatpush1.bf16.msra.mxu0 %v12462_v44  ;;  %v781_v44 = vsub.s32 1, %v14276_v33 }
 0x127   :  { %4058 = vmatpush1.bf16.msra.mxu1 %v12465_v45  ;;  %4018 = vmatprep.subr.bf16.mxu0 %v12470_v46  ;;  %v12540_v45 = vld [vmem:[#allocation5 + $0x208] ss:$36 sps:$4 sm:$0xff]   ;;  %v778_v46 = vrot.slane %v771_v39, %v777_v41 }
 0x128   :  { %4059 = vmatprep.subr.bf16.mxu1 %v12473_v47  ;;  %v12543_v47 = vld [vmem:[#allocation5 + $0x688] ss:$36 sps:$4 sm:$0xff]  }
 0x12a   :  { %4019 = vmatpush1.bf16.msra.mxu0 %v12468_v48  ;;  %v12548_v48 = vld [vmem:[#allocation5 + $0x1c4] ss:$36 sps:$4 sm:$0xff]  }
 0x12b   :  { %4060 = vmatpush1.bf16.msra.mxu1 %v12471_v50  ;;  %4020 = vmatprep.subr.bf16.mxu0 %v12476_v51  ;;  %v12551_v50 = vld [vmem:[#allocation5 + $0x644] ss:$36 sps:$4 sm:$0xff]   ;;  %v782_v51 = vrot.slane %v771_v39, %v781_v44 }
 0x12c   :  { %4061 = vmatprep.subr.bf16.mxu1 %v12479_v53  ;;  %v12594_v39 = vld [vmem:[#allocation5 + $0x400] ss:$36 sps:$4 sm:$0xff]  }
 0x12e   :  { %4021 = vmatpush1.bf16.msra.mxu0 %v12474_v54 }
 0x12f   :  { %4062 = vmatpush1.bf16.msra.mxu1 %v12477_v55  ;;  %4022 = vmatprep.subr.bf16.mxu0 %v12482_v56  ;;  %v12546_v55 = vld [vmem:[#allocation5 + $0x1c0] ss:$36 sps:$4 sm:$0xff]  }
 0x130   :  { %4063 = vmatprep.subr.bf16.mxu1 %v12485_v57  ;;  %v12549_v57 = vld [vmem:[#allocation5 + $0x640] ss:$36 sps:$4 sm:$0xff]  }
 0x132   :  { %4023 = vmatpush1.bf16.msra.mxu0 %v12480_v58 }
 0x133   :  { %4064 = vmatpush1.bf16.msra.mxu1 %v12483_v59  ;;  %4024 = vmatprep.subr.bf16.mxu0 %v12488_v60  ;;  %v12554_v60 = vld [vmem:[#allocation5 + $0x17c] ss:$36 sps:$4 sm:$0xff]  }
 0x134   :  { %4065 = vmatprep.subr.bf16.mxu1 %v12491_v61  ;;  %v12557_v61 = vld [vmem:[#allocation5 + $0x5fc] ss:$36 sps:$4 sm:$0xff]  }
 0x136   :  { %4025 = vmatpush1.bf16.msra.mxu0 %v12486_v62 }
 0x137   :  { %4066 = vmatpush1.bf16.msra.mxu1 %v12489_v63  ;;  %4026 = vmatprep.subr.bf16.mxu0 %v12494_v0 }
 0x138   :  { %4067 = vmatprep.subr.bf16.mxu1 %v12497_v1 }
 0x13a   :  { %4027 = vmatpush2.bf16.msra.mxu0 %v12492_v2  ;;  %v12552_v2 = vld [vmem:[#allocation5 + $0x178] ss:$36 sps:$4 sm:$0xff]  }
 0x13b   :  { %4068 = vmatpush2.bf16.msra.mxu1 %v12495_v3  ;;  %4028 = vmatprep.subr.bf16.mxu0 %v12500_v4  ;;  %v12555_v4 = vld [vmem:[#allocation5 + $0x5f8] ss:$36 sps:$4 sm:$0xff]  }
 0x13c   :  { %4069 = vmatprep.subr.bf16.mxu1 %v12503_v5 }
 0x13e   :  { %4029 = vmatpush2.bf16.msra.mxu0 %v12498_v6 }
 0x13f   :  { %4070 = vmatpush2.bf16.msra.mxu1 %v12501_v7  ;;  %4030 = vmatprep.subr.bf16.mxu0 %v12506_v10  ;;  %v12560_v7 = vld [vmem:[#allocation5 + $0x134] ss:$36 sps:$4 sm:$0xff]  }
 0x140   :  { %4071 = vmatprep.subr.bf16.mxu1 %v12509_v11  ;;  %v12563_v10 = vld [vmem:[#allocation5 + $0x5b4] ss:$36 sps:$4 sm:$0xff]  }
 0x141   :  { %v12558_v11 = vld [vmem:[#allocation5 + $0x130] ss:$36 sps:$4 sm:$0xff]  }
 0x142   :  { %4031 = vmatpush2.bf16.msra.mxu0 %v12504_v12  ;;  %v12561_v12 = vld [vmem:[#allocation5 + $0x5b0] ss:$36 sps:$4 sm:$0xff]  }
 0x143   :  { %4072 = vmatpush2.bf16.msra.mxu1 %v12507_v13  ;;  %4032 = vmatprep.subr.bf16.mxu0 %v12512_v14  ;;  %v12566_v13 = vld [vmem:[#allocation5 + $0xec] ss:$36 sps:$4 sm:$0xff]  }
 0x144   :  { %4073 = vmatprep.subr.bf16.mxu1 %v12515_v15  ;;  %v12569_v14 = vld [vmem:[#allocation5 + $0x56c] ss:$36 sps:$4 sm:$0xff]  }
 0x145   :  { %v12564_v15 = vld [vmem:[#allocation5 + $0xe8] ss:$36 sps:$4 sm:$0xff]  }
 0x146   :  { %4033 = vmatpush2.bf16.msra.mxu0 %v12510_v16  ;;  %v12567_v16 = vld [vmem:[#allocation5 + $0x568] ss:$36 sps:$4 sm:$0xff]  }
 0x147   :  { %4074 = vmatpush2.bf16.msra.mxu1 %v12513_v17  ;;  %4034 = vmatprep.subr.bf16.mxu0 %v12518_v18  ;;  %v12572_v17 = vld [vmem:[#allocation5 + $0xa4] ss:$36 sps:$4 sm:$0xff]  }
 0x148   :  { %4075 = vmatprep.subr.bf16.mxu1 %v12521_v19  ;;  %v12575_v18 = vld [vmem:[#allocation5 + $0x524] ss:$36 sps:$4 sm:$0xff]  }
 0x149   :  { %v12570_v19 = vld [vmem:[#allocation5 + $0xa0] ss:$36 sps:$4 sm:$0xff]  }
 0x14a   :  { %4035 = vmatpush2.bf16.msra.mxu0 %v12516_v22  ;;  %v12573_v22 = vld [vmem:[#allocation5 + $0x520] ss:$36 sps:$4 sm:$0xff]  }
 0x14b   :  { %4076 = vmatpush2.bf16.msra.mxu1 %v12519_v23  ;;  %4036 = vmatprep.subr.bf16.mxu0 %v12524_v24  ;;  %v12578_v23 = vld [vmem:[#allocation5 + $0x5c] ss:$36 sps:$4 sm:$0xff]  }
 0x14c   :  { %4077 = vmatprep.subr.bf16.mxu1 %v12527_v25  ;;  %v12581_v24 = vld [vmem:[#allocation5 + $0x4dc] ss:$36 sps:$4 sm:$0xff]  }
 0x14d   :  { %v12576_v25 = vld [vmem:[#allocation5 + $0x58] ss:$36 sps:$4 sm:$0xff]  }
 0x14e   :  { %4037 = vmatpush2.bf16.msra.mxu0 %v12522_v26  ;;  %v12579_v26 = vld [vmem:[#allocation5 + $0x4d8] ss:$36 sps:$4 sm:$0xff]  }
 0x14f   :  { %4078 = vmatpush2.bf16.msra.mxu1 %v12525_v27  ;;  %4038 = vmatprep.subr.bf16.mxu0 %v12530_v29  ;;  %v12584_v27 = vld [vmem:[#allocation5 + $0x14] ss:$36 sps:$4 sm:$0xff]  }
 0x150   :  { %4079 = vmatprep.subr.bf16.mxu1 %v12533_v30  ;;  %v12582_v29 = vld [vmem:[#allocation5 + $0x10] ss:$36 sps:$4 sm:$0xff]  }
 0x151   :  { %v12585_v30 = vld [vmem:[#allocation5 + $0x490] ss:$36 sps:$4 sm:$0xff]  }
 0x152   :  { %4039 = vmatpush2.bf16.msra.mxu0 %v12528_v31  ;;  %v12590_v31 = vld [vmem:[#allocation5 + $0x44c] ss:$36 sps:$4 sm:$0xff]  }
 0x153   :  { %4080 = vmatpush2.bf16.msra.mxu1 %v12531_v32  ;;  %4040 = vmatprep.subr.bf16.mxu0 %v12536_v34  ;;  %v12593_v32 = vld [vmem:[#allocation5 + $0x8cc] ss:$36 sps:$4 sm:$0xff]  }
 0x154   :  { %4081 = vmatprep.subr.bf16.mxu1 %v12539_v35  ;;  %v12588_v34 = vld [vmem:[#allocation5 + $0x448] ss:$36 sps:$4 sm:$0xff]  }
 0x155   :  { %v12591_v35 = vld [vmem:[#allocation5 + $0x8c8] ss:$36 sps:$4 sm:$0xff]  }
 0x156   :  { %4041 = vmatpush2.bf16.msra.mxu0 %v12534_v36  ;;  %v12596_v36 = vld [vmem:[#allocation5 + $0x404] ss:$36 sps:$4 sm:$0xff]  }
 0x157   :  { %4082 = vmatpush2.bf16.msra.mxu1 %v12537_v38  ;;  %4092 = vmatprep.subr.bf16.mxu0 %v12542_v42  ;;  %v12599_v38 = vld [vmem:[#allocation5 + $0x884] ss:$36 sps:$4 sm:$0xff]  }
 0x158   :  { %4133 = vmatprep.subr.bf16.mxu1 %v12545_v43  ;;  %v12597_v42 = vld [vmem:[#allocation5 + $0x880] ss:$36 sps:$4 sm:$0xff]  }
 0x159   :  { %v3798_v53 = vpop.f32.mrf.mxu0  ;;  %4043 = vmatmul.mubr.bf16.vlgmr.msra.gmra.mxu0 %v14264_v20  ;;  %v12602_v43 = vld [vmem:[#allocation5 + $0x3bc] ss:$36 sps:$4 sm:$0xff]  }
 0x15a   :  { %v3839_v54 = vpop.f32.mrf.mxu1  ;;  %4084 = vmatmul.mubr.bf16.vlgmr.msra.gmra.mxu1 %v14266_v21  ;;  %v3799_v56 = vadd.f32 %v3798_v53, %v778_v46  ;;  %4093 = vmatpush1.bf16.msra.mxu0 %v12540_v45  ;;  %v12605_v45 = vld [vmem:[#allocation5 + $0x83c] ss:$36 sps:$4 sm:$0xff]   ;;  %v12609_v53 = vld [vmem:[#allocation5 + $0x7f0] ss:$36 sps:$4 sm:$0xff]  }
 0x15b   :  { %4134 = vmatpush1.bf16.msra.mxu1 %v12543_v47  ;;  %v3800_v58 = vpop.f32.mrf.mxu0  ;;  %4094 = vmatprep.subr.bf16.mxu0 %v12548_v48  ;;  %v12600_v46 = vld [vmem:[#allocation5 + $0x3b8] ss:$36 sps:$4 sm:$0xff]  }
 0x15c   :  { %v3841_v59 = vpop.f32.mrf.mxu1  ;;  %4135 = vmatprep.subr.bf16.mxu1 %v12551_v50  ;;  %v14286_v62 = vadd.f32 %v3839_v54, %v3799_v56  ;;  %v3801_v63 = vadd.f32 %v3800_v58, %v782_v51  ;;  %4124 = vmatprep.mubr.bf16.mxu0 %v14246_v49  ;;  %v12603_v47 = vld [vmem:[#allocation5 + $0x838] ss:$36 sps:$4 sm:$0xff]   ;;  %v12606_v51 = vld [vmem:[#allocation5 + $0x370] ss:$36 sps:$4 sm:$0xff]   ;;  %v12612_v56 = vld [vmem:[#allocation5 + $0x328] ss:$36 sps:$4 sm:$0xff]  }
 0x15d   :  { %4165 = vmatprep.mubr.bf16.mxu1 %v14248_v52  ;;  %v3802_v0 = vpop.f32.mrf.mxu0  ;;  %v12608_v48 = vld [vmem:[#allocation5 + $0x374] ss:$36 sps:$4 sm:$0xff]   ;;  %v12614_v54 = vld [vmem:[#allocation5 + $0x32c] ss:$36 sps:$4 sm:$0xff]   ;;  %v12620_v58 = vld [vmem:[#allocation5 + $0x2e4] ss:$36 sps:$4 sm:$0xff]  }
 0x15e   :  { %v3843_v1 = vpop.f32.mrf.mxu1  ;;  %v14290_v3 = vadd.f32 %v3841_v59, %v3801_v63  ;;  %4095 = vmatpush1.bf16.msra.mxu0 %v12546_v55  ;;  %v12611_v50 = vld [vmem:[#allocation5 + $0x7f4] ss:$36 sps:$4 sm:$0xff]   ;;  %v12617_v55 = vld [vmem:[#allocation5 + $0x7ac] ss:$36 sps:$4 sm:$0xff]   ;;  %v12623_v59 = vld [vmem:[#allocation5 + $0x764] ss:$36 sps:$4 sm:$0xff]  }
 0x15f   :  { %4136 = vmatpush1.bf16.msra.mxu1 %v12549_v57  ;;  %v3803_v5 = vpop.f32.mrf.mxu0  ;;  %4096 = vmatprep.subr.bf16.mxu0 %v12554_v60  ;;  %v12615_v57 = vld [vmem:[#allocation5 + $0x7a8] ss:$36 sps:$4 sm:$0xff]   ;;  %v12618_v60 = vld [vmem:[#allocation5 + $0x2e0] ss:$36 sps:$4 sm:$0xff]   ;;  %v12624_v1 = vld [vmem:[#allocation5 + $0x298] ss:$36 sps:$4 sm:$0xff]  }
 0x160   :  { %v3844_v6 = vpop.f32.mrf.mxu1  ;;  %4137 = vmatprep.subr.bf16.mxu1 %v12557_v61  ;;  %v12621_v61 = vld [vmem:[#allocation5 + $0x760] ss:$36 sps:$4 sm:$0xff]   ;;  %v12635_v5 = vld [vmem:[#allocation5 + $0x6d4] ss:$36 sps:$4 sm:$0xff]  }
 0x161   :  { %v12626_v63 = vld [vmem:[#allocation5 + $0x29c] ss:$36 sps:$4 sm:$0xff]   ;;  %v12630_v6 = vld [vmem:[#allocation5 + $0x250] ss:$36 sps:$4 sm:$0xff]  }
 0x162   :  { %4097 = vmatpush1.bf16.msra.mxu0 %v12552_v2  ;;  %v12629_v0 = vld [vmem:[#allocation5 + $0x71c] ss:$36 sps:$4 sm:$0xff]  }
 0x163   :  { %4138 = vmatpush1.bf16.msra.mxu1 %v12555_v4  ;;  %4098 = vmatprep.subr.bf16.mxu0 %v12560_v7  ;;  %v12627_v2 = vld [vmem:[#allocation5 + $0x718] ss:$36 sps:$4 sm:$0xff]   ;;  %v12633_v7 = vld [vmem:[#allocation5 + $0x6d0] ss:$36 sps:$4 sm:$0xff]  }
 0x164   :  { %4139 = vmatprep.subr.bf16.mxu1 %v12563_v10  ;;  %v12632_v4 = vld [vmem:[#allocation5 + $0x254] ss:$36 sps:$4 sm:$0xff]   ;;  %v12638_v10 = vld [vmem:[#allocation5 + $0xb0c] ss:$36 sps:$4 sm:$0xff]  }
 0x166   :  { %4099 = vmatpush1.bf16.msra.mxu0 %v12558_v11  ;;  %v12641_v11 = vld [vmem:[#allocation5 + $0xf8c] ss:$36 sps:$4 sm:$0xff]  }
 0x167   :  { %4140 = vmatpush1.bf16.msra.mxu1 %v12561_v12  ;;  %4100 = vmatprep.subr.bf16.mxu0 %v12566_v13  ;;  %v12636_v12 = vld [vmem:[#allocation5 + $0xb08] ss:$36 sps:$4 sm:$0xff]  }
 0x168   :  { %4141 = vmatprep.subr.bf16.mxu1 %v12569_v14  ;;  %v12639_v13 = vld [vmem:[#allocation5 + $0xf88] ss:$36 sps:$4 sm:$0xff]  }
 0x169   :  { %v12644_v14 = vld [vmem:[#allocation5 + $0xac4] ss:$36 sps:$4 sm:$0xff]  }
 0x16a   :  { %4101 = vmatpush1.bf16.msra.mxu0 %v12564_v15  ;;  %v12647_v15 = vld [vmem:[#allocation5 + $0xf44] ss:$36 sps:$4 sm:$0xff]  }
 0x16b   :  { %4142 = vmatpush1.bf16.msra.mxu1 %v12567_v16  ;;  %4102 = vmatprep.subr.bf16.mxu0 %v12572_v17  ;;  %v12642_v16 = vld [vmem:[#allocation5 + $0xac0] ss:$36 sps:$4 sm:$0xff]  }
 0x16c   :  { %4143 = vmatprep.subr.bf16.mxu1 %v12575_v18  ;;  %v12645_v17 = vld [vmem:[#allocation5 + $0xf40] ss:$36 sps:$4 sm:$0xff]  }
 0x16e   :  { %4103 = vmatpush1.bf16.msra.mxu0 %v12570_v19 }
 0x16f   :  { %4144 = vmatpush1.bf16.msra.mxu1 %v12573_v22  ;;  %4104 = vmatprep.subr.bf16.mxu0 %v12578_v23 }
 0x170   :  { %4145 = vmatprep.subr.bf16.mxu1 %v12581_v24 }
 0x172   :  { %4105 = vmatpush1.bf16.msra.mxu0 %v12576_v25  ;;  %v12650_v25 = vld [vmem:[#allocation5 + $0xa7c] ss:$36 sps:$4 sm:$0xff]  }
 0x173   :  { %4146 = vmatpush1.bf16.msra.mxu1 %v12579_v26  ;;  %4106 = vmatprep.subr.bf16.mxu0 %v12584_v27  ;;  %v12653_v26 = vld [vmem:[#allocation5 + $0xefc] ss:$36 sps:$4 sm:$0xff]  }
 0x174   :  { %4147 = vmatprep.subr.bf16.mxu1 %v12587_v28 }
 0x176   :  { %4107 = vmatpush1.bf16.msra.mxu0 %v12582_v29  ;;  %v12648_v29 = vld [vmem:[#allocation5 + $0xa78] ss:$36 sps:$4 sm:$0xff]  }
 0x177   :  { %4148 = vmatpush1.bf16.msra.mxu1 %v12585_v30  ;;  %4108 = vmatprep.subr.bf16.mxu0 %v12590_v31  ;;  %v12651_v30 = vld [vmem:[#allocation5 + $0xef8] ss:$36 sps:$4 sm:$0xff]  }
 0x178   :  { %4149 = vmatprep.subr.bf16.mxu1 %v12593_v32 }
 0x17a   :  { %4109 = vmatpush2.bf16.msra.mxu0 %v12588_v34 }
 0x17b   :  { %4150 = vmatpush2.bf16.msra.mxu1 %v12591_v35  ;;  %4110 = vmatprep.subr.bf16.mxu0 %v12596_v36  ;;  %v12656_v36 = vld [vmem:[#allocation5 + $0xa34] ss:$36 sps:$4 sm:$0xff]  }
 0x17c   :  { %4151 = vmatprep.subr.bf16.mxu1 %v12599_v38  ;;  %v12659_v38 = vld [vmem:[#allocation5 + $0xeb4] ss:$36 sps:$4 sm:$0xff]  }
 0x17e   :  { %4111 = vmatpush2.bf16.msra.mxu0 %v12594_v39  ;;  %v12657_v39 = vld [vmem:[#allocation5 + $0xeb0] ss:$36 sps:$4 sm:$0xff]  }
 0x17f   :  { %4152 = vmatpush2.bf16.msra.mxu1 %v12597_v42  ;;  %4112 = vmatprep.subr.bf16.mxu0 %v12602_v43  ;;  %v12662_v42 = vld [vmem:[#allocation5 + $0x9ec] ss:$36 sps:$4 sm:$0xff]  }
 0x180   :  { %4153 = vmatprep.subr.bf16.mxu1 %v12605_v45  ;;  %v12665_v43 = vld [vmem:[#allocation5 + $0xe6c] ss:$36 sps:$4 sm:$0xff]  }
 0x181   :  { %v12660_v45 = vld [vmem:[#allocation5 + $0x9e8] ss:$36 sps:$4 sm:$0xff]  }
 0x182   :  { %4113 = vmatpush2.bf16.msra.mxu0 %v12600_v46  ;;  %v12663_v46 = vld [vmem:[#allocation5 + $0xe68] ss:$36 sps:$4 sm:$0xff]  }
 0x183   :  { %4154 = vmatpush2.bf16.msra.mxu1 %v12603_v47  ;;  %4114 = vmatprep.subr.bf16.mxu0 %v12608_v48  ;;  %v12668_v47 = vld [vmem:[#allocation5 + $0x9a4] ss:$36 sps:$4 sm:$0xff]  }
 0x184   :  { %4155 = vmatprep.subr.bf16.mxu1 %v12611_v50  ;;  %v12671_v48 = vld [vmem:[#allocation5 + $0xe24] ss:$36 sps:$4 sm:$0xff]  }
 0x185   :  { %v12666_v50 = vld [vmem:[#allocation5 + $0x9a0] ss:$36 sps:$4 sm:$0xff]  }
 0x186   :  { %4115 = vmatpush2.bf16.msra.mxu0 %v12606_v51  ;;  %v12669_v51 = vld [vmem:[#allocation5 + $0xe20] ss:$36 sps:$4 sm:$0xff]  }
 0x187   :  { %4156 = vmatpush2.bf16.msra.mxu1 %v12609_v53  ;;  %4116 = vmatprep.subr.bf16.mxu0 %v12614_v54  ;;  %v12674_v53 = vld [vmem:[#allocation5 + $0x95c] ss:$36 sps:$4 sm:$0xff]  }
 0x188   :  { %4157 = vmatprep.subr.bf16.mxu1 %v12617_v55  ;;  %v12677_v54 = vld [vmem:[#allocation5 + $0xddc] ss:$36 sps:$4 sm:$0xff]  }
 0x189   :  { %v12672_v55 = vld [vmem:[#allocation5 + $0x958] ss:$36 sps:$4 sm:$0xff]  }
 0x18a   :  { %4117 = vmatpush2.bf16.msra.mxu0 %v12612_v56  ;;  %v12675_v56 = vld [vmem:[#allocation5 + $0xdd8] ss:$36 sps:$4 sm:$0xff]  }
 0x18b   :  { %4158 = vmatpush2.bf16.msra.mxu1 %v12615_v57  ;;  %4118 = vmatprep.subr.bf16.mxu0 %v12620_v58  ;;  %v12680_v57 = vld [vmem:[#allocation5 + $0x914] ss:$36 sps:$4 sm:$0xff]  }
 0x18c   :  { %4159 = vmatprep.subr.bf16.mxu1 %v12623_v59  ;;  %v12683_v58 = vld [vmem:[#allocation5 + $0xd94] ss:$36 sps:$4 sm:$0xff]  }
 0x18d   :  { %v12678_v59 = vld [vmem:[#allocation5 + $0x910] ss:$36 sps:$4 sm:$0xff]  }
 0x18e   :  { %4119 = vmatpush2.bf16.msra.mxu0 %v12618_v60  ;;  %v12681_v60 = vld [vmem:[#allocation5 + $0xd90] ss:$36 sps:$4 sm:$0xff]  }
 0x18f   :  { %4160 = vmatpush2.bf16.msra.mxu1 %v12621_v61  ;;  %4120 = vmatprep.subr.bf16.mxu0 %v12626_v63  ;;  %v12686_v61 = vld [vmem:[#allocation5 + $0xd4c] ss:$36 sps:$4 sm:$0xff]  }
 0x190   :  { %4161 = vmatprep.subr.bf16.mxu1 %v12629_v0  ;;  %v12689_v63 = vld [vmem:[#allocation5 + $0x11cc] ss:$36 sps:$4 sm:$0xff]  }
 0x191   :  { %v12684_v0 = vld [vmem:[#allocation5 + $0xd48] ss:$36 sps:$4 sm:$0xff]  }
 0x192   :  { %4121 = vmatpush2.bf16.msra.mxu0 %v12624_v1  ;;  %v12687_v1 = vld [vmem:[#allocation5 + $0x11c8] ss:$36 sps:$4 sm:$0xff]  }
 0x193   :  { %4162 = vmatpush2.bf16.msra.mxu1 %v12627_v2  ;;  %4122 = vmatprep.subr.bf16.mxu0 %v12632_v4  ;;  %v12692_v2 = vld [vmem:[#allocation5 + $0xd04] ss:$36 sps:$4 sm:$0xff]  }
 0x194   :  { %4163 = vmatprep.subr.bf16.mxu1 %v12635_v5  ;;  %v12695_v4 = vld [vmem:[#allocation5 + $0x1184] ss:$36 sps:$4 sm:$0xff]  }
 0x195   :  { %v12690_v5 = vld [vmem:[#allocation5 + $0xd00] ss:$36 sps:$4 sm:$0xff]  }
 0x196   :  { %4123 = vmatpush2.bf16.msra.mxu0 %v12630_v6  ;;  %v12693_v6 = vld [vmem:[#allocation5 + $0x1180] ss:$36 sps:$4 sm:$0xff]  }
 0x197   :  { %4164 = vmatpush2.bf16.msra.mxu1 %v12633_v7  ;;  %4174 = vmatprep.subr.bf16.mxu0 %v12638_v10  ;;  %v12698_v7 = vld [vmem:[#allocation5 + $0xcbc] ss:$36 sps:$4 sm:$0xff]  }
 0x198   :  { %4215 = vmatprep.subr.bf16.mxu1 %v12641_v11  ;;  %v12701_v10 = vld [vmem:[#allocation5 + $0x113c] ss:$36 sps:$4 sm:$0xff]  }
 0x199   :  { %v3880_v18 = vpop.f32.mrf.mxu0  ;;  %4125 = vmatmul.mubr.bf16.vlgmr.msra.gmra.mxu0 %v14252_v8  ;;  %v12696_v11 = vld [vmem:[#allocation5 + $0xcb8] ss:$36 sps:$4 sm:$0xff]  }
 0x19a   :  { %v3921_v19 = vpop.f32.mrf.mxu1  ;;  %4166 = vmatmul.mubr.bf16.vlgmr.msra.gmra.mxu1 %v14254_v9  ;;  %v3881_v22 = vadd.f32 %v3880_v18, %v14286_v62  ;;  %4175 = vmatpush1.bf16.msra.mxu0 %v12636_v12  ;;  %v12699_v12 = vld [vmem:[#allocation5 + $0x1138] ss:$36 sps:$4 sm:$0xff]   ;;  %v12713_v18 = vld [vmem:[#allocation5 + $0x10ac] ss:$36 sps:$4 sm:$0xff]  }
 0x19b   :  { %4216 = vmatpush1.bf16.msra.mxu1 %v12639_v13  ;;  %v3882_v23 = vpop.f32.mrf.mxu0  ;;  %4176 = vmatprep.subr.bf16.mxu0 %v12644_v14  ;;  %v12704_v13 = vld [vmem:[#allocation5 + $0xc74] ss:$36 sps:$4 sm:$0xff]  }
 0x19c   :  { %v3923_v24 = vpop.f32.mrf.mxu1  ;;  %4217 = vmatprep.subr.bf16.mxu1 %v12647_v15  ;;  %v14295_v27 = vadd.f32 %v3921_v19, %v3881_v22  ;;  %v3883_v28 = vadd.f32 %v3882_v23, %v14290_v3  ;;  %4206 = vmatprep.mubr.bf16.mxu0 %v14258_v37  ;;  %v12654_v3 = vld [vmem:[#allocation5 + $0xa30] ss:$36 sps:$4 sm:$0xff]   ;;  %v12708_v19 = vld [vmem:[#allocation5 + $0xc28] ss:$36 sps:$4 sm:$0xff]  }
 0x19d   :  { %4247 = vmatprep.mubr.bf16.mxu1 %v14260_v40  ;;  %v3884_v31 = vpop.f32.mrf.mxu0  ;;  %v12707_v14 = vld [vmem:[#allocation5 + $0x10f4] ss:$36 sps:$4 sm:$0xff]   ;;  %v12711_v22 = vld [vmem:[#allocation5 + $0x10a8] ss:$36 sps:$4 sm:$0xff]  }
 0x19e   :  { %v3925_v62 = vpop.f32.mrf.mxu1  ;;  %v14300_v32 = vadd.f32 %v3923_v24, %v3883_v28  ;;  %4177 = vmatpush1.bf16.msra.mxu0 %v12642_v16  ;;  %v12702_v15 = vld [vmem:[#allocation5 + $0xc70] ss:$36 sps:$4 sm:$0xff]   ;;  %v12716_v23 = vld [vmem:[#allocation5 + $0xbe4] ss:$36 sps:$4 sm:$0xff]   ;;  %v12722_v28 = vld [vmem:[#allocation5 + $0xb9c] ss:$36 sps:$4 sm:$0xff]  }
 0x19f   :  { %4218 = vmatpush1.bf16.msra.mxu1 %v12645_v17  ;;  %v3885_v34 = vpop.f32.mrf.mxu0  ;;  %4178 = vmatprep.subr.bf16.mxu0 %v12650_v25  ;;  %v12705_v16 = vld [vmem:[#allocation5 + $0x10f0] ss:$36 sps:$4 sm:$0xff]   ;;  %v12719_v24 = vld [vmem:[#allocation5 + $0x1064] ss:$36 sps:$4 sm:$0xff]   ;;  %v12723_v31 = vld [vmem:[#allocation5 + $0x1018] ss:$36 sps:$4 sm:$0xff]  }
 0x1a0   :  { %v3926_v35 = vpop.f32.mrf.mxu1  ;;  %4219 = vmatprep.subr.bf16.mxu1 %v12653_v26  ;;  %v12710_v17 = vld [vmem:[#allocation5 + $0xc2c] ss:$36 sps:$4 sm:$0xff]   ;;  %v12714_v25 = vld [vmem:[#allocation5 + $0xbe0] ss:$36 sps:$4 sm:$0xff]   ;;  %v12728_v62 = vld [vmem:[#allocation5 + $0xb54] ss:$36 sps:$4 sm:$0xff]  }
 0x1a1   :  { %v12717_v26 = vld [vmem:[#allocation5 + $0x1060] ss:$36 sps:$4 sm:$0xff]   ;;  %v12731_v34 = vld [vmem:[#allocation5 + $0xfd4] ss:$36 sps:$4 sm:$0xff]  }
 0x1a2   :  { %4179 = vmatpush1.bf16.msra.mxu0 %v12648_v29  ;;  %v12725_v29 = vld [vmem:[#allocation5 + $0x101c] ss:$36 sps:$4 sm:$0xff]   ;;  %v12726_v35 = vld [vmem:[#allocation5 + $0xb50] ss:$36 sps:$4 sm:$0xff]  }
 0x1a3   :  { %4220 = vmatpush1.bf16.msra.mxu1 %v12651_v30  ;;  %4180 = vmatprep.subr.bf16.mxu0 %v12656_v36  ;;  %v12720_v30 = vld [vmem:[#allocation5 + $0xb98] ss:$36 sps:$4 sm:$0xff]   ;;  %v12729_v36 = vld [vmem:[#allocation5 + $0xfd0] ss:$36 sps:$4 sm:$0xff]  }
 0x1a4   :  { %4221 = vmatprep.subr.bf16.mxu1 %v12659_v38  ;;  %v785_v38 = vsub.s32 2, %v14276_v33 }
 0x1a6   :  { %4181 = vmatpush1.bf16.msra.mxu0 %v12654_v3  ;;  %v789_v3 = vsub.s32 3, %v14276_v33 }
 0x1a7   :  { %4222 = vmatpush1.bf16.msra.mxu1 %v12657_v39  ;;  %4182 = vmatprep.subr.bf16.mxu0 %v12662_v42  ;;  %v12734_v39 = vld [vmem:[#allocation5 + $0x214] ss:$36 sps:$4 sm:$0xff]  }
 0x1a8   :  { %4223 = vmatprep.subr.bf16.mxu1 %v12665_v43  ;;  %v12737_v42 = vld [vmem:[#allocation5 + $0x694] ss:$36 sps:$4 sm:$0xff]  }
 0x1a9   :  { %v12732_v43 = vld [vmem:[#allocation5 + $0x210] ss:$36 sps:$4 sm:$0xff]  }
 0x1aa   :  { %4183 = vmatpush1.bf16.msra.mxu0 %v12660_v45  ;;  %v12735_v45 = vld [vmem:[#allocation5 + $0x690] ss:$36 sps:$4 sm:$0xff]  }
 0x1ab   :  { %4224 = vmatpush1.bf16.msra.mxu1 %v12663_v46  ;;  %4184 = vmatprep.subr.bf16.mxu0 %v12668_v47  ;;  %v13996_v46 = vld [vmem:[#allocation7] sm:$0xff] }
 0x1ac   :  { %4225 = vmatprep.subr.bf16.mxu1 %v12671_v48  ;;  %v786_v47 = vrot.slane %v13996_v46, %v785_v38  ;;  %v12740_v48 = vld [vmem:[#allocation5 + $0x1cc] ss:$36 sps:$4 sm:$0xff]  }
 0x1ae   :  { %4185 = vmatpush1.bf16.msra.mxu0 %v12666_v50  ;;  %v12743_v50 = vld [vmem:[#allocation5 + $0x64c] ss:$36 sps:$4 sm:$0xff]  }
 0x1af   :  { %4226 = vmatpush1.bf16.msra.mxu1 %v12669_v51  ;;  %4186 = vmatprep.subr.bf16.mxu0 %v12674_v53  ;;  %v790_v51 = vrot.slane %v13996_v46, %v789_v3  ;;  %v12738_v53 = vld [vmem:[#allocation5 + $0x1c8] ss:$36 sps:$4 sm:$0xff]  }
 0x1b0   :  { %4227 = vmatprep.subr.bf16.mxu1 %v12677_v54  ;;  %v12741_v54 = vld [vmem:[#allocation5 + $0x648] ss:$36 sps:$4 sm:$0xff]  }
 0x1b1   :  { %v12786_v46 = vld [vmem:[#allocation5 + $0x408] ss:$36 sps:$4 sm:$0xff]  }
 0x1b2   :  { %4187 = vmatpush1.bf16.msra.mxu0 %v12672_v55 }
 0x1b3   :  { %4228 = vmatpush1.bf16.msra.mxu1 %v12675_v56  ;;  %4188 = vmatprep.subr.bf16.mxu0 %v12680_v57 }
 0x1b4   :  { %4229 = vmatprep.subr.bf16.mxu1 %v12683_v58 }
 0x1b6   :  { %4189 = vmatpush1.bf16.msra.mxu0 %v12678_v59 }
 0x1b7   :  { %4230 = vmatpush1.bf16.msra.mxu1 %v12681_v60  ;;  %4190 = vmatprep.subr.bf16.mxu0 %v12686_v61  ;;  %v12746_v60 = vld [vmem:[#allocation5 + $0x184] ss:$36 sps:$4 sm:$0xff]  }
 0x1b8   :  { %4231 = vmatprep.subr.bf16.mxu1 %v12689_v63  ;;  %v12749_v61 = vld [vmem:[#allocation5 + $0x604] ss:$36 sps:$4 sm:$0xff]  }
 0x1ba   :  { %4191 = vmatpush2.bf16.msra.mxu0 %v12684_v0 }
 0x1bb   :  { %4232 = vmatpush2.bf16.msra.mxu1 %v12687_v1  ;;  %4192 = vmatprep.subr.bf16.mxu0 %v12692_v2  ;;  %v12744_v1 = vld [vmem:[#allocation5 + $0x180] ss:$36 sps:$4 sm:$0xff]  }
 0x1bc   :  { %4233 = vmatprep.subr.bf16.mxu1 %v12695_v4  ;;  %v12747_v2 = vld [vmem:[#allocation5 + $0x600] ss:$36 sps:$4 sm:$0xff]  }
 0x1be   :  { %4193 = vmatpush2.bf16.msra.mxu0 %v12690_v5 }
 0x1bf   :  { %4234 = vmatpush2.bf16.msra.mxu1 %v12693_v6  ;;  %4194 = vmatprep.subr.bf16.mxu0 %v12698_v7 }
 0x1c0   :  { %4235 = vmatprep.subr.bf16.mxu1 %v12701_v10 }
 0x1c2   :  { %4195 = vmatpush2.bf16.msra.mxu0 %v12696_v11  ;;  %v12752_v11 = vld [vmem:[#allocation5 + $0x13c] ss:$36 sps:$4 sm:$0xff]  }
 0x1c3   :  { %4236 = vmatpush2.bf16.msra.mxu1 %v12699_v12  ;;  %4196 = vmatprep.subr.bf16.mxu0 %v12704_v13  ;;  %v12755_v12 = vld [vmem:[#allocation5 + $0x5bc] ss:$36 sps:$4 sm:$0xff]  }
 0x1c4   :  { %4237 = vmatprep.subr.bf16.mxu1 %v12707_v14  ;;  %v12750_v13 = vld [vmem:[#allocation5 + $0x138] ss:$36 sps:$4 sm:$0xff]  }
 0x1c5   :  { %v12753_v14 = vld [vmem:[#allocation5 + $0x5b8] ss:$36 sps:$4 sm:$0xff]  }
 0x1c6   :  { %4197 = vmatpush2.bf16.msra.mxu0 %v12702_v15  ;;  %v12758_v15 = vld [vmem:[#allocation5 + $0xf4] ss:$36 sps:$4 sm:$0xff]  }
 0x1c7   :  { %4238 = vmatpush2.bf16.msra.mxu1 %v12705_v16  ;;  %4198 = vmatprep.subr.bf16.mxu0 %v12710_v17  ;;  %v12761_v16 = vld [vmem:[#allocation5 + $0x574] ss:$36 sps:$4 sm:$0xff]  }
 0x1c8   :  { %4239 = vmatprep.subr.bf16.mxu1 %v12713_v18  ;;  %v12756_v17 = vld [vmem:[#allocation5 + $0xf0] ss:$36 sps:$4 sm:$0xff]  }
 0x1c9   :  { %v12759_v18 = vld [vmem:[#allocation5 + $0x570] ss:$36 sps:$4 sm:$0xff]  }
 0x1ca   :  { %4199 = vmatpush2.bf16.msra.mxu0 %v12708_v19  ;;  %v12764_v19 = vld [vmem:[#allocation5 + $0xac] ss:$36 sps:$4 sm:$0xff]  }
 0x1cb   :  { %4240 = vmatpush2.bf16.msra.mxu1 %v12711_v22  ;;  %4200 = vmatprep.subr.bf16.mxu0 %v12716_v23  ;;  %v12767_v22 = vld [vmem:[#allocation5 + $0x52c] ss:$36 sps:$4 sm:$0xff]  }
 0x1cc   :  { %4241 = vmatprep.subr.bf16.mxu1 %v12719_v24  ;;  %v12762_v23 = vld [vmem:[#allocation5 + $0xa8] ss:$36 sps:$4 sm:$0xff]  }
 0x1cd   :  { %v12765_v24 = vld [vmem:[#allocation5 + $0x528] ss:$36 sps:$4 sm:$0xff]  }
 0x1ce   :  { %4201 = vmatpush2.bf16.msra.mxu0 %v12714_v25  ;;  %v12770_v25 = vld [vmem:[#allocation5 + $0x64] ss:$36 sps:$4 sm:$0xff]  }
 0x1cf   :  { %4242 = vmatpush2.bf16.msra.mxu1 %v12717_v26  ;;  %4202 = vmatprep.subr.bf16.mxu0 %v12722_v28  ;;  %v12773_v26 = vld [vmem:[#allocation5 + $0x4e4] ss:$36 sps:$4 sm:$0xff]  }
 0x1d0   :  { %4243 = vmatprep.subr.bf16.mxu1 %v12725_v29  ;;  %v12768_v28 = vld [vmem:[#allocation5 + $0x60] ss:$36 sps:$4 sm:$0xff]  }
 0x1d1   :  { %v12771_v29 = vld [vmem:[#allocation5 + $0x4e0] ss:$36 sps:$4 sm:$0xff]  }
 0x1d2   :  { %4203 = vmatpush2.bf16.msra.mxu0 %v12720_v30  ;;  %v12776_v30 = vld [vmem:[#allocation5 + $0x1c] ss:$36 sps:$4 sm:$0xff]  }
 0x1d3   :  { %4244 = vmatpush2.bf16.msra.mxu1 %v12723_v31  ;;  %4204 = vmatprep.subr.bf16.mxu0 %v12728_v62  ;;  %v12779_v31 = vld [vmem:[#allocation5 + $0x49c] ss:$36 sps:$4 sm:$0xff]  }
 0x1d4   :  { %4245 = vmatprep.subr.bf16.mxu1 %v12731_v34  ;;  %v12774_v62 = vld [vmem:[#allocation5 + $0x18] ss:$36 sps:$4 sm:$0xff]  }
 0x1d5   :  { %v12777_v34 = vld [vmem:[#allocation5 + $0x498] ss:$36 sps:$4 sm:$0xff]  }
 0x1d6   :  { %4205 = vmatpush2.bf16.msra.mxu0 %v12726_v35  ;;  %v12782_v35 = vld [vmem:[#allocation5 + $0x454] ss:$36 sps:$4 sm:$0xff]  }
 0x1d7   :  { %4246 = vmatpush2.bf16.msra.mxu1 %v12729_v36  ;;  %4256 = vmatprep.subr.bf16.mxu0 %v12734_v39  ;;  %v12785_v36 = vld [vmem:[#allocation5 + $0x8d4] ss:$36 sps:$4 sm:$0xff]  }
 0x1d8   :  { %4297 = vmatprep.subr.bf16.mxu1 %v12737_v42  ;;  %v12780_v39 = vld [vmem:[#allocation5 + $0x450] ss:$36 sps:$4 sm:$0xff]  }
 0x1d9   :  { %v3962_v55 = vpop.f32.mrf.mxu0  ;;  %4207 = vmatmul.mubr.bf16.vlgmr.msra.gmra.mxu0 %v14264_v20  ;;  %v12783_v42 = vld [vmem:[#allocation5 + $0x8d0] ss:$36 sps:$4 sm:$0xff]  }
 0x1da   :  { %v4003_v56 = vpop.f32.mrf.mxu1  ;;  %4248 = vmatmul.mubr.bf16.vlgmr.msra.gmra.mxu1 %v14266_v21  ;;  %v3963_v57 = vadd.f32 %v3962_v55, %v786_v47  ;;  %4257 = vmatpush1.bf16.msra.mxu0 %v12732_v43  ;;  %v12788_v43 = vld [vmem:[#allocation5 + $0x40c] ss:$36 sps:$4 sm:$0xff]   ;;  %v12803_v55 = vld [vmem:[#allocation5 + $0x7fc] ss:$36 sps:$4 sm:$0xff]  }
 0x1db   :  { %4298 = vmatpush1.bf16.msra.mxu1 %v12735_v45  ;;  %v3964_v58 = vpop.f32.mrf.mxu0  ;;  %4258 = vmatprep.subr.bf16.mxu0 %v12740_v48  ;;  %v12791_v45 = vld [vmem:[#allocation5 + $0x88c] ss:$36 sps:$4 sm:$0xff]   ;;  %v12794_v48 = vld [vmem:[#allocation5 + $0x3c4] ss:$36 sps:$4 sm:$0xff]  }
 0x1dc   :  { %v4005_v59 = vpop.f32.mrf.mxu1  ;;  %4299 = vmatprep.subr.bf16.mxu1 %v12743_v50  ;;  %v14310_v63 = vadd.f32 %v4003_v56, %v3963_v57  ;;  %v3965_v0 = vadd.f32 %v3964_v58, %v790_v51  ;;  %4288 = vmatprep.mubr.bf16.mxu0 %v14246_v49  ;;  %v12789_v47 = vld [vmem:[#allocation5 + $0x888] ss:$36 sps:$4 sm:$0xff]   ;;  %v12792_v51 = vld [vmem:[#allocation5 + $0x3c0] ss:$36 sps:$4 sm:$0xff]   ;;  %v12798_v56 = vld [vmem:[#allocation5 + $0x378] ss:$36 sps:$4 sm:$0xff]  }
 0x1dd   :  { %4329 = vmatprep.mubr.bf16.mxu1 %v14248_v52  ;;  %v3966_v4 = vpop.f32.mrf.mxu0  ;;  %v12797_v50 = vld [vmem:[#allocation5 + $0x844] ss:$36 sps:$4 sm:$0xff]   ;;  %v12801_v57 = vld [vmem:[#allocation5 + $0x7f8] ss:$36 sps:$4 sm:$0xff]  }
 0x1de   :  { %v4007_v5 = vpop.f32.mrf.mxu1  ;;  %v14314_v6 = vadd.f32 %v4005_v59, %v3965_v0  ;;  %4259 = vmatpush1.bf16.msra.mxu0 %v12738_v53  ;;  %v12795_v53 = vld [vmem:[#allocation5 + $0x840] ss:$36 sps:$4 sm:$0xff]   ;;  %v12806_v58 = vld [vmem:[#allocation5 + $0x334] ss:$36 sps:$4 sm:$0xff]   ;;  %v12812_v0 = vld [vmem:[#allocation5 + $0x2ec] ss:$36 sps:$4 sm:$0xff]  }
 0x1df   :  { %4300 = vmatpush1.bf16.msra.mxu1 %v12741_v54  ;;  %v3967_v7 = vpop.f32.mrf.mxu0  ;;  %4260 = vmatprep.subr.bf16.mxu0 %v12746_v60  ;;  %v12800_v54 = vld [vmem:[#allocation5 + $0x37c] ss:$36 sps:$4 sm:$0xff]   ;;  %v12809_v59 = vld [vmem:[#allocation5 + $0x7b4] ss:$36 sps:$4 sm:$0xff]   ;;  %v12813_v4 = vld [vmem:[#allocation5 + $0x768] ss:$36 sps:$4 sm:$0xff]  }
 0x1e0   :  { %v4008_v10 = vpop.f32.mrf.mxu1  ;;  %4301 = vmatprep.subr.bf16.mxu1 %v12749_v61  ;;  %v12804_v60 = vld [vmem:[#allocation5 + $0x330] ss:$36 sps:$4 sm:$0xff]   ;;  %v12818_v5 = vld [vmem:[#allocation5 + $0x2a4] ss:$36 sps:$4 sm:$0xff]  }
 0x1e1   :  { %v12807_v61 = vld [vmem:[#allocation5 + $0x7b0] ss:$36 sps:$4 sm:$0xff]   ;;  %v12821_v7 = vld [vmem:[#allocation5 + $0x724] ss:$36 sps:$4 sm:$0xff]  }
 0x1e2   :  { %4261 = vmatpush1.bf16.msra.mxu0 %v12744_v1  ;;  %v12815_v1 = vld [vmem:[#allocation5 + $0x76c] ss:$36 sps:$4 sm:$0xff]   ;;  %v12816_v10 = vld [vmem:[#allocation5 + $0x2a0] ss:$36 sps:$4 sm:$0xff]  }
 0x1e3   :  { %4302 = vmatpush1.bf16.msra.mxu1 %v12747_v2  ;;  %4262 = vmatprep.subr.bf16.mxu0 %v12752_v11  ;;  %v12810_v2 = vld [vmem:[#allocation5 + $0x2e8] ss:$36 sps:$4 sm:$0xff]   ;;  %v12819_v11 = vld [vmem:[#allocation5 + $0x720] ss:$36 sps:$4 sm:$0xff]  }
 0x1e4   :  { %4303 = vmatprep.subr.bf16.mxu1 %v12755_v12  ;;  %v12824_v12 = vld [vmem:[#allocation5 + $0x25c] ss:$36 sps:$4 sm:$0xff]  }
 0x1e6   :  { %4263 = vmatpush1.bf16.msra.mxu0 %v12750_v13  ;;  %v12827_v13 = vld [vmem:[#allocation5 + $0x6dc] ss:$36 sps:$4 sm:$0xff]  }
 0x1e7   :  { %4304 = vmatpush1.bf16.msra.mxu1 %v12753_v14  ;;  %4264 = vmatprep.subr.bf16.mxu0 %v12758_v15  ;;  %v12822_v14 = vld [vmem:[#allocation5 + $0x258] ss:$36 sps:$4 sm:$0xff]  }
 0x1e8   :  { %4305 = vmatprep.subr.bf16.mxu1 %v12761_v16  ;;  %v12825_v15 = vld [vmem:[#allocation5 + $0x6d8] ss:$36 sps:$4 sm:$0xff]  }
 0x1e9   :  { %v12830_v16 = vld [vmem:[#allocation5 + $0xb14] ss:$36 sps:$4 sm:$0xff]  }
 0x1ea   :  { %4265 = vmatpush1.bf16.msra.mxu0 %v12756_v17  ;;  %v12833_v17 = vld [vmem:[#allocation5 + $0xf94] ss:$36 sps:$4 sm:$0xff]  }
 0x1eb   :  { %4306 = vmatpush1.bf16.msra.mxu1 %v12759_v18  ;;  %4266 = vmatprep.subr.bf16.mxu0 %v12764_v19  ;;  %v12828_v18 = vld [vmem:[#allocation5 + $0xb10] ss:$36 sps:$4 sm:$0xff]  }
 0x1ec   :  { %4307 = vmatprep.subr.bf16.mxu1 %v12767_v22  ;;  %v12831_v19 = vld [vmem:[#allocation5 + $0xf90] ss:$36 sps:$4 sm:$0xff]  }
 0x1ed   :  { %v12836_v22 = vld [vmem:[#allocation5 + $0xacc] ss:$36 sps:$4 sm:$0xff]  }
 0x1ee   :  { %4267 = vmatpush1.bf16.msra.mxu0 %v12762_v23  ;;  %v12839_v23 = vld [vmem:[#allocation5 + $0xf4c] ss:$36 sps:$4 sm:$0xff]  }
 0x1ef   :  { %4308 = vmatpush1.bf16.msra.mxu1 %v12765_v24  ;;  %4268 = vmatprep.subr.bf16.mxu0 %v12770_v25  ;;  %v12834_v24 = vld [vmem:[#allocation5 + $0xac8] ss:$36 sps:$4 sm:$0xff]  }
 0x1f0   :  { %4309 = vmatprep.subr.bf16.mxu1 %v12773_v26  ;;  %v12837_v25 = vld [vmem:[#allocation5 + $0xf48] ss:$36 sps:$4 sm:$0xff]  }
 0x1f2   :  { %4269 = vmatpush1.bf16.msra.mxu0 %v12768_v28 }
 0x1f3   :  { %4310 = vmatpush1.bf16.msra.mxu1 %v12771_v29  ;;  %4270 = vmatprep.subr.bf16.mxu0 %v12776_v30  ;;  %v12842_v29 = vld [vmem:[#allocation5 + $0xa84] ss:$36 sps:$4 sm:$0xff]  }
 0x1f4   :  { %4311 = vmatprep.subr.bf16.mxu1 %v12779_v31  ;;  %v12845_v30 = vld [vmem:[#allocation5 + $0xf04] ss:$36 sps:$4 sm:$0xff]  }
 0x1f6   :  { %4271 = vmatpush1.bf16.msra.mxu0 %v12774_v62 }
 0x1f7   :  { %4312 = vmatpush1.bf16.msra.mxu1 %v12777_v34  ;;  %4272 = vmatprep.subr.bf16.mxu0 %v12782_v35 }
 0x1f8   :  { %4313 = vmatprep.subr.bf16.mxu1 %v12785_v36 }
 0x1fa   :  { %4273 = vmatpush2.bf16.msra.mxu0 %v12780_v39  ;;  %v12840_v39 = vld [vmem:[#allocation5 + $0xa80] ss:$36 sps:$4 sm:$0xff]  }
 0x1fb   :  { %4314 = vmatpush2.bf16.msra.mxu1 %v12783_v42  ;;  %4274 = vmatprep.subr.bf16.mxu0 %v12788_v43  ;;  %v12843_v42 = vld [vmem:[#allocation5 + $0xf00] ss:$36 sps:$4 sm:$0xff]  }
 0x1fc   :  { %4315 = vmatprep.subr.bf16.mxu1 %v12791_v45 }
 0x1fe   :  { %4275 = vmatpush2.bf16.msra.mxu0 %v12786_v46  ;;  %v12848_v46 = vld [vmem:[#allocation5 + $0xa3c] ss:$36 sps:$4 sm:$0xff]  }
 0x1ff   :  { %4316 = vmatpush2.bf16.msra.mxu1 %v12789_v47  ;;  %4276 = vmatprep.subr.bf16.mxu0 %v12794_v48 }
 0x200   :  { %4317 = vmatprep.subr.bf16.mxu1 %v12797_v50 }
 0x202   :  { %4277 = vmatpush2.bf16.msra.mxu0 %v12792_v51  ;;  %v12846_v51 = vld [vmem:[#allocation5 + $0xa38] ss:$36 sps:$4 sm:$0xff]  }
 0x203   :  { %4318 = vmatpush2.bf16.msra.mxu1 %v12795_v53  ;;  %4278 = vmatprep.subr.bf16.mxu0 %v12800_v54  ;;  %v12854_v53 = vld [vmem:[#allocation5 + $0x9f4] ss:$36 sps:$4 sm:$0xff]  }
 0x204   :  { %4319 = vmatprep.subr.bf16.mxu1 %v12803_v55  ;;  %v12857_v54 = vld [vmem:[#allocation5 + $0xe74] ss:$36 sps:$4 sm:$0xff]  }
 0x205   :  { %v12852_v55 = vld [vmem:[#allocation5 + $0x9f0] ss:$36 sps:$4 sm:$0xff]  }
 0x206   :  { %4279 = vmatpush2.bf16.msra.mxu0 %v12798_v56  ;;  %v12855_v56 = vld [vmem:[#allocation5 + $0xe70] ss:$36 sps:$4 sm:$0xff]  }
 0x207   :  { %4320 = vmatpush2.bf16.msra.mxu1 %v12801_v57  ;;  %4280 = vmatprep.subr.bf16.mxu0 %v12806_v58  ;;  %v12860_v57 = vld [vmem:[#allocation5 + $0x9ac] ss:$36 sps:$4 sm:$0xff]  }
 0x208   :  { %4321 = vmatprep.subr.bf16.mxu1 %v12809_v59  ;;  %v12863_v58 = vld [vmem:[#allocation5 + $0xe2c] ss:$36 sps:$4 sm:$0xff]  }
 0x209   :  { %v12858_v59 = vld [vmem:[#allocation5 + $0x9a8] ss:$36 sps:$4 sm:$0xff]  }
 0x20a   :  { %4281 = vmatpush2.bf16.msra.mxu0 %v12804_v60  ;;  %v12861_v60 = vld [vmem:[#allocation5 + $0xe28] ss:$36 sps:$4 sm:$0xff]  }
 0x20b   :  { %4322 = vmatpush2.bf16.msra.mxu1 %v12807_v61  ;;  %4282 = vmatprep.subr.bf16.mxu0 %v12812_v0  ;;  %v12866_v61 = vld [vmem:[#allocation5 + $0x964] ss:$36 sps:$4 sm:$0xff]  }
 0x20c   :  { %4323 = vmatprep.subr.bf16.mxu1 %v12815_v1  ;;  %v12869_v0 = vld [vmem:[#allocation5 + $0xde4] ss:$36 sps:$4 sm:$0xff]  }
 0x20d   :  { %v12864_v1 = vld [vmem:[#allocation5 + $0x960] ss:$36 sps:$4 sm:$0xff]  }
 0x20e   :  { %4283 = vmatpush2.bf16.msra.mxu0 %v12810_v2  ;;  %v12867_v2 = vld [vmem:[#allocation5 + $0xde0] ss:$36 sps:$4 sm:$0xff]  }
 0x20f   :  { %4324 = vmatpush2.bf16.msra.mxu1 %v12813_v4  ;;  %4284 = vmatprep.subr.bf16.mxu0 %v12818_v5  ;;  %v12872_v4 = vld [vmem:[#allocation5 + $0x91c] ss:$36 sps:$4 sm:$0xff]  }
 0x210   :  { %4325 = vmatprep.subr.bf16.mxu1 %v12821_v7  ;;  %v12875_v5 = vld [vmem:[#allocation5 + $0xd9c] ss:$36 sps:$4 sm:$0xff]  }
 0x211   :  { %v12870_v7 = vld [vmem:[#allocation5 + $0x918] ss:$36 sps:$4 sm:$0xff]  }
 0x212   :  { %4285 = vmatpush2.bf16.msra.mxu0 %v12816_v10  ;;  %v12873_v10 = vld [vmem:[#allocation5 + $0xd98] ss:$36 sps:$4 sm:$0xff]  }
 0x213   :  { %4326 = vmatpush2.bf16.msra.mxu1 %v12819_v11  ;;  %4286 = vmatprep.subr.bf16.mxu0 %v12824_v12  ;;  %v12878_v11 = vld [vmem:[#allocation5 + $0xd54] ss:$36 sps:$4 sm:$0xff]  }
 0x214   :  { %4327 = vmatprep.subr.bf16.mxu1 %v12827_v13  ;;  %v12881_v12 = vld [vmem:[#allocation5 + $0x11d4] ss:$36 sps:$4 sm:$0xff]  }
 0x215   :  { %v12876_v13 = vld [vmem:[#allocation5 + $0xd50] ss:$36 sps:$4 sm:$0xff]  }
 0x216   :  { %4287 = vmatpush2.bf16.msra.mxu0 %v12822_v14  ;;  %v12879_v14 = vld [vmem:[#allocation5 + $0x11d0] ss:$36 sps:$4 sm:$0xff]  }
 0x217   :  { %4328 = vmatpush2.bf16.msra.mxu1 %v12825_v15  ;;  %4338 = vmatprep.subr.bf16.mxu0 %v12830_v16  ;;  %v12884_v15 = vld [vmem:[#allocation5 + $0xd0c] ss:$36 sps:$4 sm:$0xff]  }
 0x218   :  { %4379 = vmatprep.subr.bf16.mxu1 %v12833_v17  ;;  %v12887_v16 = vld [vmem:[#allocation5 + $0x118c] ss:$36 sps:$4 sm:$0xff]  }
 0x219   :  { %v4044_v26 = vpop.f32.mrf.mxu0  ;;  %4289 = vmatmul.mubr.bf16.vlgmr.msra.gmra.mxu0 %v14252_v8  ;;  %v12882_v17 = vld [vmem:[#allocation5 + $0xd08] ss:$36 sps:$4 sm:$0xff]  }
 0x21a   :  { %v4085_v28 = vpop.f32.mrf.mxu1  ;;  %4330 = vmatmul.mubr.bf16.vlgmr.msra.gmra.mxu1 %v14254_v9  ;;  %v4045_v31 = vadd.f32 %v4044_v26, %v14310_v63  ;;  %4339 = vmatpush1.bf16.msra.mxu0 %v12828_v18  ;;  %v12851_v63 = vld [vmem:[#allocation5 + $0xebc] ss:$36 sps:$4 sm:$0xff]   ;;  %v12885_v18 = vld [vmem:[#allocation5 + $0x1188] ss:$36 sps:$4 sm:$0xff]  }
 0x21b   :  { %4380 = vmatpush1.bf16.msra.mxu1 %v12831_v19  ;;  %v4046_v62 = vpop.f32.mrf.mxu0  ;;  %4340 = vmatprep.subr.bf16.mxu0 %v12836_v22  ;;  %v12890_v19 = vld [vmem:[#allocation5 + $0xcc4] ss:$36 sps:$4 sm:$0xff]   ;;  %v12899_v26 = vld [vmem:[#allocation5 + $0x10fc] ss:$36 sps:$4 sm:$0xff]  }
 0x21c   :  { %v4087_v34 = vpop.f32.mrf.mxu1  ;;  %4381 = vmatprep.subr.bf16.mxu1 %v12839_v23  ;;  %v14319_v35 = vadd.f32 %v4085_v28, %v4045_v31  ;;  %v4047_v36 = vadd.f32 %v4046_v62, %v14314_v6  ;;  %4370 = vmatprep.mubr.bf16.mxu0 %v14258_v37  ;;  %v12849_v6 = vld [vmem:[#allocation5 + $0xeb8] ss:$36 sps:$4 sm:$0xff]   ;;  %v12893_v22 = vld [vmem:[#allocation5 + $0x1144] ss:$36 sps:$4 sm:$0xff]   ;;  %v12900_v62 = vld [vmem:[#allocation5 + $0xc30] ss:$36 sps:$4 sm:$0xff]  }
 0x21d   :  { %4411 = vmatprep.mubr.bf16.mxu1 %v14260_v40  ;;  %v4048_v43 = vpop.f32.mrf.mxu0  ;;  %v12888_v23 = vld [vmem:[#allocation5 + $0xcc0] ss:$36 sps:$4 sm:$0xff]   ;;  %v12894_v28 = vld [vmem:[#allocation5 + $0xc78] ss:$36 sps:$4 sm:$0xff]  }
 0x21e   :  { %v4089_v45 = vpop.f32.mrf.mxu1  ;;  %v14324_v47 = vadd.f32 %v4087_v34, %v4047_v36  ;;  %4341 = vmatpush1.bf16.msra.mxu0 %v12834_v24  ;;  %v12891_v24 = vld [vmem:[#allocation5 + $0x1140] ss:$36 sps:$4 sm:$0xff]   ;;  %v12905_v31 = vld [vmem:[#allocation5 + $0x10b4] ss:$36 sps:$4 sm:$0xff]   ;;  %v12908_v36 = vld [vmem:[#allocation5 + $0xbec] ss:$36 sps:$4 sm:$0xff]  }
 0x21f   :  { %4382 = vmatpush1.bf16.msra.mxu1 %v12837_v25  ;;  %v4049_v48 = vpop.f32.mrf.mxu0  ;;  %4342 = vmatprep.subr.bf16.mxu0 %v12842_v29  ;;  %v12896_v25 = vld [vmem:[#allocation5 + $0xc7c] ss:$36 sps:$4 sm:$0xff]   ;;  %v12903_v34 = vld [vmem:[#allocation5 + $0x10b0] ss:$36 sps:$4 sm:$0xff]   ;;  %v12909_v43 = vld [vmem:[#allocation5 + $0x1068] ss:$36 sps:$4 sm:$0xff]  }
 0x220   :  { %v4090_v50 = vpop.f32.mrf.mxu1  ;;  %4383 = vmatprep.subr.bf16.mxu1 %v12845_v30  ;;  %v12897_v29 = vld [vmem:[#allocation5 + $0x10f8] ss:$36 sps:$4 sm:$0xff]   ;;  %v12914_v45 = vld [vmem:[#allocation5 + $0xba4] ss:$36 sps:$4 sm:$0xff]  }
 0x221   :  { %v12902_v30 = vld [vmem:[#allocation5 + $0xc34] ss:$36 sps:$4 sm:$0xff]   ;;  %v12915_v48 = vld [vmem:[#allocation5 + $0x1020] ss:$36 sps:$4 sm:$0xff]  }
 0x222   :  { %4343 = vmatpush1.bf16.msra.mxu0 %v12840_v39  ;;  %v12911_v39 = vld [vmem:[#allocation5 + $0x106c] ss:$36 sps:$4 sm:$0xff]   ;;  %v12920_v50 = vld [vmem:[#allocation5 + $0xb5c] ss:$36 sps:$4 sm:$0xff]  }
 0x223   :  { %4384 = vmatpush1.bf16.msra.mxu1 %v12843_v42  ;;  %4344 = vmatprep.subr.bf16.mxu0 %v12848_v46  ;;  %v12906_v42 = vld [vmem:[#allocation5 + $0xbe8] ss:$36 sps:$4 sm:$0xff]  }
 0x224   :  { %4385 = vmatprep.subr.bf16.mxu1 %v12851_v63  ;;  %v12917_v46 = vld [vmem:[#allocation5 + $0x1024] ss:$36 sps:$4 sm:$0xff]  }
 0x225   :  { %v12912_v63 = vld [vmem:[#allocation5 + $0xba0] ss:$36 sps:$4 sm:$0xff]  }
 0x226   :  { %4345 = vmatpush1.bf16.msra.mxu0 %v12846_v51  ;;  %v12923_v51 = vld [vmem:[#allocation5 + $0xfdc] ss:$36 sps:$4 sm:$0xff]  }
 0x227   :  { %4386 = vmatpush1.bf16.msra.mxu1 %v12849_v6  ;;  %4346 = vmatprep.subr.bf16.mxu0 %v12854_v53  ;;  %v12918_v6 = vld [vmem:[#allocation5 + $0xb58] ss:$36 sps:$4 sm:$0xff]  }
 0x228   :  { %4387 = vmatprep.subr.bf16.mxu1 %v12857_v54  ;;  %v12921_v53 = vld [vmem:[#allocation5 + $0xfd8] ss:$36 sps:$4 sm:$0xff]   ;;  %v793_v54 = vsub.s32 4, %v14276_v33 }
 0x22a   :  { %4347 = vmatpush1.bf16.msra.mxu0 %v12852_v55  ;;  %v12924_v55 = vld [vmem:[#allocation5 + $0x458] ss:$36 sps:$4 sm:$0xff]  }
 0x22b   :  { %4388 = vmatpush1.bf16.msra.mxu1 %v12855_v56  ;;  %4348 = vmatprep.subr.bf16.mxu0 %v12860_v57  ;;  %v12925_v56 = vld [vmem:[#allocation5 + $0x8d8] ss:$36 sps:$4 sm:$0xff]  }
 0x22c   :  { %4389 = vmatprep.subr.bf16.mxu1 %v12863_v58  ;;  %v12926_v57 = vld [vmem:[#allocation5 + $0x218] ss:$36 sps:$4 sm:$0xff]  }
 0x22d   :  { %v12927_v58 = vld [vmem:[#allocation5 + $0x698] ss:$36 sps:$4 sm:$0xff]  }
 0x22e   :  { %4349 = vmatpush1.bf16.msra.mxu0 %v12858_v59  ;;  %v797_v59 = vsub.s32 5, %v14276_v33 }
 0x22f   :  { %4390 = vmatpush1.bf16.msra.mxu1 %v12861_v60  ;;  %4350 = vmatprep.subr.bf16.mxu0 %v12866_v61  ;;  %v12928_v60 = vld [vmem:[#allocation5 + $0x410] ss:$36 sps:$4 sm:$0xff]  }
 0x230   :  { %4391 = vmatprep.subr.bf16.mxu1 %v12869_v0  ;;  %v12929_v61 = vld [vmem:[#allocation5 + $0x890] ss:$36 sps:$4 sm:$0xff]   ;;  %v13997_v0 = vld [vmem:[#allocation7] sm:$0xff] }
 0x232   :  { %4351 = vmatpush1.bf16.msra.mxu0 %v12864_v1  ;;  %v794_v1 = vrot.slane %v13997_v0, %v793_v54 }
 0x233   :  { %4392 = vmatpush1.bf16.msra.mxu1 %v12867_v2  ;;  %4352 = vmatprep.subr.bf16.mxu0 %v12872_v4  ;;  %v798_v2 = vrot.slane %v13997_v0, %v797_v59  ;;  %v12930_v4 = vld [vmem:[#allocation5 + $0x1d0] ss:$36 sps:$4 sm:$0xff]  }
 0x234   :  { %4393 = vmatprep.subr.bf16.mxu1 %v12875_v5  ;;  %v12931_v5 = vld [vmem:[#allocation5 + $0x650] ss:$36 sps:$4 sm:$0xff]  }
 0x235   :  { %v12962_v0 = vld [vmem:[#allocation5 + $0xad0] ss:$36 sps:$4 sm:$0xff]  }
 0x236   :  { %4353 = vmatpush1.bf16.msra.mxu0 %v12870_v7 }
 0x237   :  { %4394 = vmatpush1.bf16.msra.mxu1 %v12873_v10  ;;  %4354 = vmatprep.subr.bf16.mxu0 %v12878_v11  ;;  %v12932_v11 = vld [vmem:[#allocation5 + $0x3c8] ss:$36 sps:$4 sm:$0xff]  }
 0x238   :  { %4395 = vmatprep.subr.bf16.mxu1 %v12881_v12  ;;  %v12933_v12 = vld [vmem:[#allocation5 + $0x848] ss:$36 sps:$4 sm:$0xff]  }
 0x23a   :  { %4355 = vmatpush2.bf16.msra.mxu0 %v12876_v13 }
 0x23b   :  { %4396 = vmatpush2.bf16.msra.mxu1 %v12879_v14  ;;  %4356 = vmatprep.subr.bf16.mxu0 %v12884_v15 }
 0x23c   :  { %4397 = vmatprep.subr.bf16.mxu1 %v12887_v16 }
 0x23e   :  { %4357 = vmatpush2.bf16.msra.mxu0 %v12882_v17 }
 0x23f   :  { %4398 = vmatpush2.bf16.msra.mxu1 %v12885_v18  ;;  %4358 = vmatprep.subr.bf16.mxu0 %v12890_v19  ;;  %v12934_v18 = vld [vmem:[#allocation5 + $0x188] ss:$36 sps:$4 sm:$0xff]  }
 0x240   :  { %4399 = vmatprep.subr.bf16.mxu1 %v12893_v22 }
 0x242   :  { %4359 = vmatpush2.bf16.msra.mxu0 %v12888_v23  ;;  %v12935_v23 = vld [vmem:[#allocation5 + $0x608] ss:$36 sps:$4 sm:$0xff]  }
 0x243   :  { %4400 = vmatpush2.bf16.msra.mxu1 %v12891_v24  ;;  %4360 = vmatprep.subr.bf16.mxu0 %v12896_v25 }
 0x244   :  { %4401 = vmatprep.subr.bf16.mxu1 %v12899_v26 }
 0x246   :  { %4361 = vmatpush2.bf16.msra.mxu0 %v12894_v28  ;;  %v12936_v28 = vld [vmem:[#allocation5 + $0x380] ss:$36 sps:$4 sm:$0xff]  }
 0x247   :  { %4402 = vmatpush2.bf16.msra.mxu1 %v12897_v29  ;;  %4362 = vmatprep.subr.bf16.mxu0 %v12902_v30  ;;  %v12937_v29 = vld [vmem:[#allocation5 + $0x800] ss:$36 sps:$4 sm:$0xff]  }
 0x248   :  { %4403 = vmatprep.subr.bf16.mxu1 %v12905_v31  ;;  %v12938_v30 = vld [vmem:[#allocation5 + $0x140] ss:$36 sps:$4 sm:$0xff]  }
 0x249   :  { %v12939_v31 = vld [vmem:[#allocation5 + $0x5c0] ss:$36 sps:$4 sm:$0xff]  }
 0x24a   :  { %4363 = vmatpush2.bf16.msra.mxu0 %v12900_v62  ;;  %v12942_v62 = vld [vmem:[#allocation5 + $0xf8] ss:$36 sps:$4 sm:$0xff]  }
 0x24b   :  { %4404 = vmatpush2.bf16.msra.mxu1 %v12903_v34  ;;  %4364 = vmatprep.subr.bf16.mxu0 %v12908_v36  ;;  %v12943_v34 = vld [vmem:[#allocation5 + $0x578] ss:$36 sps:$4 sm:$0xff]   ;;  %v12944_v36 = vld [vmem:[#allocation5 + $0x2f0] ss:$36 sps:$4 sm:$0xff]  }
 0x24c   :  { %4405 = vmatprep.subr.bf16.mxu1 %v12911_v39  ;;  %v12945_v39 = vld [vmem:[#allocation5 + $0x770] ss:$36 sps:$4 sm:$0xff]  }
 0x24e   :  { %4365 = vmatpush2.bf16.msra.mxu0 %v12906_v42  ;;  %v12946_v42 = vld [vmem:[#allocation5 + $0xb0] ss:$36 sps:$4 sm:$0xff]  }
 0x24f   :  { %4406 = vmatpush2.bf16.msra.mxu1 %v12909_v43  ;;  %4366 = vmatprep.subr.bf16.mxu0 %v12914_v45  ;;  %v12947_v43 = vld [vmem:[#allocation5 + $0x530] ss:$36 sps:$4 sm:$0xff]   ;;  %v12948_v45 = vld [vmem:[#allocation5 + $0x2a8] ss:$36 sps:$4 sm:$0xff]  }
 0x250   :  { %4407 = vmatprep.subr.bf16.mxu1 %v12917_v46  ;;  %v12949_v46 = vld [vmem:[#allocation5 + $0x728] ss:$36 sps:$4 sm:$0xff]  }
 0x252   :  { %4367 = vmatpush2.bf16.msra.mxu0 %v12912_v63  ;;  %v12950_v63 = vld [vmem:[#allocation5 + $0x68] ss:$36 sps:$4 sm:$0xff]  }
 0x253   :  { %4408 = vmatpush2.bf16.msra.mxu1 %v12915_v48  ;;  %4368 = vmatprep.subr.bf16.mxu0 %v12920_v50  ;;  %v12951_v48 = vld [vmem:[#allocation5 + $0x4e8] ss:$36 sps:$4 sm:$0xff]   ;;  %v12952_v50 = vld [vmem:[#allocation5 + $0x260] ss:$36 sps:$4 sm:$0xff]  }
 0x254   :  { %4409 = vmatprep.subr.bf16.mxu1 %v12923_v51  ;;  %v12953_v51 = vld [vmem:[#allocation5 + $0x6e0] ss:$36 sps:$4 sm:$0xff]  }
 0x256   :  { %4369 = vmatpush2.bf16.msra.mxu0 %v12918_v6  ;;  %v12954_v6 = vld [vmem:[#allocation5 + $0x20] ss:$36 sps:$4 sm:$0xff]  }
 0x257   :  { %4410 = vmatpush2.bf16.msra.mxu1 %v12921_v53  ;;  %11819 = vmatprep.subr.bf16.mxu0 %v12924_v55  ;;  %v12955_v53 = vld [vmem:[#allocation5 + $0x4a0] ss:$36 sps:$4 sm:$0xff]   ;;  %v12956_v55 = vld [vmem:[#allocation5 + $0xd58] ss:$36 sps:$4 sm:$0xff]  }
 0x258   :  { %11841 = vmatprep.subr.bf16.mxu1 %v12925_v56  ;;  %v12957_v56 = vld [vmem:[#allocation5 + $0x11d8] ss:$36 sps:$4 sm:$0xff]  }
 0x259   :  { %v4126_v7 = vpop.f32.mrf.mxu0  ;;  %4371 = vmatmul.mubr.bf16.vlgmr.msra.gmra.mxu0 %v14264_v20 }
 0x25a   :  { %v4167_v10 = vpop.f32.mrf.mxu1  ;;  %4412 = vmatmul.mubr.bf16.vlgmr.msra.gmra.mxu1 %v14266_v21  ;;  %v4127_v13 = vadd.f32 %v4126_v7, %v794_v1  ;;  %11820 = vmatpush3.bf16.msra.mxu0 %v12926_v57  ;;  %v12958_v57 = vld [vmem:[#allocation5 + $0xb18] ss:$36 sps:$4 sm:$0xff]   ;;  %v12963_v1 = vld [vmem:[#allocation5 + $0xf50] ss:$36 sps:$4 sm:$0xff]   ;;  %v12967_v7 = vld [vmem:[#allocation5 + $0xf08] ss:$36 sps:$4 sm:$0xff]  }
 0x25b   :  { %11842 = vmatpush3.bf16.msra.mxu1 %v12927_v58  ;;  %v4128_v14 = vpop.f32.mrf.mxu0  ;;  %11821 = vmatprep.subr.bf16.mxu0 %v12928_v60  ;;  %v12959_v58 = vld [vmem:[#allocation5 + $0xf98] ss:$36 sps:$4 sm:$0xff]   ;;  %v12960_v60 = vld [vmem:[#allocation5 + $0xd10] ss:$36 sps:$4 sm:$0xff]  }
 0x25c   :  { %v4169_v15 = vpop.f32.mrf.mxu1  ;;  %11843 = vmatprep.subr.bf16.mxu1 %v12929_v61  ;;  %v14334_v16 = vadd.f32 %v4167_v10, %v4127_v13  ;;  %v4129_v17 = vadd.f32 %v4128_v14, %v798_v2  ;;  %4452 = vmatprep.mubr.bf16.mxu0 %v14246_v49  ;;  %v12940_v49 = vld [vmem:[#allocation5 + $0x338] ss:$36 sps:$4 sm:$0xff]   ;;  %v12961_v61 = vld [vmem:[#allocation5 + $0x1190] ss:$36 sps:$4 sm:$0xff]   ;;  %v12964_v2 = vld [vmem:[#allocation5 + $0xcc8] ss:$36 sps:$4 sm:$0xff]  }
 0x25d   :  { %4492 = vmatprep.mubr.bf16.mxu1 %v14248_v52  ;;  %v4130_v19 = vpop.f32.mrf.mxu0  ;;  %v12941_v52 = vld [vmem:[#allocation5 + $0x7b8] ss:$36 sps:$4 sm:$0xff]   ;;  %v12968_v10 = vld [vmem:[#allocation5 + $0xc80] ss:$36 sps:$4 sm:$0xff]   ;;  %v12976_v14 = vld [vmem:[#allocation5 + $0xbf0] ss:$36 sps:$4 sm:$0xff]  }
 0x25e   :  { %v4171_v22 = vpop.f32.mrf.mxu1  ;;  %v14338_v24 = vadd.f32 %v4169_v15, %v4129_v17  ;;  %11822 = vmatpush3.bf16.msra.mxu0 %v12930_v4  ;;  %v12965_v4 = vld [vmem:[#allocation5 + $0x1148] ss:$36 sps:$4 sm:$0xff]   ;;  %v12973_v13 = vld [vmem:[#allocation5 + $0x10b8] ss:$36 sps:$4 sm:$0xff]   ;;  %v12977_v15 = vld [vmem:[#allocation5 + $0x1070] ss:$36 sps:$4 sm:$0xff]  }
 0x25f   :  { %11844 = vmatpush3.bf16.msra.mxu1 %v12931_v5  ;;  %v4131_v25 = vpop.f32.mrf.mxu0  ;;  %11823 = vmatprep.subr.bf16.mxu0 %v12932_v11  ;;  %v12966_v5 = vld [vmem:[#allocation5 + $0xa88] ss:$36 sps:$4 sm:$0xff]   ;;  %v12971_v11 = vld [vmem:[#allocation5 + $0xec0] ss:$36 sps:$4 sm:$0xff]   ;;  %v12978_v17 = vld [vmem:[#allocation5 + $0x9b0] ss:$36 sps:$4 sm:$0xff]  }
 0x260   :  { %v4172_v26 = vpop.f32.mrf.mxu1  ;;  %11845 = vmatprep.subr.bf16.mxu1 %v12933_v12  ;;  %v12972_v12 = vld [vmem:[#allocation5 + $0xc38] ss:$36 sps:$4 sm:$0xff]   ;;  %v12980_v19 = vld [vmem:[#allocation5 + $0xba8] ss:$36 sps:$4 sm:$0xff]  }
 0x261   :  { %v12981_v22 = vld [vmem:[#allocation5 + $0x1028] ss:$36 sps:$4 sm:$0xff]   ;;  %v12984_v26 = vld [vmem:[#allocation5 + $0xb60] ss:$36 sps:$4 sm:$0xff]  }
 0x262   :  { %11824 = vmatpush3.bf16.msra.mxu0 %v12934_v18  ;;  %v12979_v18 = vld [vmem:[#allocation5 + $0xe30] ss:$36 sps:$4 sm:$0xff]   ;;  %v12983_v25 = vld [vmem:[#allocation5 + $0xde8] ss:$36 sps:$4 sm:$0xff]  }
 0x263   :  { %11846 = vmatpush3.bf16.msra.mxu1 %v12935_v23  ;;  %11825 = vmatprep.subr.bf16.mxu0 %v12936_v28  ;;  %v12982_v23 = vld [vmem:[#allocation5 + $0x968] ss:$36 sps:$4 sm:$0xff]   ;;  %v12985_v28 = vld [vmem:[#allocation5 + $0xfe0] ss:$36 sps:$4 sm:$0xff]  }
 0x264   :  { %11847 = vmatprep.subr.bf16.mxu1 %v12937_v29  ;;  %v12986_v29 = vld [vmem:[#allocation5 + $0x920] ss:$36 sps:$4 sm:$0xff]  }
 0x266   :  { %11826 = vmatpush3.bf16.msra.mxu0 %v12938_v30  ;;  %v12987_v30 = vld [vmem:[#allocation5 + $0xda0] ss:$36 sps:$4 sm:$0xff]  }
 0x267   :  { %11848 = vmatpush3.bf16.msra.mxu1 %v12939_v31  ;;  %11827 = vmatprep.subr.bf16.mxu0 %v12940_v49  ;;  %v12990_v31 = vld [vmem:[#allocation8 + $0x1fc] ss:$36 sps:$4 sm:$0xff]  }
 0x268   :  { %11849 = vmatprep.subr.bf16.mxu1 %v12941_v52  ;;  %v12993_v49 = vld [vmem:[#allocation8 + $0x67c] ss:$36 sps:$4 sm:$0xff]   ;;  %v4581_v52 = vmax.f32 %v14300_v32, 0.0  ;;  %v12997_v32 = vld [vmem:[#allocation8 + $0x630] ss:$36 sps:$4 sm:$0xff]  }
 0x26a   :  { %11828 = vmatpush3.bf16.msra.mxu0 %v12942_v62  ;;  %v12988_v62 = vld [vmem:[#allocation8 + $0x1f8] ss:$36 sps:$4 sm:$0xff]  }
 0x26b   :  { %11850 = vmatpush3.bf16.msra.mxu1 %v12943_v34  ;;  %11829 = vmatprep.subr.bf16.mxu0 %v12944_v36  ;;  %v4583_v34 = vmax.f32 %v14324_v47, 0.0  ;;  %v12991_v36 = vld [vmem:[#allocation8 + $0x678] ss:$36 sps:$4 sm:$0xff]   ;;  %v13002_v47 = vld [vmem:[#allocation8 + $0x16c] ss:$36 sps:$4 sm:$0xff]  }
 0x26c   :  { %11851 = vmatprep.subr.bf16.mxu1 %v12945_v39  ;;  %v12996_v39 = vld [vmem:[#allocation8 + $0x1b4] ss:$36 sps:$4 sm:$0xff]  }
 0x26e   :  { %11830 = vmatpush3.bf16.msra.mxu0 %v12946_v42  ;;  %v12999_v42 = vld [vmem:[#allocation8 + $0x634] ss:$36 sps:$4 sm:$0xff]  }
 0x26f   :  { %11852 = vmatpush3.bf16.msra.mxu1 %v12947_v43  ;;  %11831 = vmatprep.subr.bf16.mxu0 %v12948_v45  ;;  %v14346_v43 = vpack.c.bf16 %v4581_v52, %v4581_v52  ;;  %v12994_v45 = vld [vmem:[#allocation8 + $0x1b0] ss:$36 sps:$4 sm:$0xff]  }
 0x270   :  { %11853 = vmatprep.subr.bf16.mxu1 %v12949_v46  ;;  %v14348_v46 = vpack.c.bf16 %v4583_v34, %v4583_v34  ;;  %v13053_v52 = vld [vmem:[#allocation8 + $0x82c] ss:$36 sps:$4 sm:$0xff]   ;;  %v13056_v34 = vld [vmem:[#allocation8 + $0x364] ss:$36 sps:$4 sm:$0xff]  }
 0x272   :  { %11832 = vmatpush3.bf16.msra.mxu0 %v12950_v63 }
 0x273   :  { %11854 = vmatpush3.bf16.msra.mxu1 %v12951_v48  ;;  %11833 = vmatprep.subr.bf16.mxu0 %v12952_v50 }
 0x274   :  { %11855 = vmatprep.subr.bf16.mxu1 %v12953_v51 }
 0x276   :  { %11834 = vmatpush3.bf16.msra.mxu0 %v12954_v6 }
 0x277   :  { %11856 = vmatpush3.bf16.msra.mxu1 %v12955_v53  ;;  %11863 = vmatprep.subr.bf16.mxu0 %v12956_v55  ;;  %v13005_v53 = vld [vmem:[#allocation8 + $0x5ec] ss:$36 sps:$4 sm:$0xff]  }
 0x278   :  { %11885 = vmatprep.subr.bf16.mxu1 %v12957_v56 }
 0x279   :  { %4453 = vmatmul.mubr.bf16.vlgmr.msra.gmra.mxu0 %v14252_v8  ;;  %v12969_v8 = vld [vmem:[#allocation5 + $0x1100] ss:$36 sps:$4 sm:$0xff]  }
 0x27a   :  { %4493 = vmatmul.mubr.bf16.vlgmr.msra.gmra.mxu1 %v14254_v9  ;;  %11864 = vmatpush3.bf16.msra.mxu0 %v12958_v57  ;;  %v12970_v9 = vld [vmem:[#allocation5 + $0xa40] ss:$36 sps:$4 sm:$0xff]   ;;  %v13003_v57 = vld [vmem:[#allocation8 + $0x5e8] ss:$36 sps:$4 sm:$0xff]  }
 0x27b   :  { %11886 = vmatpush3.bf16.msra.mxu1 %v12959_v58  ;;  %11865 = vmatprep.subr.bf16.mxu0 %v12960_v60  ;;  %v13008_v60 = vld [vmem:[#allocation8 + $0x124] ss:$36 sps:$4 sm:$0xff]  }
 0x27c   :  { %11887 = vmatprep.subr.bf16.mxu1 %v12961_v61  ;;  %4532 = vmatprep.mubr.bf16.mxu0 %v14258_v37  ;;  %v12974_v37 = vld [vmem:[#allocation5 + $0x9f8] ss:$36 sps:$4 sm:$0xff]   ;;  %v13006_v61 = vld [vmem:[#allocation8 + $0x120] ss:$36 sps:$4 sm:$0xff]  }
 0x27d   :  { %4572 = vmatprep.mubr.bf16.mxu1 %v14260_v40  ;;  %v12975_v40 = vld [vmem:[#allocation5 + $0xe78] ss:$36 sps:$4 sm:$0xff]  }
 0x27e   :  { %11866 = vmatpush3.bf16.msra.mxu0 %v12962_v0  ;;  %v13011_v0 = vld [vmem:[#allocation8 + $0x5a4] ss:$36 sps:$4 sm:$0xff]  }
 0x27f   :  { %11888 = vmatpush3.bf16.msra.mxu1 %v12963_v1  ;;  %11867 = vmatprep.subr.bf16.mxu0 %v12964_v2  ;;  %v13009_v1 = vld [vmem:[#allocation8 + $0x5a0] ss:$36 sps:$4 sm:$0xff]  }
 0x280   :  { %11889 = vmatprep.subr.bf16.mxu1 %v12965_v4  ;;  %v13014_v2 = vld [vmem:[#allocation8 + $0xdc] ss:$36 sps:$4 sm:$0xff]  }
 0x281   :  { %v13012_v4 = vld [vmem:[#allocation8 + $0xd8] ss:$36 sps:$4 sm:$0xff]  }
 0x282   :  { %11868 = vmatpush3.bf16.msra.mxu0 %v12966_v5  ;;  %v13017_v5 = vld [vmem:[#allocation8 + $0x55c] ss:$36 sps:$4 sm:$0xff]  }
 0x283   :  { %11890 = vmatpush3.bf16.msra.mxu1 %v12967_v7  ;;  %11869 = vmatprep.subr.bf16.mxu0 %v12968_v10  ;;  %v13015_v7 = vld [vmem:[#allocation8 + $0x558] ss:$36 sps:$4 sm:$0xff]  }
 0x284   :  { %11891 = vmatprep.subr.bf16.mxu1 %v12969_v8  ;;  %v13020_v10 = vld [vmem:[#allocation8 + $0x94] ss:$36 sps:$4 sm:$0xff]  }
 0x285   :  { %v13023_v8 = vld [vmem:[#allocation8 + $0x514] ss:$36 sps:$4 sm:$0xff]  }
 0x286   :  { %11870 = vmatpush3.bf16.msra.mxu0 %v12970_v9  ;;  %v13018_v9 = vld [vmem:[#allocation8 + $0x90] ss:$36 sps:$4 sm:$0xff]  }
 0x287   :  { %11892 = vmatpush3.bf16.msra.mxu1 %v12971_v11  ;;  %11871 = vmatprep.subr.bf16.mxu0 %v12972_v12  ;;  %v13021_v11 = vld [vmem:[#allocation8 + $0x510] ss:$36 sps:$4 sm:$0xff]  }
 0x288   :  { %11893 = vmatprep.subr.bf16.mxu1 %v12973_v13  ;;  %v13026_v12 = vld [vmem:[#allocation8 + $0x4c] ss:$36 sps:$4 sm:$0xff]  }
 0x289   :  { %v13029_v13 = vld [vmem:[#allocation8 + $0x4cc] ss:$36 sps:$4 sm:$0xff]  }
 0x28a   :  { %11872 = vmatpush3.bf16.msra.mxu0 %v12974_v37  ;;  %v13024_v37 = vld [vmem:[#allocation8 + $0x48] ss:$36 sps:$4 sm:$0xff]  }
 0x28b   :  { %11894 = vmatpush3.bf16.msra.mxu1 %v12975_v40  ;;  %11873 = vmatprep.subr.bf16.mxu0 %v12976_v14  ;;  %v13027_v40 = vld [vmem:[#allocation8 + $0x4c8] ss:$36 sps:$4 sm:$0xff]  }
 0x28c   :  { %11895 = vmatprep.subr.bf16.mxu1 %v12977_v15  ;;  %v13032_v14 = vld [vmem:[#allocation8 + $0x4] ss:$36 sps:$4 sm:$0xff]  }
 0x28d   :  { %v13035_v15 = vld [vmem:[#allocation8 + $0x484] ss:$36 sps:$4 sm:$0xff]  }
 0x28e   :  { %11874 = vmatpush3.bf16.msra.mxu0 %v12978_v17  ;;  %v13030_v17 = vld [vmem:[#allocation8] ss:$36 sps:$4 sm:$0xff]  }
 0x28f   :  { %11896 = vmatpush3.bf16.msra.mxu1 %v12979_v18  ;;  %11875 = vmatprep.subr.bf16.mxu0 %v12980_v19  ;;  %v13033_v18 = vld [vmem:[#allocation8 + $0x480] ss:$36 sps:$4 sm:$0xff]  }
 0x290   :  { %11897 = vmatprep.subr.bf16.mxu1 %v12981_v22  ;;  %v13038_v19 = vld [vmem:[#allocation8 + $0x43c] ss:$36 sps:$4 sm:$0xff]  }
 0x291   :  { %v13041_v22 = vld [vmem:[#allocation8 + $0x8bc] ss:$36 sps:$4 sm:$0xff]  }
 0x292   :  { %11876 = vmatpush3.bf16.msra.mxu0 %v12982_v23  ;;  %v13036_v23 = vld [vmem:[#allocation8 + $0x438] ss:$36 sps:$4 sm:$0xff]  }
 0x293   :  { %11898 = vmatpush3.bf16.msra.mxu1 %v12983_v25  ;;  %11877 = vmatprep.subr.bf16.mxu0 %v12984_v26  ;;  %v13039_v25 = vld [vmem:[#allocation8 + $0x8b8] ss:$36 sps:$4 sm:$0xff]  }
 0x294   :  { %11899 = vmatprep.subr.bf16.mxu1 %v12985_v28  ;;  %v13044_v26 = vld [vmem:[#allocation8 + $0x3f4] ss:$36 sps:$4 sm:$0xff]  }
 0x295   :  { %v13047_v28 = vld [vmem:[#allocation8 + $0x874] ss:$36 sps:$4 sm:$0xff]  }
 0x296   :  { %11878 = vmatpush3.bf16.msra.mxu0 %v12986_v29  ;;  %v13042_v29 = vld [vmem:[#allocation8 + $0x3f0] ss:$36 sps:$4 sm:$0xff]  }
 0x297   :  { %11900 = vmatpush3.bf16.msra.mxu1 %v12987_v30  ;;  %8679 = vmatprep.subr.bf16.mxu0 %v12990_v31  ;;  %v13045_v30 = vld [vmem:[#allocation8 + $0x870] ss:$36 sps:$4 sm:$0xff]  }
 0x298   :  { %8720 = vmatprep.subr.bf16.mxu1 %v12993_v49  ;;  %v13050_v31 = vld [vmem:[#allocation8 + $0x3ac] ss:$36 sps:$4 sm:$0xff]  }
 0x299   :  { %v4208_v63 = vpop.f32.mrf.mxu0  ;;  %4533 = vmatmul.mubr.bf16.vlgmr.msra.gmra.mxu0 %v14264_v20  ;;  %v13000_v20 = vld [vmem:[#allocation8 + $0x168] ss:$36 sps:$4 sm:$0xff]  }
 0x29a   :  { %v4249_v48 = vpop.f32.mrf.mxu1  ;;  %4573 = vmatmul.mubr.bf16.vlgmr.msra.gmra.mxu1 %v14266_v21  ;;  %v4209_v50 = vadd.f32 %v4208_v63, %v14334_v16  ;;  %8680 = vmatpush1.bf16.msra.mxu0 %v12988_v62  ;;  %v13048_v49 = vld [vmem:[#allocation8 + $0x3a8] ss:$36 sps:$4 sm:$0xff]   ;;  %v13065_v63 = vld [vmem:[#allocation8 + $0x79c] ss:$36 sps:$4 sm:$0xff]  }
 0x29b   :  { %8711 = vmatprep.mubr.bf16.mxu0 %v14346_v43  ;;  %8721 = vmatpush1.bf16.msra.mxu1 %v12991_v36  ;;  %v14355_v51 = vpop.f32.mrf.mxu0  ;;  %v13051_v62 = vld [vmem:[#allocation8 + $0x828] ss:$36 sps:$4 sm:$0xff]  }
 0x29c   :  { %8752 = vmatprep.mubr.bf16.mxu1 %v14348_v46  ;;  %v14357_v6 = vpop.f32.mrf.mxu1  ;;  %v14359_v55 = vadd.f32 %v4249_v48, %v4209_v50  ;;  %8681 = vmatprep.subr.bf16.mxu0 %v12996_v39  ;;  %v13059_v36 = vld [vmem:[#allocation8 + $0x7e4] ss:$36 sps:$4 sm:$0xff]   ;;  %v13060_v48 = vld [vmem:[#allocation8 + $0x318] ss:$36 sps:$4 sm:$0xff]  }
 0x29d   :  { %8722 = vmatprep.subr.bf16.mxu1 %v12999_v42  ;;  %v4212_v21 = vpop.f32.mrf.mxu0  ;;  %v13054_v39 = vld [vmem:[#allocation8 + $0x360] ss:$36 sps:$4 sm:$0xff]   ;;  %v13071_v50 = vld [vmem:[#allocation8 + $0x754] ss:$36 sps:$4 sm:$0xff]  }
 0x29e   :  { %v4253_v56 = vpop.f32.mrf.mxu1  ;;  %8682 = vmatpush1.bf16.msra.mxu0 %v12994_v45  ;;  %v13057_v42 = vld [vmem:[#allocation8 + $0x7e0] ss:$36 sps:$4 sm:$0xff]   ;;  %v13074_v21 = vld [vmem:[#allocation8 + $0x28c] ss:$36 sps:$4 sm:$0xff]  }
 0x29f   :  { %8723 = vmatpush1.bf16.msra.mxu1 %v12997_v32  ;;  %v4213_v16 = vpop.f32.mrf.mxu0  ;;  %8683 = vmatprep.subr.bf16.mxu0 %v13002_v47  ;;  %v13062_v45 = vld [vmem:[#allocation8 + $0x31c] ss:$36 sps:$4 sm:$0xff]   ;;  %v13068_v47 = vld [vmem:[#allocation8 + $0x2d4] ss:$36 sps:$4 sm:$0xff]   ;;  %v13077_v56 = vld [vmem:[#allocation8 + $0x70c] ss:$36 sps:$4 sm:$0xff]  }
 0x2a0   :  { %v4254_v58 = vpop.f32.mrf.mxu1  ;;  %8724 = vmatprep.subr.bf16.mxu1 %v13005_v53  ;;  %v13063_v32 = vld [vmem:[#allocation8 + $0x798] ss:$36 sps:$4 sm:$0xff]   ;;  %v13066_v53 = vld [vmem:[#allocation8 + $0x2d0] ss:$36 sps:$4 sm:$0xff]   ;;  %v13072_v16 = vld [vmem:[#allocation8 + $0x288] ss:$36 sps:$4 sm:$0xff]  }
 0x2a1   :  { %v13075_v58 = vld [vmem:[#allocation8 + $0x708] ss:$36 sps:$4 sm:$0xff]  }
 0x2a2   :  { %8684 = vmatpush1.bf16.msra.mxu0 %v13000_v20  ;;  %v13069_v20 = vld [vmem:[#allocation8 + $0x750] ss:$36 sps:$4 sm:$0xff]  }
 0x2a3   :  { %8725 = vmatpush1.bf16.msra.mxu1 %v13003_v57  ;;  %8685 = vmatprep.subr.bf16.mxu0 %v13008_v60  ;;  %v4211_v57 = vadd.f32 %v14355_v51, %v14338_v24  ;;  %v13080_v60 = vld [vmem:[#allocation8 + $0x244] ss:$36 sps:$4 sm:$0xff]   ;;  %v4582_v24 = vmax.f32 %v14319_v35, 0.0  ;;  %v13101_v35 = vld [vmem:[#allocation8 + $0xf34] ss:$36 sps:$4 sm:$0xff]  }
 0x2a4   :  { %8726 = vmatprep.subr.bf16.mxu1 %v13011_v0 }
 0x2a5   :  { %v4252_v0 = vadd.f32 %v14357_v6, %v4211_v57  ;;  %v14368_v6 = vpack.c.bf16 %v4582_v24, %v4582_v24  ;;  %v13126_v57 = vld [vmem:[#allocation8 + $0xd38] ss:$36 sps:$4 sm:$0xff]   ;;  %v13155_v24 = vld [vmem:[#allocation8 + $0x112c] ss:$36 sps:$4 sm:$0xff]  }
 0x2a6   :  { %8686 = vmatpush1.bf16.msra.mxu0 %v13006_v61  ;;  %v13083_v61 = vld [vmem:[#allocation8 + $0x6c4] ss:$36 sps:$4 sm:$0xff]  }
 0x2a7   :  { %8727 = vmatpush1.bf16.msra.mxu1 %v13009_v1  ;;  %8687 = vmatprep.subr.bf16.mxu0 %v13014_v2  ;;  %v13078_v1 = vld [vmem:[#allocation8 + $0x240] ss:$36 sps:$4 sm:$0xff]   ;;  %v4585_v51 = vmax.f32 %v4252_v0, 0.0  ;;  %v13141_v0 = vld [vmem:[#allocation8 + $0x11b8] ss:$36 sps:$4 sm:$0xff]  }
 0x2a8   :  { %8728 = vmatprep.subr.bf16.mxu1 %v13017_v5  ;;  %v13081_v2 = vld [vmem:[#allocation8 + $0x6c0] ss:$36 sps:$4 sm:$0xff]  }
 0x2a9   :  { %v13086_v5 = vld [vmem:[#allocation8 + $0xafc] ss:$36 sps:$4 sm:$0xff]  }
 0x2aa   :  { %8688 = vmatpush1.bf16.msra.mxu0 %v13012_v4  ;;  %v4580_v4 = vmax.f32 %v14295_v27, 0.0  ;;  %v14370_v27 = vpack.c.bf16 %v4585_v51, %v4585_v51  ;;  %v13144_v51 = vld [vmem:[#allocation8 + $0xc60] ss:$36 sps:$4 sm:$0xff]  }
 0x2ab   :  { %8729 = vmatpush1.bf16.msra.mxu1 %v13015_v7  ;;  %8689 = vmatprep.subr.bf16.mxu0 %v13020_v10  ;;  %v13095_v7 = vld [vmem:[#allocation8 + $0xf7c] ss:$36 sps:$4 sm:$0xff]  }
 0x2ac   :  { %8730 = vmatprep.subr.bf16.mxu1 %v13023_v8  ;;  %v13084_v10 = vld [vmem:[#allocation8 + $0xaf8] ss:$36 sps:$4 sm:$0xff]  }
 0x2ad   :  { %v13089_v8 = vld [vmem:[#allocation8 + $0xab4] ss:$36 sps:$4 sm:$0xff]  }
 0x2ae   :  { %8690 = vmatpush1.bf16.msra.mxu0 %v13018_v9  ;;  %v14366_v9 = vpack.c.bf16 %v4580_v4, %v4580_v4  ;;  %v13138_v4 = vld [vmem:[#allocation8 + $0xca8] ss:$36 sps:$4 sm:$0xff]  }
 0x2af   :  { %8731 = vmatpush1.bf16.msra.mxu1 %v13021_v11  ;;  %8691 = vmatprep.subr.bf16.mxu0 %v13026_v12  ;;  %v13087_v11 = vld [vmem:[#allocation8 + $0xab0] ss:$36 sps:$4 sm:$0xff]   ;;  %v13093_v12 = vld [vmem:[#allocation8 + $0xf78] ss:$36 sps:$4 sm:$0xff]  }
 0x2b0   :  { %8732 = vmatprep.subr.bf16.mxu1 %v13029_v13 }
 0x2b2   :  { %8692 = vmatpush1.bf16.msra.mxu0 %v13024_v37 }
 0x2b3   :  { %8733 = vmatpush1.bf16.msra.mxu1 %v13027_v40  ;;  %8693 = vmatprep.subr.bf16.mxu0 %v13032_v14 }
 0x2b4   :  { %8734 = vmatprep.subr.bf16.mxu1 %v13035_v15  ;;  %v13092_v15 = vld [vmem:[#allocation8 + $0xa6c] ss:$36 sps:$4 sm:$0xff]  }
 0x2b6   :  { %8694 = vmatpush1.bf16.msra.mxu0 %v13030_v17  ;;  %v13090_v17 = vld [vmem:[#allocation8 + $0xa68] ss:$36 sps:$4 sm:$0xff]  }
 0x2b7   :  { %8735 = vmatpush1.bf16.msra.mxu1 %v13033_v18  ;;  %8695 = vmatprep.subr.bf16.mxu0 %v13038_v19  ;;  %v13099_v18 = vld [vmem:[#allocation8 + $0xf30] ss:$36 sps:$4 sm:$0xff]  }
 0x2b8   :  { %8736 = vmatprep.subr.bf16.mxu1 %v13041_v22 }
 0x2ba   :  { %8696 = vmatpush2.bf16.msra.mxu0 %v13036_v23  ;;  %v13107_v23 = vld [vmem:[#allocation8 + $0xeec] ss:$36 sps:$4 sm:$0xff]  }
 0x2bb   :  { %8737 = vmatpush2.bf16.msra.mxu1 %v13039_v25  ;;  %8697 = vmatprep.subr.bf16.mxu0 %v13044_v26 }
 0x2bc   :  { %8738 = vmatprep.subr.bf16.mxu1 %v13047_v28  ;;  %v13098_v28 = vld [vmem:[#allocation8 + $0xa24] ss:$36 sps:$4 sm:$0xff]  }
 0x2be   :  { %8698 = vmatpush2.bf16.msra.mxu0 %v13042_v29  ;;  %v13096_v29 = vld [vmem:[#allocation8 + $0xa20] ss:$36 sps:$4 sm:$0xff]  }
 0x2bf   :  { %8739 = vmatpush2.bf16.msra.mxu1 %v13045_v30  ;;  %8699 = vmatprep.subr.bf16.mxu0 %v13050_v31  ;;  %v13105_v30 = vld [vmem:[#allocation8 + $0xee8] ss:$36 sps:$4 sm:$0xff]  }
 0x2c0   :  { %8740 = vmatprep.subr.bf16.mxu1 %v13053_v52  ;;  %v13113_v31 = vld [vmem:[#allocation8 + $0xea4] ss:$36 sps:$4 sm:$0xff]   ;;  %v13102_v52 = vld [vmem:[#allocation8 + $0x9d8] ss:$36 sps:$4 sm:$0xff]  }
 0x2c2   :  { %8700 = vmatpush2.bf16.msra.mxu0 %v13048_v49  ;;  %v13104_v49 = vld [vmem:[#allocation8 + $0x9dc] ss:$36 sps:$4 sm:$0xff]  }
 0x2c3   :  { %8741 = vmatpush2.bf16.msra.mxu1 %v13051_v62  ;;  %8701 = vmatprep.subr.bf16.mxu0 %v13056_v34  ;;  %v13111_v62 = vld [vmem:[#allocation8 + $0xea0] ss:$36 sps:$4 sm:$0xff]   ;;  %v13110_v34 = vld [vmem:[#allocation8 + $0x994] ss:$36 sps:$4 sm:$0xff]  }
 0x2c4   :  { %8742 = vmatprep.subr.bf16.mxu1 %v13059_v36  ;;  %v13119_v36 = vld [vmem:[#allocation8 + $0xe5c] ss:$36 sps:$4 sm:$0xff]  }
 0x2c6   :  { %8702 = vmatpush2.bf16.msra.mxu0 %v13054_v39  ;;  %v13108_v39 = vld [vmem:[#allocation8 + $0x990] ss:$36 sps:$4 sm:$0xff]  }
 0x2c7   :  { %8743 = vmatpush2.bf16.msra.mxu1 %v13057_v42  ;;  %8703 = vmatprep.subr.bf16.mxu0 %v13062_v45  ;;  %v13117_v42 = vld [vmem:[#allocation8 + $0xe58] ss:$36 sps:$4 sm:$0xff]   ;;  %v13116_v45 = vld [vmem:[#allocation8 + $0x94c] ss:$36 sps:$4 sm:$0xff]  }
 0x2c8   :  { %8744 = vmatprep.subr.bf16.mxu1 %v13065_v63  ;;  %v13125_v63 = vld [vmem:[#allocation8 + $0xe14] ss:$36 sps:$4 sm:$0xff]  }
 0x2ca   :  { %8704 = vmatpush2.bf16.msra.mxu0 %v13060_v48  ;;  %v13114_v48 = vld [vmem:[#allocation8 + $0x948] ss:$36 sps:$4 sm:$0xff]  }
 0x2cb   :  { %8745 = vmatpush2.bf16.msra.mxu1 %v13063_v32  ;;  %8705 = vmatprep.subr.bf16.mxu0 %v13068_v47  ;;  %v13123_v32 = vld [vmem:[#allocation8 + $0xe10] ss:$36 sps:$4 sm:$0xff]   ;;  %v13122_v47 = vld [vmem:[#allocation8 + $0x904] ss:$36 sps:$4 sm:$0xff]  }
 0x2cc   :  { %8746 = vmatprep.subr.bf16.mxu1 %v13071_v50  ;;  %v13131_v50 = vld [vmem:[#allocation8 + $0xdcc] ss:$36 sps:$4 sm:$0xff]  }
 0x2ce   :  { %8706 = vmatpush2.bf16.msra.mxu0 %v13066_v53  ;;  %v13120_v53 = vld [vmem:[#allocation8 + $0x900] ss:$36 sps:$4 sm:$0xff]  }
 0x2cf   :  { %8747 = vmatpush2.bf16.msra.mxu1 %v13069_v20  ;;  %8707 = vmatprep.subr.bf16.mxu0 %v13074_v21  ;;  %v13129_v20 = vld [vmem:[#allocation8 + $0xdc8] ss:$36 sps:$4 sm:$0xff]   ;;  %v13128_v21 = vld [vmem:[#allocation8 + $0xd3c] ss:$36 sps:$4 sm:$0xff]  }
 0x2d0   :  { %8748 = vmatprep.subr.bf16.mxu1 %v13077_v56  ;;  %v13137_v56 = vld [vmem:[#allocation8 + $0xd84] ss:$36 sps:$4 sm:$0xff]  }
 0x2d2   :  { %8708 = vmatpush2.bf16.msra.mxu0 %v13072_v16  ;;  %v13135_v16 = vld [vmem:[#allocation8 + $0xd80] ss:$36 sps:$4 sm:$0xff]  }
 0x2d3   :  { %8749 = vmatpush2.bf16.msra.mxu1 %v13075_v58  ;;  %8709 = vmatprep.subr.bf16.mxu0 %v13080_v60  ;;  %v13134_v58 = vld [vmem:[#allocation8 + $0xcf4] ss:$36 sps:$4 sm:$0xff]   ;;  %v13143_v60 = vld [vmem:[#allocation8 + $0x11bc] ss:$36 sps:$4 sm:$0xff]  }
 0x2d4   :  { %8750 = vmatprep.subr.bf16.mxu1 %v13083_v61  ;;  %v13132_v61 = vld [vmem:[#allocation8 + $0xcf0] ss:$36 sps:$4 sm:$0xff]  }
 0x2d6   :  { %8710 = vmatpush2.bf16.msra.mxu0 %v13078_v1  ;;  %v13140_v1 = vld [vmem:[#allocation8 + $0xcac] ss:$36 sps:$4 sm:$0xff]  }
 0x2d7   :  { %8751 = vmatpush2.bf16.msra.mxu1 %v13081_v2  ;;  %8761 = vmatprep.subr.bf16.mxu0 %v13086_v5  ;;  %v13149_v2 = vld [vmem:[#allocation8 + $0x1174] ss:$36 sps:$4 sm:$0xff]  }
 0x2d8   :  { %8802 = vmatprep.subr.bf16.mxu1 %v13095_v7  ;;  %v13147_v5 = vld [vmem:[#allocation8 + $0x1170] ss:$36 sps:$4 sm:$0xff]   ;;  %v13146_v7 = vld [vmem:[#allocation8 + $0xc64] ss:$36 sps:$4 sm:$0xff]  }
 0x2d9   :  { %v14372_v13 = vpop.f32.mrf.mxu0  ;;  %8712 = vmatmul.mubr.bf16.vlgmr.msra.gmra.mxu0 %v14366_v9 }
 0x2da   :  { %v14374_v37 = vpop.f32.mrf.mxu1  ;;  %8753 = vmatmul.mubr.bf16.vlgmr.msra.gmra.mxu1 %v14368_v6  ;;  %8762 = vmatpush1.bf16.msra.mxu0 %v13084_v10  ;;  %v13153_v10 = vld [vmem:[#allocation8 + $0x1128] ss:$36 sps:$4 sm:$0xff]  }
 0x2db   :  { %8793 = vmatprep.mubr.bf16.mxu0 %v14370_v27  ;;  %v14379_v40 = vpop.f32.mrf.mxu0  ;;  %8763 = vmatprep.subr.bf16.mxu0 %v13089_v8  ;;  %v13152_v8 = vld [vmem:[#allocation8 + $0xc1c] ss:$36 sps:$4 sm:$0xff]  }
 0x2dc   :  { %v14381_v14 = vpop.f32.mrf.mxu1  ;;  %8803 = vmatpush1.bf16.msra.mxu1 %v13093_v12  ;;  %v13150_v12 = vld [vmem:[#allocation8 + $0xc18] ss:$36 sps:$4 sm:$0xff]  }
 0x2dd   :  { %v4294_v19 = vpop.f32.mrf.mxu0  ;;  %8804 = vmatprep.subr.bf16.mxu1 %v13101_v35  ;;  %v13159_v35 = vld [vmem:[#allocation8 + $0x10e0] ss:$36 sps:$4 sm:$0xff]  }
 0x2de   :  { %v4335_v22 = vpop.f32.mrf.mxu1  ;;  %8764 = vmatpush1.bf16.msra.mxu0 %v13087_v11  ;;  %v13161_v11 = vld [vmem:[#allocation8 + $0x10e4] ss:$36 sps:$4 sm:$0xff]   ;;  %v13165_v19 = vld [vmem:[#allocation8 + $0x1098] ss:$36 sps:$4 sm:$0xff]  }
 0x2df   :  { %v4295_v25 = vpop.f32.mrf.mxu0  ;;  %8765 = vmatprep.subr.bf16.mxu0 %v13092_v15  ;;  %v13158_v15 = vld [vmem:[#allocation8 + $0xbd4] ss:$36 sps:$4 sm:$0xff]   ;;  %v13164_v22 = vld [vmem:[#allocation8 + $0xb8c] ss:$36 sps:$4 sm:$0xff]  }
 0x2e0   :  { %v4336_v26 = vpop.f32.mrf.mxu1  ;;  %8805 = vmatpush1.bf16.msra.mxu1 %v13099_v18  ;;  %v13156_v18 = vld [vmem:[#allocation8 + $0xbd0] ss:$36 sps:$4 sm:$0xff]   ;;  %v801_v25 = vsub.s32 6, %v14276_v33 }
 0x2e1   :  { %8806 = vmatprep.subr.bf16.mxu1 %v13107_v23  ;;  %v13173_v23 = vld [vmem:[#allocation8 + $0x1054] ss:$36 sps:$4 sm:$0xff]   ;;  %v805_v26 = vsub.s32 7, %v14276_v33 }
 0x2e2   :  { %8766 = vmatpush1.bf16.msra.mxu0 %v13090_v17  ;;  %v13167_v17 = vld [vmem:[#allocation8 + $0x109c] ss:$36 sps:$4 sm:$0xff]  }
 0x2e3   :  { %8767 = vmatprep.subr.bf16.mxu0 %v13098_v28  ;;  %v13162_v28 = vld [vmem:[#allocation8 + $0xb88] ss:$36 sps:$4 sm:$0xff]  }
 0x2e4   :  { %8807 = vmatpush1.bf16.msra.mxu1 %v13105_v30  ;;  %v13170_v30 = vld [vmem:[#allocation8 + $0xb44] ss:$36 sps:$4 sm:$0xff]  }
 0x2e5   :  { %8808 = vmatprep.subr.bf16.mxu1 %v13113_v31  ;;  %v13176_v31 = vld [vmem:[#allocation8 + $0x100c] ss:$36 sps:$4 sm:$0xff]  }
 0x2e6   :  { %8768 = vmatpush1.bf16.msra.mxu0 %v13096_v29  ;;  %v13171_v29 = vld [vmem:[#allocation8 + $0x1050] ss:$36 sps:$4 sm:$0xff]  }
 0x2e7   :  { %8769 = vmatprep.subr.bf16.mxu0 %v13104_v49  ;;  %v4584_v49 = vmax.f32 %v14359_v55, 0.0  ;;  %v13182_v55 = vld [vmem:[#allocation8 + $0x204] ss:$36 sps:$4 sm:$0xff]  }
 0x2e8   :  { %8809 = vmatpush1.bf16.msra.mxu1 %v13111_v62 }
 0x2e9   :  { %8810 = vmatprep.subr.bf16.mxu1 %v13119_v36  ;;  %v13174_v36 = vld [vmem:[#allocation8 + $0x1008] ss:$36 sps:$4 sm:$0xff]  }
 0x2ea   :  { %8770 = vmatpush1.bf16.msra.mxu0 %v13102_v52  ;;  %v13998_v52 = vld [vmem:[#allocation7] sm:$0xff] }
 0x2eb   :  { %8771 = vmatprep.subr.bf16.mxu0 %v13110_v34  ;;  %v802_v62 = vrot.slane %v13998_v52, %v801_v25  ;;  %v13168_v34 = vld [vmem:[#allocation8 + $0xb40] ss:$36 sps:$4 sm:$0xff]  }
 0x2ec   :  { %8811 = vmatpush1.bf16.msra.mxu1 %v13117_v42  ;;  %v13209_v42 = vld [vmem:[#allocation8 + $0x13fc] ss:$36 sps:$4 sm:$0xff]  }
 0x2ed   :  { %8812 = vmatprep.subr.bf16.mxu1 %v13125_v63  ;;  %v4291_v63 = vadd.f32 %v14372_v13, %v802_v62  ;;  %v13213_v13 = vld [vmem:[#allocation8 + $0x13b0] ss:$36 sps:$4 sm:$0xff]   ;;  %v13243_v62 = vld [vmem:[#allocation8 + $0x1248] ss:$36 sps:$4 sm:$0xff]  }
 0x2ee   :  { %8772 = vmatpush1.bf16.msra.mxu0 %v13108_v39  ;;  %v13179_v39 = vld [vmem:[#allocation8 + $0xfc4] ss:$36 sps:$4 sm:$0xff]  }
 0x2ef   :  { %8773 = vmatprep.subr.bf16.mxu0 %v13116_v45  ;;  %v806_v45 = vrot.slane %v13998_v52, %v805_v26  ;;  %v13194_v52 = vld [vmem:[#allocation8 + $0xe4] ss:$36 sps:$4 sm:$0xff]  }
 0x2f0   :  { %8813 = vmatpush1.bf16.msra.mxu1 %v13123_v32  ;;  %v13207_v32 = vld [vmem:[#allocation8 + $0x13f8] ss:$36 sps:$4 sm:$0xff]  }
 0x2f1   :  { %8814 = vmatprep.subr.bf16.mxu1 %v13131_v50  ;;  %v4293_v50 = vadd.f32 %v14379_v40, %v806_v45  ;;  %v13195_v45 = vld [vmem:[#allocation8 + $0x98] ss:$36 sps:$4 sm:$0xff]  }
 0x2f2   :  { %8774 = vmatpush1.bf16.msra.mxu0 %v13114_v48  ;;  %v13177_v48 = vld [vmem:[#allocation8 + $0xfc0] ss:$36 sps:$4 sm:$0xff]  }
 0x2f3   :  { %8775 = vmatprep.subr.bf16.mxu0 %v13122_v47  ;;  %v13215_v47 = vld [vmem:[#allocation8 + $0x13b4] ss:$36 sps:$4 sm:$0xff]  }
 0x2f4   :  { %8815 = vmatpush1.bf16.msra.mxu1 %v13129_v20  ;;  %v4332_v20 = vadd.f32 %v14374_v37, %v4291_v63  ;;  %v13257_v63 = vld [vmem:[#allocation8 + $0x684] ss:$36 sps:$4 sm:$0xff]  }
 0x2f5   :  { %8816 = vmatprep.subr.bf16.mxu1 %v13137_v56 }
 0x2f6   :  { %8776 = vmatpush1.bf16.msra.mxu0 %v13120_v53  ;;  %v14392_v53 = vpack.c.bf16 %v4584_v49, %v4584_v49  ;;  %v13245_v49 = vld [vmem:[#allocation8 + $0x124c] ss:$36 sps:$4 sm:$0xff]  }
 0x2f7   :  { %8777 = vmatprep.subr.bf16.mxu0 %v13128_v21 }
 0x2f8   :  { %8817 = vmatpush1.bf16.msra.mxu1 %v13135_v16 }
 0x2f9   :  { %8818 = vmatprep.subr.bf16.mxu1 %v13143_v60  ;;  %v14181_v60 = vmov 0  }
 0x2fa   :  { %8778 = vmatpush2.bf16.msra.mxu0 %v13126_v57  ;;  %v4334_v57 = vadd.f32 %v14381_v14, %v4293_v50  ;;  %v13203_v50 = vld [vmem:[#allocation8 + $0xc] ss:$36 sps:$4 sm:$0xff]  }
 0x2fb   :  { %8779 = vmatprep.subr.bf16.mxu0 %v13134_v58  ;;  %v13221_v58 = vld [vmem:[#allocation8 + $0x136c] ss:$36 sps:$4 sm:$0xff]  }
 0x2fc   :  { %8819 = vmatpush2.bf16.msra.mxu1 %v13141_v0 }
 0x2fd   :  { %8820 = vmatprep.subr.bf16.mxu1 %v13149_v2 }
 0x2fe   :  { %8780 = vmatpush2.bf16.msra.mxu0 %v13132_v61 }
 0x2ff   :  { %8781 = vmatprep.subr.bf16.mxu0 %v13140_v1 }
 0x300   :  { %8821 = vmatpush2.bf16.msra.mxu1 %v13147_v5 }
 0x301   :  { %8822 = vmatprep.subr.bf16.mxu1 %v13155_v24  ;;  %v13227_v24 = vld [vmem:[#allocation8 + $0x1324] ss:$36 sps:$4 sm:$0xff]  }
 0x302   :  { %8782 = vmatpush2.bf16.msra.mxu0 %v13138_v4  ;;  %v13219_v4 = vld [vmem:[#allocation8 + $0x1368] ss:$36 sps:$4 sm:$0xff]  }
 0x303   :  { %8783 = vmatprep.subr.bf16.mxu0 %v13146_v7 }
 0x304   :  { %8823 = vmatpush2.bf16.msra.mxu1 %v13153_v10 }
 0x305   :  { %8824 = vmatprep.subr.bf16.mxu1 %v13161_v11  ;;  %v13185_v11 = vld [vmem:[#allocation8 + $0x1bc] ss:$36 sps:$4 sm:$0xff]  }
 0x306   :  { %8784 = vmatpush2.bf16.msra.mxu0 %v13144_v51 }
 0x307   :  { %8785 = vmatprep.subr.bf16.mxu0 %v13152_v8  ;;  %v13180_v8 = vld [vmem:[#allocation8 + $0x200] ss:$36 sps:$4 sm:$0xff]  }
 0x308   :  { %8825 = vmatpush2.bf16.msra.mxu1 %v13159_v35 }
 0x309   :  { %8826 = vmatprep.subr.bf16.mxu1 %v13167_v17  ;;  %v13233_v17 = vld [vmem:[#allocation8 + $0x12dc] ss:$36 sps:$4 sm:$0xff]  }
 0x30a   :  { %8786 = vmatpush2.bf16.msra.mxu0 %v13150_v12  ;;  %v13225_v12 = vld [vmem:[#allocation8 + $0x1320] ss:$36 sps:$4 sm:$0xff]  }
 0x30b   :  { %8787 = vmatprep.subr.bf16.mxu0 %v13158_v15 }
 0x30c   :  { %8827 = vmatpush2.bf16.msra.mxu1 %v13165_v19  ;;  %v13188_v19 = vld [vmem:[#allocation8 + $0x174] ss:$36 sps:$4 sm:$0xff]  }
 0x30d   :  { %8828 = vmatprep.subr.bf16.mxu1 %v13173_v23  ;;  %v13186_v23 = vld [vmem:[#allocation8 + $0x170] ss:$36 sps:$4 sm:$0xff]  }
 0x30e   :  { %8788 = vmatpush2.bf16.msra.mxu0 %v13156_v18  ;;  %v13183_v18 = vld [vmem:[#allocation8 + $0x1b8] ss:$36 sps:$4 sm:$0xff]  }
 0x30f   :  { %8789 = vmatprep.subr.bf16.mxu0 %v13164_v22  ;;  %v13231_v22 = vld [vmem:[#allocation8 + $0x12d8] ss:$36 sps:$4 sm:$0xff]  }
 0x310   :  { %8829 = vmatpush2.bf16.msra.mxu1 %v13171_v29  ;;  %v13191_v29 = vld [vmem:[#allocation8 + $0x12c] ss:$36 sps:$4 sm:$0xff]  }
 0x311   :  { %8830 = vmatprep.subr.bf16.mxu1 %v13176_v31  ;;  %v13189_v31 = vld [vmem:[#allocation8 + $0x128] ss:$36 sps:$4 sm:$0xff]  }
 0x312   :  { %8790 = vmatpush2.bf16.msra.mxu0 %v13162_v28  ;;  %v13239_v28 = vld [vmem:[#allocation8 + $0x1294] ss:$36 sps:$4 sm:$0xff]  }
 0x313   :  { %8791 = vmatprep.subr.bf16.mxu0 %v13170_v30  ;;  %v13237_v30 = vld [vmem:[#allocation8 + $0x1290] ss:$36 sps:$4 sm:$0xff]  }
 0x314   :  { %8831 = vmatpush2.bf16.msra.mxu1 %v13174_v36  ;;  %v13251_v36 = vld [vmem:[#allocation8 + $0x1204] ss:$36 sps:$4 sm:$0xff]  }
 0x315   :  { %8832 = vmatprep.subr.bf16.mxu1 %v13179_v39  ;;  %v13197_v39 = vld [vmem:[#allocation8 + $0x9c] ss:$36 sps:$4 sm:$0xff]  }
 0x316   :  { %8792 = vmatpush2.bf16.msra.mxu0 %v13168_v34  ;;  %v13192_v34 = vld [vmem:[#allocation8 + $0xe0] ss:$36 sps:$4 sm:$0xff]  }
 0x317   :  { %8843 = vmatprep.subr.bf16.mxu0 %v13209_v42  ;;  %v13249_v42 = vld [vmem:[#allocation8 + $0x1200] ss:$36 sps:$4 sm:$0xff]  }
 0x318   :  { %8833 = vmatpush2.bf16.msra.mxu1 %v13177_v48  ;;  %v13200_v48 = vld [vmem:[#allocation8 + $0x54] ss:$36 sps:$4 sm:$0xff]  }
 0x319   :  { %v4372_v21 = vpop.f32.mrf.mxu0  ;;  %8794 = vmatmul.mubr.bf16.vlgmr.msra.gmra.mxu0 %v14392_v53  ;;  %8884 = vmatprep.subr.bf16.mxu1 %v13182_v55  ;;  %v13198_v55 = vld [vmem:[#allocation8 + $0x50] ss:$36 sps:$4 sm:$0xff]  }
 0x31a   :  { %v4413_v56 = vpop.f32.mrf.mxu1  ;;  %v4373_v16 = vadd.f32 %v4372_v21, %v4332_v20  ;;  %8844 = vmatpush1.bf16.msra.mxu0 %v13207_v32  ;;  %8875 = vmatprep.mubr.bf16.mxu0 %v14181_v60 }
 0x31b   :  { %v4374_v40 = vpop.f32.mrf.mxu0  ;;  %8845 = vmatprep.subr.bf16.mxu0 %v13215_v47 }
 0x31c   :  { %v4415_v61 = vpop.f32.mrf.mxu1  ;;  %v4414_v0 = vadd.f32 %v4413_v56, %v4373_v16  ;;  %v4375_v37 = vadd.f32 %v4374_v40, %v4334_v57  ;;  %v13201_v56 = vld [vmem:[#allocation8 + $0x8] ss:$36 sps:$4 sm:$0xff]  }
 0x31d   :  { %v4376_v1 = vpop.f32.mrf.mxu0  ;;  %v13206_v16 = vld [vmem:[#allocation8 + $0x444] ss:$36 sps:$4 sm:$0xff]  }
 0x31e   :  { %v4417_v2 = vpop.f32.mrf.mxu1  ;;  %v4586_v5 = vmax.f32 %v4414_v0, 0.0  ;;  %v4416_v7 = vadd.f32 %v4415_v61, %v4375_v37  ;;  %8846 = vmatpush1.bf16.msra.mxu0 %v13213_v13  ;;  %v13204_v61 = vld [vmem:[#allocation8 + $0x440] ss:$36 sps:$4 sm:$0xff]   ;;  %v13210_v37 = vld [vmem:[#allocation8 + $0x3f8] ss:$36 sps:$4 sm:$0xff]  }
 0x31f   :  { %v4377_v51 = vpop.f32.mrf.mxu0  ;;  %8847 = vmatprep.subr.bf16.mxu0 %v13221_v58  ;;  %v13212_v0 = vld [vmem:[#allocation8 + $0x3fc] ss:$36 sps:$4 sm:$0xff]   ;;  %v13218_v1 = vld [vmem:[#allocation8 + $0x3b4] ss:$36 sps:$4 sm:$0xff]  }
 0x320   :  { %v4418_v14 = vpop.f32.mrf.mxu1  ;;  %v4587_v10 = vmax.f32 %v4416_v7, 0.0  ;;  %v14400_v15 = vpack.c.bf16 %v4586_v5, %v4586_v5  ;;  %v13216_v2 = vld [vmem:[#allocation8 + $0x3b0] ss:$36 sps:$4 sm:$0xff]   ;;  %v13222_v5 = vld [vmem:[#allocation8 + $0x368] ss:$36 sps:$4 sm:$0xff]  }
 0x321   :  { %v13230_v7 = vld [vmem:[#allocation8 + $0x324] ss:$36 sps:$4 sm:$0xff]   ;;  %v13236_v51 = vld [vmem:[#allocation8 + $0x2dc] ss:$36 sps:$4 sm:$0xff]  }
 0x322   :  { %v14398_v35 = vpack.c.bf16 %v4587_v10, %v4587_v10  ;;  %8848 = vmatpush1.bf16.msra.mxu0 %v13219_v4  ;;  %v13224_v4 = vld [vmem:[#allocation8 + $0x36c] ss:$36 sps:$4 sm:$0xff]   ;;  %v10520_v14 = vld [vmem:[#allocation7 + $0x8] ss:$0 sm:$0xff] }
 0x323   :  { %8849 = vmatprep.subr.bf16.mxu0 %v13227_v24  ;;  %v13228_v24 = vld [vmem:[#allocation8 + $0x320] ss:$36 sps:$4 sm:$0xff]  }
 0x324   :  { %8834 = vmatprep.mubr.bf16.mxu1 %v14398_v35 }
 0x325   :  { %8835 = vmatmul.mubr.bf16.vlgmr.msra.gmra.mxu1 %v14400_v15 }
 0x326   :  { %8885 = vmatpush1.bf16.msra.mxu1 %v13180_v8  ;;  %8916 = vmatprep.mubr.bf16.mxu1 %v14346_v43  ;;  %v13234_v8 = vld [vmem:[#allocation8 + $0x2d8] ss:$36 sps:$4 sm:$0xff]  }
 0x327   :  { %8886 = vmatprep.subr.bf16.mxu1 %v13185_v11  ;;  %8850 = vmatpush1.bf16.msra.mxu0 %v13225_v12  ;;  %v13242_v11 = vld [vmem:[#allocation8 + $0x294] ss:$36 sps:$4 sm:$0xff]  }
 0x328   :  { %8851 = vmatprep.subr.bf16.mxu0 %v13233_v17 }
 0x32a   :  { %8887 = vmatpush1.bf16.msra.mxu1 %v13183_v18 }
 0x32b   :  { %8888 = vmatprep.subr.bf16.mxu1 %v13188_v19  ;;  %8852 = vmatpush1.bf16.msra.mxu0 %v13231_v22  ;;  %v13240_v22 = vld [vmem:[#allocation8 + $0x290] ss:$36 sps:$4 sm:$0xff]  }
 0x32c   :  { %8853 = vmatprep.subr.bf16.mxu0 %v13239_v28 }
 0x32e   :  { %8889 = vmatpush1.bf16.msra.mxu1 %v13186_v23  ;;  %v13248_v23 = vld [vmem:[#allocation8 + $0x24c] ss:$36 sps:$4 sm:$0xff]  }
 0x32f   :  { %8890 = vmatprep.subr.bf16.mxu1 %v13191_v29  ;;  %8854 = vmatpush1.bf16.msra.mxu0 %v13237_v30 }
 0x330   :  { %8855 = vmatprep.subr.bf16.mxu0 %v13245_v49 }
 0x332   :  { %8891 = vmatpush1.bf16.msra.mxu1 %v13189_v31 }
 0x333   :  { %8892 = vmatprep.subr.bf16.mxu1 %v13194_v52  ;;  %8856 = vmatpush1.bf16.msra.mxu0 %v13243_v62  ;;  %v13246_v62 = vld [vmem:[#allocation8 + $0x248] ss:$36 sps:$4 sm:$0xff]  }
 0x334   :  { %8857 = vmatprep.subr.bf16.mxu0 %v13251_v36 }
 0x336   :  { %8893 = vmatpush1.bf16.msra.mxu1 %v13192_v34  ;;  %v13254_v34 = vld [vmem:[#allocation8 + $0xb04] ss:$36 sps:$4 sm:$0xff]  }
 0x337   :  { %8894 = vmatprep.subr.bf16.mxu1 %v13197_v39  ;;  %8858 = vmatpush1.bf16.msra.mxu0 %v13249_v42 }
 0x338   :  { %8925 = vmatprep.subr.bf16.mxu0 %v13257_v63 }
 0x339   :  { %v11835_v32 = vpop.f32.mrf.mxu0 }
 0x33a   :  { %v11857_v47 = vpop.f32.mrf.mxu1  ;;  %8895 = vmatpush1.bf16.msra.mxu1 %v13195_v45 }
 0x33b   :  { %v11836_v20 = vpop.f32.mrf.mxu0  ;;  %8896 = vmatprep.subr.bf16.mxu1 %v13200_v48  ;;  %v13252_v48 = vld [vmem:[#allocation8 + $0xb00] ss:$36 sps:$4 sm:$0xff]  }
 0x33c   :  { %v11858_v21 = vpop.f32.mrf.mxu1  ;;  %v11837_v10 = vadd.f32 %v11836_v20, %v11835_v32  ;;  %v13258_v20 = vld [vmem:[#allocation8 + $0xab8] ss:$36 sps:$4 sm:$0xff]  }
 0x33d   :  { %v11838_v13 = vpop.f32.mrf.mxu0  ;;  %v11859_v17 = vadd.f32 %v11858_v21, %v11857_v47  ;;  %v13263_v21 = vld [vmem:[#allocation8 + $0x63c] ss:$36 sps:$4 sm:$0xff]  }
 0x33e   :  { %v11860_v57 = vpop.f32.mrf.mxu1  ;;  %8897 = vmatpush1.bf16.msra.mxu1 %v13198_v55  ;;  %v4455_v12 = vadd.f32 %v11837_v10, %v10520_v14  ;;  %v13260_v55 = vld [vmem:[#allocation8 + $0xabc] ss:$36 sps:$4 sm:$0xff]   ;;  %v13290_v14 = vld [vmem:[#allocation8 + $0x954] ss:$36 sps:$4 sm:$0xff]  }
 0x33f   :  { %v11839_v58 = vpop.f32.mrf.mxu0  ;;  %8898 = vmatprep.subr.bf16.mxu1 %v13203_v50  ;;  %v13255_v50 = vld [vmem:[#allocation8 + $0x680] ss:$36 sps:$4 sm:$0xff]   ;;  %v13261_v13 = vld [vmem:[#allocation8 + $0x638] ss:$36 sps:$4 sm:$0xff]   ;;  %v13264_v57 = vld [vmem:[#allocation8 + $0xa70] ss:$36 sps:$4 sm:$0xff]  }
 0x340   :  { %v11861_v40 = vpop.f32.mrf.mxu1  ;;  %v4495_v30 = vadd.f32 %v11859_v17, %v4455_v12  ;;  %v13272_v58 = vld [vmem:[#allocation8 + $0xa2c] ss:$36 sps:$4 sm:$0xff]   ;;  %v13285_v10 = vld [vmem:[#allocation8 + $0x518] ss:$36 sps:$4 sm:$0xff]  }
 0x341   :  { %v13267_v40 = vld [vmem:[#allocation8 + $0x5f0] ss:$36 sps:$4 sm:$0xff]  }
 0x342   :  { %8899 = vmatpush1.bf16.msra.mxu1 %v13201_v56  ;;  %v13266_v56 = vld [vmem:[#allocation8 + $0xa74] ss:$36 sps:$4 sm:$0xff]   ;;  %v13296_v12 = vld [vmem:[#allocation8 + $0x90c] ss:$36 sps:$4 sm:$0xff]  }
 0x343   :  { %8900 = vmatprep.subr.bf16.mxu1 %v13206_v16  ;;  %v13269_v16 = vld [vmem:[#allocation8 + $0x5f4] ss:$36 sps:$4 sm:$0xff]  }
 0x344   :  { %v13291_v17 = vld [vmem:[#allocation8 + $0x4d0] ss:$36 sps:$4 sm:$0xff]  }
 0x346   :  { %8901 = vmatpush2.bf16.msra.mxu1 %v13204_v61  ;;  %v13270_v61 = vld [vmem:[#allocation8 + $0xa28] ss:$36 sps:$4 sm:$0xff]  }
 0x347   :  { %8902 = vmatprep.subr.bf16.mxu1 %v13212_v0  ;;  %v13275_v0 = vld [vmem:[#allocation8 + $0x5ac] ss:$36 sps:$4 sm:$0xff]  }
 0x34a   :  { %8903 = vmatpush2.bf16.msra.mxu1 %v13210_v37  ;;  %v13278_v37 = vld [vmem:[#allocation8 + $0x9e4] ss:$36 sps:$4 sm:$0xff]  }
 0x34b   :  { %8904 = vmatprep.subr.bf16.mxu1 %v13218_v1  ;;  %v13273_v1 = vld [vmem:[#allocation8 + $0x5a8] ss:$36 sps:$4 sm:$0xff]  }
 0x34e   :  { %8905 = vmatpush2.bf16.msra.mxu1 %v13216_v2  ;;  %v13276_v2 = vld [vmem:[#allocation8 + $0x9e0] ss:$36 sps:$4 sm:$0xff]  }
 0x34f   :  { %8906 = vmatprep.subr.bf16.mxu1 %v13224_v4  ;;  %v13281_v4 = vld [vmem:[#allocation8 + $0x564] ss:$36 sps:$4 sm:$0xff]  }
 0x352   :  { %8907 = vmatpush2.bf16.msra.mxu1 %v13222_v5  ;;  %v13284_v5 = vld [vmem:[#allocation8 + $0x99c] ss:$36 sps:$4 sm:$0xff]  }
 0x353   :  { %8908 = vmatprep.subr.bf16.mxu1 %v13230_v7  ;;  %v13279_v7 = vld [vmem:[#allocation8 + $0x560] ss:$36 sps:$4 sm:$0xff]  }
 0x356   :  { %8909 = vmatpush2.bf16.msra.mxu1 %v13228_v24  ;;  %v13282_v24 = vld [vmem:[#allocation8 + $0x998] ss:$36 sps:$4 sm:$0xff]  }
 0x357   :  { %8910 = vmatprep.subr.bf16.mxu1 %v13236_v51  ;;  %v13287_v51 = vld [vmem:[#allocation8 + $0x51c] ss:$36 sps:$4 sm:$0xff]  }
 0x359   :  { %v11879_v18 = vpop.f32.mrf.mxu0 }
 0x35a   :  { %v11901_v19 = vpop.f32.mrf.mxu1  ;;  %8911 = vmatpush2.bf16.msra.mxu1 %v13234_v8  ;;  %v13288_v8 = vld [vmem:[#allocation8 + $0x950] ss:$36 sps:$4 sm:$0xff]  }
 0x35b   :  { %v11880_v28 = vpop.f32.mrf.mxu0  ;;  %8912 = vmatprep.subr.bf16.mxu1 %v13242_v11  ;;  %v13293_v11 = vld [vmem:[#allocation8 + $0x4d4] ss:$36 sps:$4 sm:$0xff]  }
 0x35c   :  { %v11902_v29 = vpop.f32.mrf.mxu1  ;;  %v11881_v31 = vadd.f32 %v11880_v28, %v11879_v18  ;;  %v13299_v18 = vld [vmem:[#allocation8 + $0x48c] ss:$36 sps:$4 sm:$0xff]   ;;  %v13305_v28 = vld [vmem:[#allocation8 + $0x8c4] ss:$36 sps:$4 sm:$0xff]  }
 0x35d   :  { %v11882_v49 = vpop.f32.mrf.mxu0  ;;  %v11903_v39 = vadd.f32 %v11902_v29, %v11901_v19  ;;  %v13294_v19 = vld [vmem:[#allocation8 + $0x908] ss:$36 sps:$4 sm:$0xff]   ;;  %v13300_v29 = vld [vmem:[#allocation8 + $0xd40] ss:$36 sps:$4 sm:$0xff]  }
 0x35e   :  { %v11904_v52 = vpop.f32.mrf.mxu1  ;;  %v4535_v36 = vadd.f32 %v11881_v31, %v4495_v30  ;;  %8913 = vmatpush2.bf16.msra.mxu1 %v13240_v22  ;;  %v13302_v22 = vld [vmem:[#allocation8 + $0xd44] ss:$36 sps:$4 sm:$0xff]   ;;  %v13308_v30 = vld [vmem:[#allocation8 + $0xcfc] ss:$36 sps:$4 sm:$0xff]  }
 0x35f   :  { %v11883_v42 = vpop.f32.mrf.mxu0  ;;  %8914 = vmatprep.subr.bf16.mxu1 %v13248_v23  ;;  %v13297_v23 = vld [vmem:[#allocation8 + $0x488] ss:$36 sps:$4 sm:$0xff]   ;;  %v13303_v31 = vld [vmem:[#allocation8 + $0x8c0] ss:$36 sps:$4 sm:$0xff]   ;;  %v13306_v52 = vld [vmem:[#allocation8 + $0xcf8] ss:$36 sps:$4 sm:$0xff]  }
 0x360   :  { %v11905_v45 = vpop.f32.mrf.mxu1  ;;  %v4575_v63 = vadd.f32 %v11903_v39, %v4535_v36  ;;  %v13311_v49 = vld [vmem:[#allocation8 + $0x87c] ss:$36 sps:$4 sm:$0xff]   ;;  %v13317_v36 = vld [vmem:[#allocation8 + $0x834] ss:$36 sps:$4 sm:$0xff]   ;;  %v13320_v42 = vld [vmem:[#allocation8 + $0xc6c] ss:$36 sps:$4 sm:$0xff]  }
 0x361   :  { %v13312_v39 = vld [vmem:[#allocation8 + $0xcb0] ss:$36 sps:$4 sm:$0xff]  }
 0x362   :  { %v4588_v32 = vmax.f32 %v4575_v63, 0.0  ;;  %8915 = vmatpush2.bf16.msra.mxu1 %v13246_v62  ;;  %v13314_v62 = vld [vmem:[#allocation8 + $0xcb4] ss:$36 sps:$4 sm:$0xff]   ;;  %v13323_v63 = vld [vmem:[#allocation8 + $0x7ec] ss:$36 sps:$4 sm:$0xff]  }
 0x363   :  { %8966 = vmatprep.subr.bf16.mxu1 %v13254_v34  ;;  %v13309_v34 = vld [vmem:[#allocation8 + $0x878] ss:$36 sps:$4 sm:$0xff]   ;;  %v13315_v45 = vld [vmem:[#allocation8 + $0x830] ss:$36 sps:$4 sm:$0xff]  }
 0x364   :  { %v14405_v47 = vpack.c.bf16 %v4588_v32, %v4588_v32  ;;  %v13321_v32 = vld [vmem:[#allocation8 + $0x7e8] ss:$36 sps:$4 sm:$0xff]  }
 0x365   :  { %8917 = vmatmul.mubr.bf16.vlgmr.msra.gmra.mxu1 %v14366_v9 }
 0x366   :  { %8967 = vmatpush1.bf16.msra.mxu1 %v13252_v48  ;;  %8998 = vmatprep.mubr.bf16.mxu1 %v14370_v27  ;;  %v13318_v48 = vld [vmem:[#allocation8 + $0xc68] ss:$36 sps:$4 sm:$0xff]  }
 0x367   :  { %8876 = vmatmul.mubr.bf16.vlgmr.msra.gmra.mxu0 %v14405_v47  ;;  %8968 = vmatprep.subr.bf16.mxu1 %v13260_v55  ;;  %v13326_v55 = vld [vmem:[#allocation8 + $0xc24] ss:$36 sps:$4 sm:$0xff]  }
 0x368   :  { %8926 = vmatpush1.bf16.msra.mxu0 %v13255_v50  ;;  %8957 = vmatprep.mubr.bf16.mxu0 %v14348_v46  ;;  %v13329_v50 = vld [vmem:[#allocation8 + $0x7a4] ss:$36 sps:$4 sm:$0xff]  }
 0x369   :  { %8927 = vmatprep.subr.bf16.mxu0 %v13263_v21  ;;  %v13332_v21 = vld [vmem:[#allocation8 + $0xbdc] ss:$36 sps:$4 sm:$0xff]  }
 0x36a   :  { %8969 = vmatpush1.bf16.msra.mxu1 %v13258_v20  ;;  %v13324_v20 = vld [vmem:[#allocation8 + $0xc20] ss:$36 sps:$4 sm:$0xff]  }
 0x36b   :  { %8970 = vmatprep.subr.bf16.mxu1 %v13266_v56  ;;  %v14411_v56 = vld [vmem:[#allocation10] sm:$0xff] }
 0x36c   :  { %8928 = vmatpush1.bf16.msra.mxu0 %v13261_v13  ;;  %v13327_v13 = vld [vmem:[#allocation8 + $0x7a0] ss:$36 sps:$4 sm:$0xff]  }
 0x36d   :  { %8929 = vmatprep.subr.bf16.mxu0 %v13269_v16  ;;  %v13330_v16 = vld [vmem:[#allocation8 + $0xbd8] ss:$36 sps:$4 sm:$0xff]  }
 0x36e   :  { %8971 = vmatpush1.bf16.msra.mxu1 %v13264_v57  ;;  %v13335_v57 = vld [vmem:[#allocation8 + $0x75c] ss:$36 sps:$4 sm:$0xff]  }
 0x36f   :  { %8972 = vmatprep.subr.bf16.mxu1 %v13272_v58  ;;  %v5325_v58 = vrot.slane %v14411_v56, %v777_v41 }
 0x370   :  { %8930 = vmatpush1.bf16.msra.mxu0 %v13267_v40  ;;  %v13338_v40 = vld [vmem:[#allocation8 + $0xb94] ss:$36 sps:$4 sm:$0xff]  }
 0x371   :  { %8931 = vmatprep.subr.bf16.mxu0 %v13275_v0  ;;  %v5329_v0 = vrot.slane %v14411_v56, %v781_v44 }
 0x372   :  { %8973 = vmatpush1.bf16.msra.mxu1 %v13270_v61  ;;  %v13333_v61 = vld [vmem:[#allocation8 + $0x758] ss:$36 sps:$4 sm:$0xff]  }
 0x373   :  { %8974 = vmatprep.subr.bf16.mxu1 %v13278_v37 }
 0x374   :  { %8932 = vmatpush1.bf16.msra.mxu0 %v13273_v1  ;;  %v13341_v1 = vld [vmem:[#allocation8 + $0x714] ss:$36 sps:$4 sm:$0xff]  }
 0x375   :  { %8933 = vmatprep.subr.bf16.mxu0 %v13281_v4 }
 0x376   :  { %8975 = vmatpush1.bf16.msra.mxu1 %v13276_v2 }
 0x377   :  { %8976 = vmatprep.subr.bf16.mxu1 %v13284_v5  ;;  %v13336_v5 = vld [vmem:[#allocation8 + $0xb90] ss:$36 sps:$4 sm:$0xff]  }
 0x378   :  { %8934 = vmatpush1.bf16.msra.mxu0 %v13279_v7 }
 0x379   :  { %8935 = vmatprep.subr.bf16.mxu0 %v13287_v51 }
 0x37a   :  { %8977 = vmatpush1.bf16.msra.mxu1 %v13282_v24  ;;  %v13344_v24 = vld [vmem:[#allocation8 + $0xb4c] ss:$36 sps:$4 sm:$0xff]  }
 0x37b   :  { %8978 = vmatprep.subr.bf16.mxu1 %v13290_v14 }
 0x37c   :  { %8936 = vmatpush1.bf16.msra.mxu0 %v13285_v10  ;;  %v13339_v10 = vld [vmem:[#allocation8 + $0x710] ss:$36 sps:$4 sm:$0xff]  }
 0x37d   :  { %8937 = vmatprep.subr.bf16.mxu0 %v13293_v11  ;;  %v13347_v11 = vld [vmem:[#allocation8 + $0x6cc] ss:$36 sps:$4 sm:$0xff]  }
 0x37e   :  { %8979 = vmatpush1.bf16.msra.mxu1 %v13288_v8 }
 0x37f   :  { %8980 = vmatprep.subr.bf16.mxu1 %v13296_v12 }
 0x380   :  { %8938 = vmatpush1.bf16.msra.mxu0 %v13291_v17  ;;  %v13342_v17 = vld [vmem:[#allocation8 + $0xb48] ss:$36 sps:$4 sm:$0xff]  }
 0x381   :  { %8939 = vmatprep.subr.bf16.mxu0 %v13299_v18 }
 0x382   :  { %8981 = vmatpush1.bf16.msra.mxu1 %v13294_v19  ;;  %v13350_v19 = vld [vmem:[#allocation8 + $0x1404] ss:$36 sps:$4 sm:$0xff]  }
 0x383   :  { %8982 = vmatprep.subr.bf16.mxu1 %v13302_v22 }
 0x384   :  { %8940 = vmatpush1.bf16.msra.mxu0 %v13297_v23  ;;  %v13345_v23 = vld [vmem:[#allocation8 + $0x6c8] ss:$36 sps:$4 sm:$0xff]  }
 0x385   :  { %8941 = vmatprep.subr.bf16.mxu0 %v13305_v28  ;;  %v13353_v28 = vld [vmem:[#allocation8 + $0xf84] ss:$36 sps:$4 sm:$0xff]  }
 0x386   :  { %8983 = vmatpush2.bf16.msra.mxu1 %v13300_v29  ;;  %v13348_v29 = vld [vmem:[#allocation8 + $0x1400] ss:$36 sps:$4 sm:$0xff]  }
 0x387   :  { %8984 = vmatprep.subr.bf16.mxu1 %v13308_v30  ;;  %v13356_v30 = vld [vmem:[#allocation8 + $0x13bc] ss:$36 sps:$4 sm:$0xff]  }
 0x388   :  { %8942 = vmatpush2.bf16.msra.mxu0 %v13303_v31  ;;  %v13351_v31 = vld [vmem:[#allocation8 + $0xf80] ss:$36 sps:$4 sm:$0xff]  }
 0x389   :  { %8943 = vmatprep.subr.bf16.mxu0 %v13311_v49  ;;  %v13359_v49 = vld [vmem:[#allocation8 + $0xf3c] ss:$36 sps:$4 sm:$0xff]  }
 0x38a   :  { %8985 = vmatpush2.bf16.msra.mxu1 %v13306_v52  ;;  %v13354_v52 = vld [vmem:[#allocation8 + $0x13b8] ss:$36 sps:$4 sm:$0xff]  }
 0x38b   :  { %8986 = vmatprep.subr.bf16.mxu1 %v13314_v62  ;;  %v13362_v62 = vld [vmem:[#allocation8 + $0x1374] ss:$36 sps:$4 sm:$0xff]  }
 0x38c   :  { %8944 = vmatpush2.bf16.msra.mxu0 %v13309_v34  ;;  %v13357_v34 = vld [vmem:[#allocation8 + $0xf38] ss:$36 sps:$4 sm:$0xff]  }
 0x38d   :  { %8945 = vmatprep.subr.bf16.mxu0 %v13317_v36  ;;  %v13365_v36 = vld [vmem:[#allocation8 + $0xef4] ss:$36 sps:$4 sm:$0xff]  }
 0x38e   :  { %8987 = vmatpush2.bf16.msra.mxu1 %v13312_v39  ;;  %v13360_v39 = vld [vmem:[#allocation8 + $0x1370] ss:$36 sps:$4 sm:$0xff]  }
 0x38f   :  { %8988 = vmatprep.subr.bf16.mxu1 %v13320_v42  ;;  %v13368_v42 = vld [vmem:[#allocation8 + $0x132c] ss:$36 sps:$4 sm:$0xff]  }
 0x390   :  { %8946 = vmatpush2.bf16.msra.mxu0 %v13315_v45  ;;  %v13363_v45 = vld [vmem:[#allocation8 + $0xef0] ss:$36 sps:$4 sm:$0xff]  }
 0x391   :  { %8947 = vmatprep.subr.bf16.mxu0 %v13323_v63  ;;  %v13371_v63 = vld [vmem:[#allocation8 + $0xeac] ss:$36 sps:$4 sm:$0xff]  }
 0x392   :  { %8989 = vmatpush2.bf16.msra.mxu1 %v13318_v48  ;;  %v13366_v48 = vld [vmem:[#allocation8 + $0x1328] ss:$36 sps:$4 sm:$0xff]  }
 0x393   :  { %8990 = vmatprep.subr.bf16.mxu1 %v13326_v55  ;;  %v13374_v55 = vld [vmem:[#allocation8 + $0x12e4] ss:$36 sps:$4 sm:$0xff]  }
 0x394   :  { %8948 = vmatpush2.bf16.msra.mxu0 %v13321_v32  ;;  %v13369_v32 = vld [vmem:[#allocation8 + $0xea8] ss:$36 sps:$4 sm:$0xff]  }
 0x395   :  { %8949 = vmatprep.subr.bf16.mxu0 %v13329_v50  ;;  %v13377_v50 = vld [vmem:[#allocation8 + $0xe64] ss:$36 sps:$4 sm:$0xff]  }
 0x396   :  { %8991 = vmatpush2.bf16.msra.mxu1 %v13324_v20  ;;  %v13372_v20 = vld [vmem:[#allocation8 + $0x12e0] ss:$36 sps:$4 sm:$0xff]  }
 0x397   :  { %8992 = vmatprep.subr.bf16.mxu1 %v13332_v21  ;;  %v13380_v21 = vld [vmem:[#allocation8 + $0x129c] ss:$36 sps:$4 sm:$0xff]  }
 0x398   :  { %8950 = vmatpush2.bf16.msra.mxu0 %v13327_v13  ;;  %v13375_v13 = vld [vmem:[#allocation8 + $0xe60] ss:$36 sps:$4 sm:$0xff]  }
 0x399   :  { %v8713_v37 = vpop.f32.mrf.mxu0  ;;  %8951 = vmatprep.subr.bf16.mxu0 %v13335_v57  ;;  %v13383_v57 = vld [vmem:[#allocation8 + $0xe1c] ss:$36 sps:$4 sm:$0xff]  }
 0x39a   :  { %v8714_v2 = vadd.f32 %v8713_v37, %v5325_v58  ;;  %v8754_v4 = vpop.f32.mrf.mxu1  ;;  %8993 = vmatpush2.bf16.msra.mxu1 %v13330_v16  ;;  %v13378_v16 = vld [vmem:[#allocation8 + $0x1298] ss:$36 sps:$4 sm:$0xff]   ;;  %v13392_v37 = vld [vmem:[#allocation8 + $0x120c] ss:$36 sps:$4 sm:$0xff]  }
 0x39b   :  { %v8715_v7 = vpop.f32.mrf.mxu0  ;;  %8994 = vmatprep.subr.bf16.mxu1 %v13338_v40  ;;  %v13386_v58 = vld [vmem:[#allocation8 + $0x1254] ss:$36 sps:$4 sm:$0xff]  }
 0x39c   :  { %v14419_v51 = vadd.f32 %v8754_v4, %v8714_v2  ;;  %8952 = vmatpush2.bf16.msra.mxu0 %v13333_v61  ;;  %v8716_v41 = vadd.f32 %v8715_v7, %v5329_v0  ;;  %v8756_v14 = vpop.f32.mrf.mxu1  ;;  %v13381_v40 = vld [vmem:[#allocation8 + $0xe18] ss:$36 sps:$4 sm:$0xff]   ;;  %v13384_v0 = vld [vmem:[#allocation8 + $0x1250] ss:$36 sps:$4 sm:$0xff]   ;;  %v13390_v4 = vld [vmem:[#allocation8 + $0x1208] ss:$36 sps:$4 sm:$0xff]  }
 0x39d   :  { %v8717_v8 = vpop.f32.mrf.mxu0  ;;  %8953 = vmatprep.subr.bf16.mxu0 %v13341_v1  ;;  %v13389_v61 = vld [vmem:[#allocation8 + $0xdd4] ss:$36 sps:$4 sm:$0xff]   ;;  %v13395_v2 = vld [vmem:[#allocation8 + $0xd8c] ss:$36 sps:$4 sm:$0xff]  }
 0x39e   :  { %v14421_v44 = vadd.f32 %v8756_v14, %v8716_v41  ;;  %v8758_v12 = vpop.f32.mrf.mxu1  ;;  %8995 = vmatpush2.bf16.msra.mxu1 %v13336_v5  ;;  %v13387_v1 = vld [vmem:[#allocation8 + $0xdd0] ss:$36 sps:$4 sm:$0xff]   ;;  %v13393_v7 = vld [vmem:[#allocation8 + $0xd88] ss:$36 sps:$4 sm:$0xff]   ;;  %v13407_v8 = vld [vmem:[#allocation8 + $0x117c] ss:$36 sps:$4 sm:$0xff]  }
 0x39f   :  { %v8718_v18 = vpop.f32.mrf.mxu0  ;;  %8996 = vmatprep.subr.bf16.mxu1 %v13344_v24  ;;  %v13398_v5 = vld [vmem:[#allocation8 + $0x68c] ss:$36 sps:$4 sm:$0xff]   ;;  %v13401_v24 = vld [vmem:[#allocation8 + $0x11c4] ss:$36 sps:$4 sm:$0xff]   ;;  %v13410_v12 = vld [vmem:[#allocation8 + $0x5fc] ss:$36 sps:$4 sm:$0xff]  }
 0x3a0   :  { %8954 = vmatpush2.bf16.msra.mxu0 %v13339_v10  ;;  %v8759_v22 = vpop.f32.mrf.mxu1  ;;  %v13396_v41 = vld [vmem:[#allocation8 + $0x688] ss:$36 sps:$4 sm:$0xff]   ;;  %v13399_v10 = vld [vmem:[#allocation8 + $0x11c0] ss:$36 sps:$4 sm:$0xff]   ;;  %v13413_v18 = vld [vmem:[#allocation8 + $0x1134] ss:$36 sps:$4 sm:$0xff]  }
 0x3a1   :  { %8955 = vmatprep.subr.bf16.mxu0 %v13347_v11  ;;  %v13404_v14 = vld [vmem:[#allocation8 + $0x644] ss:$36 sps:$4 sm:$0xff]   ;;  %v13416_v22 = vld [vmem:[#allocation8 + $0x5b4] ss:$36 sps:$4 sm:$0xff]  }
 0x3a2   :  { %8997 = vmatpush2.bf16.msra.mxu1 %v13342_v17  ;;  %v13402_v11 = vld [vmem:[#allocation8 + $0x640] ss:$36 sps:$4 sm:$0xff]   ;;  %v13405_v17 = vld [vmem:[#allocation8 + $0x1178] ss:$36 sps:$4 sm:$0xff]  }
 0x3a3   :  { %9048 = vmatprep.subr.bf16.mxu1 %v13350_v19  ;;  %v13408_v19 = vld [vmem:[#allocation8 + $0x5f8] ss:$36 sps:$4 sm:$0xff]  }
 0x3a4   :  { %8956 = vmatpush2.bf16.msra.mxu0 %v13345_v23  ;;  %v13411_v23 = vld [vmem:[#allocation8 + $0x1130] ss:$36 sps:$4 sm:$0xff]  }
 0x3a5   :  { %8999 = vmatmul.mubr.bf16.vlgmr.msra.gmra.mxu1 %v14392_v53  ;;  %9007 = vmatprep.subr.bf16.mxu0 %v13353_v28  ;;  %v13419_v28 = vld [vmem:[#allocation8 + $0x10ec] ss:$36 sps:$4 sm:$0xff]  }
 0x3a6   :  { %9049 = vmatpush1.bf16.msra.mxu1 %v13348_v29  ;;  %9080 = vmatprep.mubr.bf16.mxu1 %v14181_v60  ;;  %v13414_v29 = vld [vmem:[#allocation8 + $0x5b0] ss:$36 sps:$4 sm:$0xff]  }
 0x3a7   :  { %8958 = vmatmul.mubr.bf16.vlgmr.msra.gmra.mxu0 %v14368_v6  ;;  %9050 = vmatprep.subr.bf16.mxu1 %v13356_v30  ;;  %v13422_v30 = vld [vmem:[#allocation8 + $0x56c] ss:$36 sps:$4 sm:$0xff]  }
 0x3a8   :  { %9008 = vmatpush1.bf16.msra.mxu0 %v13351_v31  ;;  %9039 = vmatprep.mubr.bf16.mxu0 %v14398_v35  ;;  %v13417_v31 = vld [vmem:[#allocation8 + $0x10e8] ss:$36 sps:$4 sm:$0xff]  }
 0x3a9   :  { %9009 = vmatprep.subr.bf16.mxu0 %v13359_v49  ;;  %v13425_v49 = vld [vmem:[#allocation8 + $0x10a4] ss:$36 sps:$4 sm:$0xff]  }
 0x3aa   :  { %9051 = vmatpush1.bf16.msra.mxu1 %v13354_v52  ;;  %v13420_v52 = vld [vmem:[#allocation8 + $0x568] ss:$36 sps:$4 sm:$0xff]  }
 0x3ab   :  { %9052 = vmatprep.subr.bf16.mxu1 %v13362_v62  ;;  %v13428_v62 = vld [vmem:[#allocation8 + $0x524] ss:$36 sps:$4 sm:$0xff]  }
 0x3ac   :  { %9010 = vmatpush1.bf16.msra.mxu0 %v13357_v34  ;;  %v13423_v34 = vld [vmem:[#allocation8 + $0x10a0] ss:$36 sps:$4 sm:$0xff]  }
 0x3ad   :  { %9011 = vmatprep.subr.bf16.mxu0 %v13365_v36  ;;  %v13431_v36 = vld [vmem:[#allocation8 + $0x105c] ss:$36 sps:$4 sm:$0xff]  }
 0x3ae   :  { %9053 = vmatpush1.bf16.msra.mxu1 %v13360_v39  ;;  %v13426_v39 = vld [vmem:[#allocation8 + $0x520] ss:$36 sps:$4 sm:$0xff]  }
 0x3af   :  { %9054 = vmatprep.subr.bf16.mxu1 %v13368_v42  ;;  %v13434_v42 = vld [vmem:[#allocation8 + $0x4dc] ss:$36 sps:$4 sm:$0xff]  }
 0x3b0   :  { %9012 = vmatpush1.bf16.msra.mxu0 %v13363_v45  ;;  %v13429_v45 = vld [vmem:[#allocation8 + $0x1058] ss:$36 sps:$4 sm:$0xff]  }
 0x3b1   :  { %9013 = vmatprep.subr.bf16.mxu0 %v13371_v63 }
 0x3b2   :  { %9055 = vmatpush1.bf16.msra.mxu1 %v13366_v48  ;;  %v13437_v48 = vld [vmem:[#allocation8 + $0x1014] ss:$36 sps:$4 sm:$0xff]  }
 0x3b3   :  { %9056 = vmatprep.subr.bf16.mxu1 %v13374_v55 }
 0x3b4   :  { %9014 = vmatpush1.bf16.msra.mxu0 %v13369_v32  ;;  %v13432_v32 = vld [vmem:[#allocation8 + $0x4d8] ss:$36 sps:$4 sm:$0xff]  }
 0x3b5   :  { %9015 = vmatprep.subr.bf16.mxu0 %v13377_v50 }
 0x3b6   :  { %9057 = vmatpush1.bf16.msra.mxu1 %v13372_v20  ;;  %v13440_v20 = vld [vmem:[#allocation8 + $0x494] ss:$36 sps:$4 sm:$0xff]  }
 0x3b7   :  { %9058 = vmatprep.subr.bf16.mxu1 %v13380_v21 }
 0x3b8   :  { %9016 = vmatpush1.bf16.msra.mxu0 %v13375_v13  ;;  %v13435_v13 = vld [vmem:[#allocation8 + $0x1010] ss:$36 sps:$4 sm:$0xff]  }
 0x3b9   :  { %9017 = vmatprep.subr.bf16.mxu0 %v13383_v57 }
 0x3ba   :  { %9059 = vmatpush1.bf16.msra.mxu1 %v13378_v16  ;;  %v13443_v16 = vld [vmem:[#allocation8 + $0xfcc] ss:$36 sps:$4 sm:$0xff]  }
 0x3bb   :  { %9060 = vmatprep.subr.bf16.mxu1 %v13386_v58  ;;  %v13438_v58 = vld [vmem:[#allocation8 + $0x490] ss:$36 sps:$4 sm:$0xff]  }
 0x3bc   :  { %9018 = vmatpush1.bf16.msra.mxu0 %v13381_v40 }
 0x3bd   :  { %9019 = vmatprep.subr.bf16.mxu0 %v13389_v61  ;;  %v13446_v61 = vld [vmem:[#allocation8 + $0x8cc] ss:$36 sps:$4 sm:$0xff]  }
 0x3be   :  { %9061 = vmatpush1.bf16.msra.mxu1 %v13384_v0  ;;  %v13441_v0 = vld [vmem:[#allocation8 + $0xfc8] ss:$36 sps:$4 sm:$0xff]  }
 0x3bf   :  { %9062 = vmatprep.subr.bf16.mxu1 %v13392_v37  ;;  %v13444_v37 = vld [vmem:[#allocation8 + $0x8c8] ss:$36 sps:$4 sm:$0xff]  }
 0x3c0   :  { %9020 = vmatpush1.bf16.msra.mxu0 %v13387_v1  ;;  %v13452_v1 = vld [vmem:[#allocation8 + $0x884] ss:$36 sps:$4 sm:$0xff]  }
 0x3c1   :  { %9021 = vmatprep.subr.bf16.mxu0 %v13395_v2  ;;  %v13447_v2 = vld [vmem:[#allocation8 + $0x208] ss:$36 sps:$4 sm:$0xff]  }
 0x3c2   :  { %9063 = vmatpush1.bf16.msra.mxu1 %v13390_v4  ;;  %v13455_v4 = vld [vmem:[#allocation8 + $0x1c4] ss:$36 sps:$4 sm:$0xff]  }
 0x3c3   :  { %9130 = vmatprep.subr.bf16.mxu1 %v13398_v5 }
 0x3c4   :  { %9022 = vmatpush1.bf16.msra.mxu0 %v13393_v7  ;;  %v13450_v7 = vld [vmem:[#allocation8 + $0x880] ss:$36 sps:$4 sm:$0xff]  }
 0x3c5   :  { %9081 = vmatmul.mubr.bf16.vlgmr.msra.gmra.mxu1 %v14405_v47  ;;  %9023 = vmatprep.subr.bf16.mxu0 %v13401_v24 }
 0x3c6   :  { %9131 = vmatpush1.bf16.msra.mxu1 %v13396_v41  ;;  %9162 = vmatprep.mubr.bf16.mxu1 %v14348_v46  ;;  %v13458_v41 = vld [vmem:[#allocation8 + $0x83c] ss:$36 sps:$4 sm:$0xff]  }
 0x3c7   :  { %9132 = vmatprep.subr.bf16.mxu1 %v13404_v14 }
 0x3c8   :  { %9024 = vmatpush2.bf16.msra.mxu0 %v13399_v10  ;;  %v13453_v10 = vld [vmem:[#allocation8 + $0x1c0] ss:$36 sps:$4 sm:$0xff]  }
 0x3c9   :  { %9025 = vmatprep.subr.bf16.mxu0 %v13407_v8 }
 0x3ca   :  { %9133 = vmatpush1.bf16.msra.mxu1 %v13402_v11  ;;  %v13461_v11 = vld [vmem:[#allocation8 + $0x17c] ss:$36 sps:$4 sm:$0xff]  }
 0x3cb   :  { %9134 = vmatprep.subr.bf16.mxu1 %v13410_v12  ;;  %v13456_v12 = vld [vmem:[#allocation8 + $0x838] ss:$36 sps:$4 sm:$0xff]  }
 0x3cc   :  { %9026 = vmatpush2.bf16.msra.mxu0 %v13405_v17 }
 0x3cd   :  { %9027 = vmatprep.subr.bf16.mxu0 %v13413_v18  ;;  %v13464_v18 = vld [vmem:[#allocation8 + $0x7f4] ss:$36 sps:$4 sm:$0xff]  }
 0x3ce   :  { %9135 = vmatpush1.bf16.msra.mxu1 %v13408_v19  ;;  %v13459_v19 = vld [vmem:[#allocation8 + $0x178] ss:$36 sps:$4 sm:$0xff]  }
 0x3cf   :  { %9136 = vmatprep.subr.bf16.mxu1 %v13416_v22  ;;  %v13467_v22 = vld [vmem:[#allocation8 + $0x134] ss:$36 sps:$4 sm:$0xff]  }
 0x3d0   :  { %9028 = vmatpush2.bf16.msra.mxu0 %v13411_v23  ;;  %v13462_v23 = vld [vmem:[#allocation8 + $0x7f0] ss:$36 sps:$4 sm:$0xff]  }
 0x3d1   :  { %9029 = vmatprep.subr.bf16.mxu0 %v13419_v28  ;;  %v13470_v28 = vld [vmem:[#allocation8 + $0x7ac] ss:$36 sps:$4 sm:$0xff]  }
 0x3d2   :  { %9137 = vmatpush1.bf16.msra.mxu1 %v13414_v29  ;;  %v13465_v29 = vld [vmem:[#allocation8 + $0x130] ss:$36 sps:$4 sm:$0xff]  }
 0x3d3   :  { %9138 = vmatprep.subr.bf16.mxu1 %v13422_v30  ;;  %v13473_v30 = vld [vmem:[#allocation8 + $0xec] ss:$36 sps:$4 sm:$0xff]  }
 0x3d4   :  { %9030 = vmatpush2.bf16.msra.mxu0 %v13417_v31  ;;  %v13468_v31 = vld [vmem:[#allocation8 + $0x7a8] ss:$36 sps:$4 sm:$0xff]  }
 0x3d5   :  { %9031 = vmatprep.subr.bf16.mxu0 %v13425_v49  ;;  %v13476_v49 = vld [vmem:[#allocation8 + $0x764] ss:$36 sps:$4 sm:$0xff]  }
 0x3d6   :  { %9139 = vmatpush1.bf16.msra.mxu1 %v13420_v52  ;;  %v13471_v52 = vld [vmem:[#allocation8 + $0xe8] ss:$36 sps:$4 sm:$0xff]  }
 0x3d7   :  { %9140 = vmatprep.subr.bf16.mxu1 %v13428_v62  ;;  %v13479_v62 = vld [vmem:[#allocation8 + $0xa4] ss:$36 sps:$4 sm:$0xff]  }
 0x3d8   :  { %9032 = vmatpush2.bf16.msra.mxu0 %v13423_v34  ;;  %v13474_v34 = vld [vmem:[#allocation8 + $0x760] ss:$36 sps:$4 sm:$0xff]  }
 0x3d9   :  { %v8795_v63 = vpop.f32.mrf.mxu0  ;;  %9033 = vmatprep.subr.bf16.mxu0 %v13431_v36  ;;  %v13482_v36 = vld [vmem:[#allocation8 + $0x71c] ss:$36 sps:$4 sm:$0xff]  }
 0x3da   :  { %v8796_v55 = vadd.f32 %v8795_v63, %v14419_v51  ;;  %9141 = vmatpush1.bf16.msra.mxu1 %v13426_v39  ;;  %v13449_v51 = vld [vmem:[#allocation8 + $0x20c] ss:$36 sps:$4 sm:$0xff]   ;;  %v13477_v39 = vld [vmem:[#allocation8 + $0xa0] ss:$36 sps:$4 sm:$0xff]   ;;  %v13488_v63 = vld [vmem:[#allocation8 + $0x6d4] ss:$36 sps:$4 sm:$0xff]  }
 0x3db   :  { %v8797_v50 = vpop.f32.mrf.mxu0  ;;  %9142 = vmatprep.subr.bf16.mxu1 %v13434_v42  ;;  %v13485_v42 = vld [vmem:[#allocation8 + $0x5c] ss:$36 sps:$4 sm:$0xff]  }
 0x3dc   :  { %9034 = vmatpush2.bf16.msra.mxu0 %v13429_v45  ;;  %v8798_v21 = vadd.f32 %v8797_v50, %v14421_v44  ;;  %v13480_v45 = vld [vmem:[#allocation8 + $0x718] ss:$36 sps:$4 sm:$0xff]   ;;  %v13494_v50 = vld [vmem:[#allocation8 + $0xf8c] ss:$36 sps:$4 sm:$0xff]  }
 0x3dd   :  { %v8799_v57 = vpop.f32.mrf.mxu0  ;;  %9035 = vmatprep.subr.bf16.mxu0 %v13437_v48  ;;  %v13483_v48 = vld [vmem:[#allocation8 + $0x58] ss:$36 sps:$4 sm:$0xff]  }
 0x3de   :  { %9143 = vmatpush1.bf16.msra.mxu1 %v13432_v32  ;;  %v13486_v32 = vld [vmem:[#allocation8 + $0x6d0] ss:$36 sps:$4 sm:$0xff]   ;;  %v13500_v57 = vld [vmem:[#allocation8 + $0xf44] ss:$36 sps:$4 sm:$0xff]  }
 0x3df   :  { %v8800_v40 = vpop.f32.mrf.mxu0  ;;  %9144 = vmatprep.subr.bf16.mxu1 %v13440_v20  ;;  %v13489_v20 = vld [vmem:[#allocation8 + $0x10] ss:$36 sps:$4 sm:$0xff]  }
 0x3e0   :  { %9036 = vmatpush2.bf16.msra.mxu0 %v13435_v13  ;;  %v13492_v13 = vld [vmem:[#allocation8 + $0xf88] ss:$36 sps:$4 sm:$0xff]   ;;  %v13498_v40 = vld [vmem:[#allocation8 + $0xf40] ss:$36 sps:$4 sm:$0xff]  }
 0x3e1   :  { %9037 = vmatprep.subr.bf16.mxu0 %v13443_v16  ;;  %v13495_v16 = vld [vmem:[#allocation8 + $0x448] ss:$36 sps:$4 sm:$0xff]  }
 0x3e2   :  { %9145 = vmatpush1.bf16.msra.mxu1 %v13438_v58  ;;  %v13503_v58 = vld [vmem:[#allocation8 + $0x404] ss:$36 sps:$4 sm:$0xff]  }
 0x3e3   :  { %9146 = vmatprep.subr.bf16.mxu1 %v13446_v61  ;;  %v13506_v61 = vld [vmem:[#allocation8 + $0xefc] ss:$36 sps:$4 sm:$0xff]  }
 0x3e4   :  { %9038 = vmatpush2.bf16.msra.mxu0 %v13441_v0  ;;  %v13501_v0 = vld [vmem:[#allocation8 + $0x400] ss:$36 sps:$4 sm:$0xff]  }
 0x3e5   :  { %v8836_v44 = vpop.f32.mrf.mxu1  ;;  %9089 = vmatprep.subr.bf16.mxu0 %v13449_v51  ;;  %v13509_v51 = vld [vmem:[#allocation8 + $0x3bc] ss:$36 sps:$4 sm:$0xff]  }
 0x3e6   :  { %v14431_v5 = vadd.f32 %v8836_v44, %v8796_v55  ;;  %9147 = vmatpush2.bf16.msra.mxu1 %v13444_v37  ;;  %v13491_v55 = vld [vmem:[#allocation8 + $0x14] ss:$36 sps:$4 sm:$0xff]  }
 0x3e7   :  { %9040 = vmatmul.mubr.bf16.vlgmr.msra.gmra.mxu0 %v14400_v15  ;;  %v8838_v24 = vpop.f32.mrf.mxu1  ;;  %9148 = vmatprep.subr.bf16.mxu1 %v13452_v1  ;;  %v13504_v37 = vld [vmem:[#allocation8 + $0xef8] ss:$36 sps:$4 sm:$0xff]  }
 0x3e8   :  { %9090 = vmatpush1.bf16.msra.mxu0 %v13447_v2  ;;  %9121 = vmatprep.mubr.bf16.mxu0 %v14346_v43  ;;  %v14435_v14 = vadd.f32 %v8838_v24, %v8798_v21  ;;  %v13497_v21 = vld [vmem:[#allocation8 + $0x44c] ss:$36 sps:$4 sm:$0xff]   ;;  %v13512_v1 = vld [vmem:[#allocation8 + $0xeb4] ss:$36 sps:$4 sm:$0xff]  }
 0x3e9   :  { %v8840_v8 = vpop.f32.mrf.mxu1  ;;  %9091 = vmatprep.subr.bf16.mxu0 %v13455_v4  ;;  %v13507_v2 = vld [vmem:[#allocation8 + $0x3b8] ss:$36 sps:$4 sm:$0xff]   ;;  %v13510_v4 = vld [vmem:[#allocation8 + $0xeb0] ss:$36 sps:$4 sm:$0xff]  }
 0x3ea   :  { %9149 = vmatpush2.bf16.msra.mxu1 %v13450_v7  ;;  %v13515_v44 = vld [vmem:[#allocation8 + $0x374] ss:$36 sps:$4 sm:$0xff]   ;;  %v13518_v7 = vld [vmem:[#allocation8 + $0xe6c] ss:$36 sps:$4 sm:$0xff]   ;;  %v13524_v8 = vld [vmem:[#allocation8 + $0xe24] ss:$36 sps:$4 sm:$0xff]  }
 0x3eb   :  { %v8841_v17 = vpop.f32.mrf.mxu1  ;;  %9150 = vmatprep.subr.bf16.mxu1 %v13458_v41  ;;  %v13513_v24 = vld [vmem:[#allocation8 + $0x370] ss:$36 sps:$4 sm:$0xff]  }
 0x3ec   :  { %9092 = vmatpush1.bf16.msra.mxu0 %v13453_v10  ;;  %v13521_v41 = vld [vmem:[#allocation8 + $0x32c] ss:$36 sps:$4 sm:$0xff]   ;;  %v13522_v17 = vld [vmem:[#allocation8 + $0xe20] ss:$36 sps:$4 sm:$0xff]  }
 0x3ed   :  { %9093 = vmatprep.subr.bf16.mxu0 %v13461_v11  ;;  %v13516_v10 = vld [vmem:[#allocation8 + $0xe68] ss:$36 sps:$4 sm:$0xff]  }
 0x3ee   :  { %9151 = vmatpush2.bf16.msra.mxu1 %v13456_v12  ;;  %v13519_v11 = vld [vmem:[#allocation8 + $0x328] ss:$36 sps:$4 sm:$0xff]  }
 0x3ef   :  { %9152 = vmatprep.subr.bf16.mxu1 %v13464_v18  ;;  %v13527_v12 = vld [vmem:[#allocation8 + $0x2e4] ss:$36 sps:$4 sm:$0xff]   ;;  %v13530_v18 = vld [vmem:[#allocation8 + $0xddc] ss:$36 sps:$4 sm:$0xff]  }
 0x3f0   :  { %9094 = vmatpush1.bf16.msra.mxu0 %v13459_v19  ;;  %v13525_v19 = vld [vmem:[#allocation8 + $0x2e0] ss:$36 sps:$4 sm:$0xff]  }
 0x3f1   :  { %9095 = vmatprep.subr.bf16.mxu0 %v13467_v22  ;;  %v13533_v22 = vld [vmem:[#allocation8 + $0x29c] ss:$36 sps:$4 sm:$0xff]  }
 0x3f2   :  { %9153 = vmatpush2.bf16.msra.mxu1 %v13462_v23  ;;  %v13528_v23 = vld [vmem:[#allocation8 + $0xdd8] ss:$36 sps:$4 sm:$0xff]  }
 0x3f3   :  { %9154 = vmatprep.subr.bf16.mxu1 %v13470_v28  ;;  %v13536_v28 = vld [vmem:[#allocation8 + $0xd94] ss:$36 sps:$4 sm:$0xff]  }
 0x3f4   :  { %9096 = vmatpush1.bf16.msra.mxu0 %v13465_v29  ;;  %v13531_v29 = vld [vmem:[#allocation8 + $0x298] ss:$36 sps:$4 sm:$0xff]  }
 0x3f5   :  { %9097 = vmatprep.subr.bf16.mxu0 %v13473_v30  ;;  %v13539_v30 = vld [vmem:[#allocation8 + $0x254] ss:$36 sps:$4 sm:$0xff]  }
 0x3f6   :  { %9155 = vmatpush2.bf16.msra.mxu1 %v13468_v31  ;;  %v13534_v31 = vld [vmem:[#allocation8 + $0xd90] ss:$36 sps:$4 sm:$0xff]  }
 0x3f7   :  { %9156 = vmatprep.subr.bf16.mxu1 %v13476_v49  ;;  %v13542_v49 = vld [vmem:[#allocation8 + $0x11cc] ss:$36 sps:$4 sm:$0xff]  }
 0x3f8   :  { %9098 = vmatpush1.bf16.msra.mxu0 %v13471_v52  ;;  %v13537_v52 = vld [vmem:[#allocation8 + $0x250] ss:$36 sps:$4 sm:$0xff]  }
 0x3f9   :  { %9099 = vmatprep.subr.bf16.mxu0 %v13479_v62  ;;  %v13545_v62 = vld [vmem:[#allocation8 + $0xb0c] ss:$36 sps:$4 sm:$0xff]  }
 0x3fa   :  { %9157 = vmatpush2.bf16.msra.mxu1 %v13474_v34  ;;  %v13540_v34 = vld [vmem:[#allocation8 + $0x11c8] ss:$36 sps:$4 sm:$0xff]  }
 0x3fb   :  { %9158 = vmatprep.subr.bf16.mxu1 %v13482_v36  ;;  %v13548_v36 = vld [vmem:[#allocation8 + $0x1184] ss:$36 sps:$4 sm:$0xff]  }
 0x3fc   :  { %9100 = vmatpush1.bf16.msra.mxu0 %v13477_v39  ;;  %v13543_v39 = vld [vmem:[#allocation8 + $0xb08] ss:$36 sps:$4 sm:$0xff]  }
 0x3fd   :  { %9101 = vmatprep.subr.bf16.mxu0 %v13485_v42 }
 0x3fe   :  { %9159 = vmatpush2.bf16.msra.mxu1 %v13480_v45  ;;  %v13551_v45 = vld [vmem:[#allocation8 + $0xac4] ss:$36 sps:$4 sm:$0xff]  }
 0x3ff   :  { %9160 = vmatprep.subr.bf16.mxu1 %v13488_v63  ;;  %v13546_v63 = vld [vmem:[#allocation8 + $0x1180] ss:$36 sps:$4 sm:$0xff]  }
 0x400   :  { %9102 = vmatpush1.bf16.msra.mxu0 %v13483_v48 }
 0x401   :  { %9103 = vmatprep.subr.bf16.mxu0 %v13491_v55 }
 0x402   :  { %9161 = vmatpush2.bf16.msra.mxu1 %v13486_v32  ;;  %v13554_v32 = vld [vmem:[#allocation8 + $0x113c] ss:$36 sps:$4 sm:$0xff]  }
 0x403   :  { %9212 = vmatprep.subr.bf16.mxu1 %v13494_v50 }
 0x404   :  { %9104 = vmatpush1.bf16.msra.mxu0 %v13489_v20  ;;  %v13549_v20 = vld [vmem:[#allocation8 + $0xac0] ss:$36 sps:$4 sm:$0xff]  }
 0x405   :  { %9163 = vmatmul.mubr.bf16.vlgmr.msra.gmra.mxu1 %v14368_v6  ;;  %9105 = vmatprep.subr.bf16.mxu0 %v13497_v21 }
 0x406   :  { %9213 = vmatpush1.bf16.msra.mxu1 %v13492_v13  ;;  %9244 = vmatprep.mubr.bf16.mxu1 %v14398_v35 }
 0x407   :  { %9214 = vmatprep.subr.bf16.mxu1 %v13500_v57  ;;  %v13557_v57 = vld [vmem:[#allocation8 + $0xa7c] ss:$36 sps:$4 sm:$0xff]  }
 0x408   :  { %9106 = vmatpush2.bf16.msra.mxu0 %v13495_v16 }
 0x409   :  { %9107 = vmatprep.subr.bf16.mxu0 %v13503_v58  ;;  %v13552_v58 = vld [vmem:[#allocation8 + $0x1138] ss:$36 sps:$4 sm:$0xff]  }
 0x40a   :  { %9215 = vmatpush1.bf16.msra.mxu1 %v13498_v40 }
 0x40b   :  { %9216 = vmatprep.subr.bf16.mxu1 %v13506_v61 }
 0x40c   :  { %9108 = vmatpush2.bf16.msra.mxu0 %v13501_v0  ;;  %v13560_v0 = vld [vmem:[#allocation8 + $0x10f4] ss:$36 sps:$4 sm:$0xff]  }
 0x40d   :  { %9109 = vmatprep.subr.bf16.mxu0 %v13509_v51 }
 0x40e   :  { %9217 = vmatpush1.bf16.msra.mxu1 %v13504_v37  ;;  %v13563_v37 = vld [vmem:[#allocation8 + $0xa34] ss:$36 sps:$4 sm:$0xff]  }
 0x40f   :  { %9218 = vmatprep.subr.bf16.mxu1 %v13512_v1  ;;  %v13558_v1 = vld [vmem:[#allocation8 + $0x10f0] ss:$36 sps:$4 sm:$0xff]  }
 0x410   :  { %9110 = vmatpush2.bf16.msra.mxu0 %v13507_v2  ;;  %v13566_v2 = vld [vmem:[#allocation8 + $0x10ac] ss:$36 sps:$4 sm:$0xff]  }
 0x411   :  { %9111 = vmatprep.subr.bf16.mxu0 %v13515_v44  ;;  %v13561_v44 = vld [vmem:[#allocation8 + $0xa30] ss:$36 sps:$4 sm:$0xff]  }
 0x412   :  { %9219 = vmatpush1.bf16.msra.mxu1 %v13510_v4  ;;  %v13564_v4 = vld [vmem:[#allocation8 + $0x10a8] ss:$36 sps:$4 sm:$0xff]  }
 0x413   :  { %9220 = vmatprep.subr.bf16.mxu1 %v13518_v7  ;;  %v13572_v7 = vld [vmem:[#allocation8 + $0x1064] ss:$36 sps:$4 sm:$0xff]  }
 0x414   :  { %9112 = vmatpush2.bf16.msra.mxu0 %v13513_v24  ;;  %v13567_v24 = vld [vmem:[#allocation8 + $0x9e8] ss:$36 sps:$4 sm:$0xff]  }
 0x415   :  { %9113 = vmatprep.subr.bf16.mxu0 %v13521_v41  ;;  %v13575_v41 = vld [vmem:[#allocation8 + $0x9a4] ss:$36 sps:$4 sm:$0xff]  }
 0x416   :  { %9221 = vmatpush1.bf16.msra.mxu1 %v13516_v10  ;;  %v13570_v10 = vld [vmem:[#allocation8 + $0x1060] ss:$36 sps:$4 sm:$0xff]  }
 0x417   :  { %9222 = vmatprep.subr.bf16.mxu1 %v13524_v8  ;;  %v13578_v8 = vld [vmem:[#allocation8 + $0x101c] ss:$36 sps:$4 sm:$0xff]  }
 0x418   :  { %9114 = vmatpush2.bf16.msra.mxu0 %v13519_v11  ;;  %v13573_v11 = vld [vmem:[#allocation8 + $0x9a0] ss:$36 sps:$4 sm:$0xff]  }
 0x419   :  { %9115 = vmatprep.subr.bf16.mxu0 %v13527_v12  ;;  %v13581_v12 = vld [vmem:[#allocation8 + $0x95c] ss:$36 sps:$4 sm:$0xff]  }
 0x41a   :  { %9223 = vmatpush1.bf16.msra.mxu1 %v13522_v17  ;;  %v13576_v17 = vld [vmem:[#allocation8 + $0x1018] ss:$36 sps:$4 sm:$0xff]  }
 0x41b   :  { %9224 = vmatprep.subr.bf16.mxu1 %v13530_v18  ;;  %v13584_v18 = vld [vmem:[#allocation8 + $0xfd4] ss:$36 sps:$4 sm:$0xff]  }
 0x41c   :  { %9116 = vmatpush2.bf16.msra.mxu0 %v13525_v19  ;;  %v13579_v19 = vld [vmem:[#allocation8 + $0x958] ss:$36 sps:$4 sm:$0xff]  }
 0x41d   :  { %9117 = vmatprep.subr.bf16.mxu0 %v13533_v22  ;;  %v13587_v22 = vld [vmem:[#allocation8 + $0x914] ss:$36 sps:$4 sm:$0xff]  }
 0x41e   :  { %9225 = vmatpush1.bf16.msra.mxu1 %v13528_v23  ;;  %v13582_v23 = vld [vmem:[#allocation8 + $0xfd0] ss:$36 sps:$4 sm:$0xff]  }
 0x41f   :  { %9226 = vmatprep.subr.bf16.mxu1 %v13536_v28  ;;  %v13590_v28 = vld [vmem:[#allocation8 + $0x214] ss:$36 sps:$4 sm:$0xff]  }
 0x420   :  { %9118 = vmatpush2.bf16.msra.mxu0 %v13531_v29  ;;  %v13585_v29 = vld [vmem:[#allocation8 + $0x910] ss:$36 sps:$4 sm:$0xff]  }
 0x421   :  { %9119 = vmatprep.subr.bf16.mxu0 %v13539_v30  ;;  %v13593_v30 = vld [vmem:[#allocation8 + $0xd4c] ss:$36 sps:$4 sm:$0xff]  }
 0x422   :  { %9227 = vmatpush1.bf16.msra.mxu1 %v13534_v31  ;;  %v13588_v31 = vld [vmem:[#allocation8 + $0x210] ss:$36 sps:$4 sm:$0xff]  }
 0x423   :  { %9228 = vmatprep.subr.bf16.mxu1 %v13542_v49  ;;  %v13596_v49 = vld [vmem:[#allocation8 + $0x1cc] ss:$36 sps:$4 sm:$0xff]  }
 0x424   :  { %9120 = vmatpush2.bf16.msra.mxu0 %v13537_v52  ;;  %v13591_v52 = vld [vmem:[#allocation8 + $0xd48] ss:$36 sps:$4 sm:$0xff]  }
 0x425   :  { %v14439_v42 = vpop.f32.mrf.mxu1  ;;  %9171 = vmatprep.subr.bf16.mxu0 %v13545_v62  ;;  %v13599_v62 = vld [vmem:[#allocation8 + $0xd04] ss:$36 sps:$4 sm:$0xff]  }
 0x426   :  { %9229 = vmatpush2.bf16.msra.mxu1 %v13540_v34  ;;  %v13594_v34 = vld [vmem:[#allocation8 + $0x1c8] ss:$36 sps:$4 sm:$0xff]  }
 0x427   :  { %9122 = vmatmul.mubr.bf16.vlgmr.msra.gmra.mxu0 %v14366_v9  ;;  %v8877_v48 = vpop.f32.mrf.mxu0  ;;  %v14442_v55 = vpop.f32.mrf.mxu1  ;;  %9230 = vmatprep.subr.bf16.mxu1 %v13548_v36  ;;  %v13602_v36 = vld [vmem:[#allocation8 + $0x184] ss:$36 sps:$4 sm:$0xff]  }
 0x428   :  { %v14445_v50 = vadd.f32 %v8877_v48, %v14431_v5  ;;  %9172 = vmatpush1.bf16.msra.mxu0 %v13543_v39  ;;  %9203 = vmatprep.mubr.bf16.mxu0 %v14370_v27  ;;  %v13555_v5 = vld [vmem:[#allocation8 + $0xa78] ss:$36 sps:$4 sm:$0xff]   ;;  %v13597_v39 = vld [vmem:[#allocation8 + $0xd00] ss:$36 sps:$4 sm:$0xff]  }
 0x429   :  { %v8879_v21 = vpop.f32.mrf.mxu0  ;;  %v8922_v13 = vpop.f32.mrf.mxu1  ;;  %9173 = vmatprep.subr.bf16.mxu0 %v13551_v45  ;;  %v13605_v45 = vld [vmem:[#allocation8 + $0xcbc] ss:$36 sps:$4 sm:$0xff]  }
 0x42a   :  { %v14449_v16 = vadd.f32 %v8879_v21, %v14435_v14  ;;  %9231 = vmatpush2.bf16.msra.mxu1 %v13546_v63  ;;  %v13569_v14 = vld [vmem:[#allocation8 + $0x9ec] ss:$36 sps:$4 sm:$0xff]   ;;  %v13600_v63 = vld [vmem:[#allocation8 + $0x180] ss:$36 sps:$4 sm:$0xff]   ;;  %v13606_v21 = vld [vmem:[#allocation8 + $0x138] ss:$36 sps:$4 sm:$0xff]  }
 0x42b   :  { %v8881_v40 = vpop.f32.mrf.mxu0  ;;  %v8923_v61 = vpop.f32.mrf.mxu1  ;;  %9232 = vmatprep.subr.bf16.mxu1 %v13554_v32  ;;  %v13608_v48 = vld [vmem:[#allocation8 + $0x13c] ss:$36 sps:$4 sm:$0xff]   ;;  %v13614_v13 = vld [vmem:[#allocation8 + $0xf4] ss:$36 sps:$4 sm:$0xff]  }
 0x42c   :  { %9174 = vmatpush1.bf16.msra.mxu0 %v13549_v20  ;;  %v13603_v32 = vld [vmem:[#allocation8 + $0xcb8] ss:$36 sps:$4 sm:$0xff]   ;;  %v13612_v40 = vld [vmem:[#allocation8 + $0xf0] ss:$36 sps:$4 sm:$0xff]  }
 0x42d   :  { %v8882_v51 = vpop.f32.mrf.mxu0  ;;  %9175 = vmatprep.subr.bf16.mxu0 %v13557_v57  ;;  %v13611_v20 = vld [vmem:[#allocation8 + $0xc74] ss:$36 sps:$4 sm:$0xff]   ;;  %v13620_v61 = vld [vmem:[#allocation8 + $0xac] ss:$36 sps:$4 sm:$0xff]  }
 0x42e   :  { %9233 = vmatpush2.bf16.msra.mxu1 %v13552_v58  ;;  %v13609_v57 = vld [vmem:[#allocation8 + $0xc70] ss:$36 sps:$4 sm:$0xff]   ;;  %v13618_v51 = vld [vmem:[#allocation8 + $0xa8] ss:$36 sps:$4 sm:$0xff]  }
 0x42f   :  { %9234 = vmatprep.subr.bf16.mxu1 %v13560_v0  ;;  %v13617_v58 = vld [vmem:[#allocation8 + $0xc2c] ss:$36 sps:$4 sm:$0xff]  }
 0x430   :  { %9176 = vmatpush1.bf16.msra.mxu0 %v13555_v5  ;;  %v13615_v0 = vld [vmem:[#allocation8 + $0xc28] ss:$36 sps:$4 sm:$0xff]  }
 0x431   :  { %9177 = vmatprep.subr.bf16.mxu0 %v13563_v37  ;;  %v13623_v5 = vld [vmem:[#allocation8 + $0xbe4] ss:$36 sps:$4 sm:$0xff]  }
 0x432   :  { %9235 = vmatpush2.bf16.msra.mxu1 %v13558_v1  ;;  %v13626_v37 = vld [vmem:[#allocation8 + $0x64] ss:$36 sps:$4 sm:$0xff]  }
 0x433   :  { %9236 = vmatprep.subr.bf16.mxu1 %v13566_v2  ;;  %v13621_v1 = vld [vmem:[#allocation8 + $0xbe0] ss:$36 sps:$4 sm:$0xff]  }
 0x434   :  { %9178 = vmatpush1.bf16.msra.mxu0 %v13561_v44  ;;  %v13629_v2 = vld [vmem:[#allocation8 + $0xb9c] ss:$36 sps:$4 sm:$0xff]  }
 0x435   :  { %9179 = vmatprep.subr.bf16.mxu0 %v13569_v14  ;;  %v13624_v44 = vld [vmem:[#allocation8 + $0x60] ss:$36 sps:$4 sm:$0xff]  }
 0x436   :  { %9237 = vmatpush2.bf16.msra.mxu1 %v13564_v4  ;;  %v13632_v14 = vld [vmem:[#allocation8 + $0x1c] ss:$36 sps:$4 sm:$0xff]  }
 0x437   :  { %9238 = vmatprep.subr.bf16.mxu1 %v13572_v7  ;;  %v13627_v4 = vld [vmem:[#allocation8 + $0xb98] ss:$36 sps:$4 sm:$0xff]  }
 0x438   :  { %9180 = vmatpush1.bf16.msra.mxu0 %v13567_v24  ;;  %v13635_v7 = vld [vmem:[#allocation8 + $0xb54] ss:$36 sps:$4 sm:$0xff]  }
 0x439   :  { %9181 = vmatprep.subr.bf16.mxu0 %v13575_v41  ;;  %v13630_v24 = vld [vmem:[#allocation8 + $0x18] ss:$36 sps:$4 sm:$0xff]  }
 0x43a   :  { %9239 = vmatpush2.bf16.msra.mxu1 %v13570_v10  ;;  %v13638_v41 = vld [vmem:[#allocation8 + $0x454] ss:$36 sps:$4 sm:$0xff]  }
 0x43b   :  { %9240 = vmatprep.subr.bf16.mxu1 %v13578_v8  ;;  %v13633_v10 = vld [vmem:[#allocation8 + $0xb50] ss:$36 sps:$4 sm:$0xff]  }
 0x43c   :  { %9182 = vmatpush1.bf16.msra.mxu0 %v13573_v11  ;;  %v13641_v8 = vld [vmem:[#allocation8 + $0x140c] ss:$36 sps:$4 sm:$0xff]   ;;  %v5333_v11 = vrot.slane %v14411_v56, %v785_v38 }
 0x43d   :  { %9183 = vmatprep.subr.bf16.mxu0 %v13581_v12  ;;  %v13636_v12 = vld [vmem:[#allocation8 + $0x450] ss:$36 sps:$4 sm:$0xff]  }
 0x43e   :  { %9241 = vmatpush2.bf16.msra.mxu1 %v13576_v17  ;;  %v13644_v17 = vld [vmem:[#allocation8 + $0x40c] ss:$36 sps:$4 sm:$0xff]  }
 0x43f   :  { %9242 = vmatprep.subr.bf16.mxu1 %v13584_v18  ;;  %v5337_v18 = vrot.slane %v14411_v56, %v789_v3  ;;  %v13645_v3 = vld [vmem:[#allocation8 + $0x13c0] ss:$36 sps:$4 sm:$0xff]  }
 0x440   :  { %9184 = vmatpush1.bf16.msra.mxu0 %v13579_v19  ;;  %v13639_v19 = vld [vmem:[#allocation8 + $0x1408] ss:$36 sps:$4 sm:$0xff]  }
 0x441   :  { %9185 = vmatprep.subr.bf16.mxu0 %v13587_v22 }
 0x442   :  { %9243 = vmatpush2.bf16.msra.mxu1 %v13582_v23  ;;  %v13647_v23 = vld [vmem:[#allocation8 + $0x13c4] ss:$36 sps:$4 sm:$0xff]  }
 0x443   :  { %9294 = vmatprep.subr.bf16.mxu1 %v13590_v28  ;;  %v8919_v28 = vadd.f32 %v14439_v42, %v5333_v11  ;;  %v13689_v11 = vld [vmem:[#allocation8 + $0x694] ss:$36 sps:$4 sm:$0xff]  }
 0x444   :  { %9186 = vmatpush1.bf16.msra.mxu0 %v13585_v29  ;;  %v13642_v29 = vld [vmem:[#allocation8 + $0x408] ss:$36 sps:$4 sm:$0xff]  }
 0x445   :  { %9245 = vmatmul.mubr.bf16.vlgmr.msra.gmra.mxu1 %v14400_v15  ;;  %9187 = vmatprep.subr.bf16.mxu0 %v13593_v30 }
 0x446   :  { %9295 = vmatpush1.bf16.msra.mxu1 %v13588_v31  ;;  %9326 = vmatprep.mubr.bf16.mxu1 %v14346_v43  ;;  %v13650_v31 = vld [vmem:[#allocation8 + $0x3c4] ss:$36 sps:$4 sm:$0xff]  }
 0x447   :  { %9296 = vmatprep.subr.bf16.mxu1 %v13596_v49  ;;  %v8921_v49 = vadd.f32 %v14442_v55, %v5337_v18  ;;  %v13651_v55 = vld [vmem:[#allocation8 + $0x1378] ss:$36 sps:$4 sm:$0xff]   ;;  %v13687_v18 = vld [vmem:[#allocation8 + $0x690] ss:$36 sps:$4 sm:$0xff]  }
 0x448   :  { %9188 = vmatpush2.bf16.msra.mxu0 %v13591_v52 }
 0x449   :  { %9189 = vmatprep.subr.bf16.mxu0 %v13599_v62 }
 0x44a   :  { %9297 = vmatpush1.bf16.msra.mxu1 %v13594_v34  ;;  %v13653_v34 = vld [vmem:[#allocation8 + $0x137c] ss:$36 sps:$4 sm:$0xff]  }
 0x44b   :  { %9298 = vmatprep.subr.bf16.mxu1 %v13602_v36  ;;  %v13648_v36 = vld [vmem:[#allocation8 + $0x3c0] ss:$36 sps:$4 sm:$0xff]  }
 0x44c   :  { %9190 = vmatpush2.bf16.msra.mxu0 %v13597_v39 }
 0x44d   :  { %9191 = vmatprep.subr.bf16.mxu0 %v13605_v45 }
 0x44e   :  { %9299 = vmatpush1.bf16.msra.mxu1 %v13600_v63 }
 0x44f   :  { %9300 = vmatprep.subr.bf16.mxu1 %v13608_v48  ;;  %v13656_v48 = vld [vmem:[#allocation8 + $0x37c] ss:$36 sps:$4 sm:$0xff]  }
 0x450   :  { %9192 = vmatpush2.bf16.msra.mxu0 %v13603_v32 }
 0x451   :  { %9193 = vmatprep.subr.bf16.mxu0 %v13611_v20 }
 0x452   :  { %9301 = vmatpush1.bf16.msra.mxu1 %v13606_v21  ;;  %v13659_v21 = vld [vmem:[#allocation8 + $0x1334] ss:$36 sps:$4 sm:$0xff]  }
 0x453   :  { %9302 = vmatprep.subr.bf16.mxu1 %v13614_v13  ;;  %v13654_v13 = vld [vmem:[#allocation8 + $0x378] ss:$36 sps:$4 sm:$0xff]  }
 0x454   :  { %9194 = vmatpush2.bf16.msra.mxu0 %v13609_v57  ;;  %v13662_v57 = vld [vmem:[#allocation8 + $0x334] ss:$36 sps:$4 sm:$0xff]  }
 0x455   :  { %9195 = vmatprep.subr.bf16.mxu0 %v13617_v58  ;;  %v13657_v58 = vld [vmem:[#allocation8 + $0x1330] ss:$36 sps:$4 sm:$0xff]  }
 0x456   :  { %9303 = vmatpush1.bf16.msra.mxu1 %v13612_v40  ;;  %v13665_v40 = vld [vmem:[#allocation8 + $0x12ec] ss:$36 sps:$4 sm:$0xff]  }
 0x457   :  { %9304 = vmatprep.subr.bf16.mxu1 %v13620_v61  ;;  %v13660_v61 = vld [vmem:[#allocation8 + $0x330] ss:$36 sps:$4 sm:$0xff]  }
 0x458   :  { %9196 = vmatpush2.bf16.msra.mxu0 %v13615_v0  ;;  %v13668_v0 = vld [vmem:[#allocation8 + $0x2ec] ss:$36 sps:$4 sm:$0xff]  }
 0x459   :  { %9197 = vmatprep.subr.bf16.mxu0 %v13623_v5  ;;  %v13663_v5 = vld [vmem:[#allocation8 + $0x12e8] ss:$36 sps:$4 sm:$0xff]  }
 0x45a   :  { %9305 = vmatpush1.bf16.msra.mxu1 %v13618_v51  ;;  %v13671_v51 = vld [vmem:[#allocation8 + $0x12a4] ss:$36 sps:$4 sm:$0xff]  }
 0x45b   :  { %9306 = vmatprep.subr.bf16.mxu1 %v13626_v37  ;;  %v13666_v37 = vld [vmem:[#allocation8 + $0x2e8] ss:$36 sps:$4 sm:$0xff]  }
 0x45c   :  { %9198 = vmatpush2.bf16.msra.mxu0 %v13621_v1  ;;  %v13674_v1 = vld [vmem:[#allocation8 + $0x2a4] ss:$36 sps:$4 sm:$0xff]  }
 0x45d   :  { %9199 = vmatprep.subr.bf16.mxu0 %v13629_v2  ;;  %v13669_v2 = vld [vmem:[#allocation8 + $0x12a0] ss:$36 sps:$4 sm:$0xff]  }
 0x45e   :  { %9307 = vmatpush1.bf16.msra.mxu1 %v13624_v44  ;;  %v13677_v44 = vld [vmem:[#allocation8 + $0x125c] ss:$36 sps:$4 sm:$0xff]  }
 0x45f   :  { %9308 = vmatprep.subr.bf16.mxu1 %v13632_v14  ;;  %v13672_v14 = vld [vmem:[#allocation8 + $0x2a0] ss:$36 sps:$4 sm:$0xff]  }
 0x460   :  { %9200 = vmatpush2.bf16.msra.mxu0 %v13627_v4  ;;  %v13680_v4 = vld [vmem:[#allocation8 + $0x25c] ss:$36 sps:$4 sm:$0xff]  }
 0x461   :  { %9201 = vmatprep.subr.bf16.mxu0 %v13635_v7  ;;  %v13675_v7 = vld [vmem:[#allocation8 + $0x1258] ss:$36 sps:$4 sm:$0xff]  }
 0x462   :  { %9309 = vmatpush1.bf16.msra.mxu1 %v13630_v24  ;;  %v13683_v24 = vld [vmem:[#allocation8 + $0x1214] ss:$36 sps:$4 sm:$0xff]  }
 0x463   :  { %9310 = vmatprep.subr.bf16.mxu1 %v13638_v41  ;;  %v13678_v41 = vld [vmem:[#allocation8 + $0x258] ss:$36 sps:$4 sm:$0xff]  }
 0x464   :  { %9202 = vmatpush2.bf16.msra.mxu0 %v13633_v10  ;;  %v13686_v10 = vld [vmem:[#allocation8 + $0xb14] ss:$36 sps:$4 sm:$0xff]  }
 0x465   :  { %v9000_v22 = vpop.f32.mrf.mxu1  ;;  %9253 = vmatprep.subr.bf16.mxu0 %v13641_v8  ;;  %v13681_v8 = vld [vmem:[#allocation8 + $0x1210] ss:$36 sps:$4 sm:$0xff]  }
 0x466   :  { %9311 = vmatpush2.bf16.msra.mxu1 %v13636_v12  ;;  %v13684_v12 = vld [vmem:[#allocation8 + $0xb10] ss:$36 sps:$4 sm:$0xff]  }
 0x467   :  { %v8959_v30 = vpop.f32.mrf.mxu0  ;;  %9204 = vmatmul.mubr.bf16.vlgmr.msra.gmra.mxu0 %v14392_v53  ;;  %v9002_v38 = vpop.f32.mrf.mxu1  ;;  %9312 = vmatprep.subr.bf16.mxu1 %v13644_v17  ;;  %v13692_v17 = vld [vmem:[#allocation8 + $0xacc] ss:$36 sps:$4 sm:$0xff]  }
 0x468   :  { %v8960_v52 = vadd.f32 %v8959_v30, %v8919_v28  ;;  %9254 = vmatpush1.bf16.msra.mxu0 %v13639_v19  ;;  %9285 = vmatprep.mubr.bf16.mxu0 %v14181_v60  ;;  %v13693_v30 = vld [vmem:[#allocation8 + $0x648] ss:$36 sps:$4 sm:$0xff]  }
 0x469   :  { %v8961_v56 = vpop.f32.mrf.mxu0  ;;  %v9004_v62 = vpop.f32.mrf.mxu1  ;;  %9255 = vmatprep.subr.bf16.mxu0 %v13647_v23  ;;  %v13690_v23 = vld [vmem:[#allocation8 + $0xac8] ss:$36 sps:$4 sm:$0xff]  }
 0x46a   :  { %v8962_v42 = vadd.f32 %v8961_v56, %v8921_v49  ;;  %9313 = vmatpush2.bf16.msra.mxu1 %v13642_v29  ;;  %v14463_v39 = vadd.f32 %v9000_v22, %v8960_v52  ;;  %v13695_v22 = vld [vmem:[#allocation8 + $0x64c] ss:$36 sps:$4 sm:$0xff]   ;;  %v13698_v29 = vld [vmem:[#allocation8 + $0xa84] ss:$36 sps:$4 sm:$0xff]   ;;  %v13707_v62 = vld [vmem:[#allocation8 + $0x5bc] ss:$36 sps:$4 sm:$0xff]  }
 0x46b   :  { %v8963_v45 = vpop.f32.mrf.mxu0  ;;  %v9005_v63 = vpop.f32.mrf.mxu1  ;;  %9314 = vmatprep.subr.bf16.mxu1 %v13650_v31  ;;  %v13701_v31 = vld [vmem:[#allocation8 + $0x604] ss:$36 sps:$4 sm:$0xff]  }
 0x46c   :  { %9256 = vmatpush1.bf16.msra.mxu0 %v13645_v3  ;;  %v14465_v32 = vadd.f32 %v9002_v38, %v8962_v42  ;;  %v13696_v49 = vld [vmem:[#allocation8 + $0xa80] ss:$36 sps:$4 sm:$0xff]   ;;  %v13710_v42 = vld [vmem:[#allocation8 + $0x9f4] ss:$36 sps:$4 sm:$0xff]  }
 0x46d   :  { %v8964_v20 = vpop.f32.mrf.mxu0  ;;  %9257 = vmatprep.subr.bf16.mxu0 %v13653_v34  ;;  %v13704_v3 = vld [vmem:[#allocation8 + $0xa3c] ss:$36 sps:$4 sm:$0xff]   ;;  %v13713_v45 = vld [vmem:[#allocation8 + $0x574] ss:$36 sps:$4 sm:$0xff]  }
 0x46e   :  { %9315 = vmatpush2.bf16.msra.mxu1 %v13648_v36  ;;  %v13699_v56 = vld [vmem:[#allocation8 + $0x600] ss:$36 sps:$4 sm:$0xff]   ;;  %v13702_v34 = vld [vmem:[#allocation8 + $0xa38] ss:$36 sps:$4 sm:$0xff]   ;;  %v13708_v63 = vld [vmem:[#allocation8 + $0x9f0] ss:$36 sps:$4 sm:$0xff]  }
 0x46f   :  { %9316 = vmatprep.subr.bf16.mxu1 %v13656_v48  ;;  %v13705_v36 = vld [vmem:[#allocation8 + $0x5b8] ss:$36 sps:$4 sm:$0xff]   ;;  %v13716_v48 = vld [vmem:[#allocation8 + $0x9ac] ss:$36 sps:$4 sm:$0xff]  }
 0x470   :  { %9258 = vmatpush1.bf16.msra.mxu0 %v13651_v55  ;;  %v13711_v55 = vld [vmem:[#allocation8 + $0x570] ss:$36 sps:$4 sm:$0xff]  }
 0x471   :  { %9259 = vmatprep.subr.bf16.mxu0 %v13659_v21  ;;  %v13719_v20 = vld [vmem:[#allocation8 + $0x52c] ss:$36 sps:$4 sm:$0xff]  }
 0x472   :  { %9317 = vmatpush2.bf16.msra.mxu1 %v13654_v13  ;;  %v13714_v21 = vld [vmem:[#allocation8 + $0x9a8] ss:$36 sps:$4 sm:$0xff]  }
 0x473   :  { %9318 = vmatprep.subr.bf16.mxu1 %v13662_v57  ;;  %v13722_v13 = vld [vmem:[#allocation8 + $0x964] ss:$36 sps:$4 sm:$0xff]  }
 0x474   :  { %9260 = vmatpush1.bf16.msra.mxu0 %v13657_v58  ;;  %v13717_v57 = vld [vmem:[#allocation8 + $0x528] ss:$36 sps:$4 sm:$0xff]  }
 0x475   :  { %9261 = vmatprep.subr.bf16.mxu0 %v13665_v40  ;;  %v13725_v58 = vld [vmem:[#allocation8 + $0x4e4] ss:$36 sps:$4 sm:$0xff]  }
 0x476   :  { %9319 = vmatpush2.bf16.msra.mxu1 %v13660_v61  ;;  %v13720_v40 = vld [vmem:[#allocation8 + $0x960] ss:$36 sps:$4 sm:$0xff]  }
 0x477   :  { %9320 = vmatprep.subr.bf16.mxu1 %v13668_v0  ;;  %v13728_v61 = vld [vmem:[#allocation8 + $0x91c] ss:$36 sps:$4 sm:$0xff]  }
 0x478   :  { %9262 = vmatpush1.bf16.msra.mxu0 %v13663_v5  ;;  %v13723_v0 = vld [vmem:[#allocation8 + $0x4e0] ss:$36 sps:$4 sm:$0xff]  }
 0x479   :  { %9263 = vmatprep.subr.bf16.mxu0 %v13671_v51  ;;  %v13731_v5 = vld [vmem:[#allocation8 + $0x49c] ss:$36 sps:$4 sm:$0xff]  }
 0x47a   :  { %9321 = vmatpush2.bf16.msra.mxu1 %v13666_v37  ;;  %v13726_v51 = vld [vmem:[#allocation8 + $0x918] ss:$36 sps:$4 sm:$0xff]  }
 0x47b   :  { %9322 = vmatprep.subr.bf16.mxu1 %v13674_v1  ;;  %v13734_v37 = vld [vmem:[#allocation8 + $0xd54] ss:$36 sps:$4 sm:$0xff]  }
 0x47c   :  { %9264 = vmatpush1.bf16.msra.mxu0 %v13669_v2  ;;  %v13729_v1 = vld [vmem:[#allocation8 + $0x498] ss:$36 sps:$4 sm:$0xff]  }
 0x47d   :  { %9265 = vmatprep.subr.bf16.mxu0 %v13677_v44  ;;  %v13737_v2 = vld [vmem:[#allocation8 + $0x8d4] ss:$36 sps:$4 sm:$0xff]  }
 0x47e   :  { %9323 = vmatpush2.bf16.msra.mxu1 %v13672_v14  ;;  %v13732_v44 = vld [vmem:[#allocation8 + $0xd50] ss:$36 sps:$4 sm:$0xff]  }
 0x47f   :  { %9324 = vmatprep.subr.bf16.mxu1 %v13680_v4  ;;  %v13740_v14 = vld [vmem:[#allocation8 + $0xd0c] ss:$36 sps:$4 sm:$0xff]  }
 0x480   :  { %9266 = vmatpush1.bf16.msra.mxu0 %v13675_v7  ;;  %v13735_v4 = vld [vmem:[#allocation8 + $0x8d0] ss:$36 sps:$4 sm:$0xff]  }
 0x481   :  { %9267 = vmatprep.subr.bf16.mxu0 %v13683_v24  ;;  %v13743_v7 = vld [vmem:[#allocation8 + $0x88c] ss:$36 sps:$4 sm:$0xff]  }
 0x482   :  { %9325 = vmatpush2.bf16.msra.mxu1 %v13678_v41  ;;  %v13738_v24 = vld [vmem:[#allocation8 + $0xd08] ss:$36 sps:$4 sm:$0xff]  }
 0x483   :  { %9376 = vmatprep.subr.bf16.mxu1 %v13686_v10  ;;  %v13746_v10 = vld [vmem:[#allocation8 + $0xcc4] ss:$36 sps:$4 sm:$0xff]  }
 0x484   :  { %9268 = vmatpush1.bf16.msra.mxu0 %v13681_v8 }
 0x485   :  { %v14467_v19 = vpop.f32.mrf.mxu1  ;;  %9327 = vmatmul.mubr.bf16.vlgmr.msra.gmra.mxu1 %v14366_v9  ;;  %9335 = vmatprep.subr.bf16.mxu0 %v13689_v11  ;;  %v13741_v11 = vld [vmem:[#allocation8 + $0x888] ss:$36 sps:$4 sm:$0xff]  }
 0x486   :  { %9377 = vmatpush1.bf16.msra.mxu1 %v13684_v12  ;;  %9408 = vmatprep.mubr.bf16.mxu1 %v14370_v27 }
 0x487   :  { %9286 = vmatmul.mubr.bf16.vlgmr.msra.gmra.mxu0 %v14405_v47  ;;  %v14472_v28 = vpop.f32.mrf.mxu1  ;;  %9378 = vmatprep.subr.bf16.mxu1 %v13692_v17  ;;  %v13749_v17 = vld [vmem:[#allocation8 + $0x844] ss:$36 sps:$4 sm:$0xff]  }
 0x488   :  { %9336 = vmatpush1.bf16.msra.mxu0 %v13687_v18  ;;  %9367 = vmatprep.mubr.bf16.mxu0 %v14348_v46 }
 0x489   :  { %v9086_v38 = vpop.f32.mrf.mxu1  ;;  %9337 = vmatprep.subr.bf16.mxu0 %v13695_v22 }
 0x48a   :  { %9379 = vmatpush1.bf16.msra.mxu1 %v13690_v23  ;;  %v13744_v23 = vld [vmem:[#allocation8 + $0xcc0] ss:$36 sps:$4 sm:$0xff]  }
 0x48b   :  { %v9087_v52 = vpop.f32.mrf.mxu1  ;;  %9380 = vmatprep.subr.bf16.mxu1 %v13698_v29 }
 0x48c   :  { %9338 = vmatpush1.bf16.msra.mxu0 %v13693_v30  ;;  %v13752_v30 = vld [vmem:[#allocation8 + $0xc7c] ss:$36 sps:$4 sm:$0xff]  }
 0x48d   :  { %9339 = vmatprep.subr.bf16.mxu0 %v13701_v31  ;;  %v13750_v52 = vld [vmem:[#allocation8 + $0xc78] ss:$36 sps:$4 sm:$0xff]  }
 0x48e   :  { %9381 = vmatpush1.bf16.msra.mxu1 %v13696_v49  ;;  %v13755_v49 = vld [vmem:[#allocation8 + $0x7fc] ss:$36 sps:$4 sm:$0xff]  }
 0x48f   :  { %9382 = vmatprep.subr.bf16.mxu1 %v13704_v3  ;;  %v13753_v3 = vld [vmem:[#allocation8 + $0x7f8] ss:$36 sps:$4 sm:$0xff]  }
 0x490   :  { %9340 = vmatpush1.bf16.msra.mxu0 %v13699_v56  ;;  %v13756_v56 = vld [vmem:[#allocation8 + $0xc30] ss:$36 sps:$4 sm:$0xff]  }
 0x491   :  { %9341 = vmatprep.subr.bf16.mxu0 %v13707_v62  ;;  %v13764_v62 = vld [vmem:[#allocation8 + $0xbec] ss:$36 sps:$4 sm:$0xff]  }
 0x492   :  { %9383 = vmatpush1.bf16.msra.mxu1 %v13702_v34  ;;  %v13767_v34 = vld [vmem:[#allocation8 + $0x76c] ss:$36 sps:$4 sm:$0xff]  }
 0x493   :  { %9384 = vmatprep.subr.bf16.mxu1 %v13710_v42  ;;  %v13762_v42 = vld [vmem:[#allocation8 + $0xbe8] ss:$36 sps:$4 sm:$0xff]  }
 0x494   :  { %9342 = vmatpush1.bf16.msra.mxu0 %v13705_v36  ;;  %v13770_v36 = vld [vmem:[#allocation8 + $0xba4] ss:$36 sps:$4 sm:$0xff]  }
 0x495   :  { %9343 = vmatprep.subr.bf16.mxu0 %v13713_v45  ;;  %v13765_v45 = vld [vmem:[#allocation8 + $0x768] ss:$36 sps:$4 sm:$0xff]  }
 0x496   :  { %9385 = vmatpush1.bf16.msra.mxu1 %v13708_v63  ;;  %v13773_v63 = vld [vmem:[#allocation8 + $0x724] ss:$36 sps:$4 sm:$0xff]  }
 0x497   :  { %9386 = vmatprep.subr.bf16.mxu1 %v13716_v48  ;;  %v13768_v48 = vld [vmem:[#allocation8 + $0xba0] ss:$36 sps:$4 sm:$0xff]  }
 0x498   :  { %9344 = vmatpush1.bf16.msra.mxu0 %v13711_v55  ;;  %v13776_v55 = vld [vmem:[#allocation8 + $0xb5c] ss:$36 sps:$4 sm:$0xff]  }
 0x499   :  { %9345 = vmatprep.subr.bf16.mxu0 %v13719_v20  ;;  %v13771_v20 = vld [vmem:[#allocation8 + $0x720] ss:$36 sps:$4 sm:$0xff]  }
 0x49a   :  { %9387 = vmatpush1.bf16.msra.mxu1 %v13714_v21  ;;  %v13779_v21 = vld [vmem:[#allocation8 + $0x6dc] ss:$36 sps:$4 sm:$0xff]  }
 0x49b   :  { %9388 = vmatprep.subr.bf16.mxu1 %v13722_v13  ;;  %v13774_v13 = vld [vmem:[#allocation8 + $0xb58] ss:$36 sps:$4 sm:$0xff]  }
 0x49c   :  { %9346 = vmatpush1.bf16.msra.mxu0 %v13717_v57  ;;  %v13782_v57 = vld [vmem:[#allocation8 + $0x1414] ss:$36 sps:$4 sm:$0xff]  }
 0x49d   :  { %9347 = vmatprep.subr.bf16.mxu0 %v13725_v58  ;;  %v13777_v58 = vld [vmem:[#allocation8 + $0x6d8] ss:$36 sps:$4 sm:$0xff]  }
 0x49e   :  { %9389 = vmatpush1.bf16.msra.mxu1 %v13720_v40  ;;  %v13785_v40 = vld [vmem:[#allocation8 + $0xf94] ss:$36 sps:$4 sm:$0xff]  }
 0x49f   :  { %9390 = vmatprep.subr.bf16.mxu1 %v13728_v61  ;;  %v13780_v61 = vld [vmem:[#allocation8 + $0x1410] ss:$36 sps:$4 sm:$0xff]  }
 0x4a0   :  { %9348 = vmatpush1.bf16.msra.mxu0 %v13723_v0  ;;  %v13788_v0 = vld [vmem:[#allocation8 + $0x13cc] ss:$36 sps:$4 sm:$0xff]  }
 0x4a1   :  { %9349 = vmatprep.subr.bf16.mxu0 %v13731_v5  ;;  %v13783_v5 = vld [vmem:[#allocation8 + $0xf90] ss:$36 sps:$4 sm:$0xff]  }
 0x4a2   :  { %9391 = vmatpush1.bf16.msra.mxu1 %v13726_v51 }
 0x4a3   :  { %9392 = vmatprep.subr.bf16.mxu1 %v13734_v37  ;;  %v13791_v37 = vld [vmem:[#allocation8 + $0xf4c] ss:$36 sps:$4 sm:$0xff]  }
 0x4a4   :  { %9350 = vmatpush1.bf16.msra.mxu0 %v13729_v1  ;;  %v13786_v1 = vld [vmem:[#allocation8 + $0x13c8] ss:$36 sps:$4 sm:$0xff]  }
 0x4a5   :  { %9351 = vmatprep.subr.bf16.mxu0 %v13737_v2 }
 0x4a6   :  { %9393 = vmatpush2.bf16.msra.mxu1 %v13732_v44  ;;  %v13794_v44 = vld [vmem:[#allocation8 + $0x1384] ss:$36 sps:$4 sm:$0xff]  }
 0x4a7   :  { %v9041_v41 = vpop.f32.mrf.mxu0  ;;  %9394 = vmatprep.subr.bf16.mxu1 %v13740_v14  ;;  %v13789_v14 = vld [vmem:[#allocation8 + $0xf48] ss:$36 sps:$4 sm:$0xff]  }
 0x4a8   :  { %v9042_v8 = vadd.f32 %v9041_v41, %v14463_v39  ;;  %9352 = vmatpush2.bf16.msra.mxu0 %v13735_v4  ;;  %v13747_v39 = vld [vmem:[#allocation8 + $0x840] ss:$36 sps:$4 sm:$0xff]  }
 0x4a9   :  { %v9043_v12 = vpop.f32.mrf.mxu0  ;;  %9353 = vmatprep.subr.bf16.mxu0 %v13743_v7  ;;  %v13797_v7 = vld [vmem:[#allocation8 + $0xf04] ss:$36 sps:$4 sm:$0xff]  }
 0x4aa   :  { %v14477_v18 = vadd.f32 %v14467_v19, %v9042_v8  ;;  %v9044_v22 = vadd.f32 %v9043_v12, %v14465_v32  ;;  %9395 = vmatpush2.bf16.msra.mxu1 %v13738_v24  ;;  %v13758_v19 = vld [vmem:[#allocation8 + $0xc34] ss:$36 sps:$4 sm:$0xff]   ;;  %v13792_v24 = vld [vmem:[#allocation8 + $0x1380] ss:$36 sps:$4 sm:$0xff]  }
 0x4ab   :  { %v9045_v29 = vpop.f32.mrf.mxu0  ;;  %9396 = vmatprep.subr.bf16.mxu1 %v13746_v10  ;;  %v13761_v32 = vld [vmem:[#allocation8 + $0x7b4] ss:$36 sps:$4 sm:$0xff]   ;;  %v13800_v10 = vld [vmem:[#allocation8 + $0x133c] ss:$36 sps:$4 sm:$0xff]  }
 0x4ac   :  { %v14481_v38 = vadd.f32 %v14472_v28, %v9044_v22  ;;  %9354 = vmatpush2.bf16.msra.mxu0 %v13741_v11  ;;  %v13759_v28 = vld [vmem:[#allocation8 + $0x7b0] ss:$36 sps:$4 sm:$0xff]   ;;  %v13803_v8 = vld [vmem:[#allocation8 + $0xebc] ss:$36 sps:$4 sm:$0xff]  }
 0x4ad   :  { %v9046_v31 = vpop.f32.mrf.mxu0  ;;  %9355 = vmatprep.subr.bf16.mxu0 %v13749_v17  ;;  %v13798_v11 = vld [vmem:[#allocation8 + $0x1338] ss:$36 sps:$4 sm:$0xff]   ;;  %v13812_v29 = vld [vmem:[#allocation8 + $0x12ac] ss:$36 sps:$4 sm:$0xff]  }
 0x4ae   :  { %9397 = vmatpush2.bf16.msra.mxu1 %v13744_v23  ;;  %v13806_v12 = vld [vmem:[#allocation8 + $0x12f4] ss:$36 sps:$4 sm:$0xff]   ;;  %v13810_v31 = vld [vmem:[#allocation8 + $0x12a8] ss:$36 sps:$4 sm:$0xff]  }
 0x4af   :  { %9398 = vmatprep.subr.bf16.mxu1 %v13752_v30  ;;  %v13801_v17 = vld [vmem:[#allocation8 + $0xeb8] ss:$36 sps:$4 sm:$0xff]   ;;  %v13804_v23 = vld [vmem:[#allocation8 + $0x12f0] ss:$36 sps:$4 sm:$0xff]  }
 0x4b0   :  { %9356 = vmatpush2.bf16.msra.mxu0 %v13747_v39  ;;  %v13809_v22 = vld [vmem:[#allocation8 + $0xe74] ss:$36 sps:$4 sm:$0xff]   ;;  %v13815_v39 = vld [vmem:[#allocation8 + $0xe2c] ss:$36 sps:$4 sm:$0xff]  }
 0x4b1   :  { %9357 = vmatprep.subr.bf16.mxu0 %v13755_v49  ;;  %v13807_v30 = vld [vmem:[#allocation8 + $0xe70] ss:$36 sps:$4 sm:$0xff]   ;;  %v13818_v49 = vld [vmem:[#allocation8 + $0x1264] ss:$36 sps:$4 sm:$0xff]  }
 0x4b2   :  { %9399 = vmatpush2.bf16.msra.mxu1 %v13750_v52  ;;  %v13813_v52 = vld [vmem:[#allocation8 + $0xe28] ss:$36 sps:$4 sm:$0xff]  }
 0x4b3   :  { %9400 = vmatprep.subr.bf16.mxu1 %v13758_v19  ;;  %v13821_v19 = vld [vmem:[#allocation8 + $0xde4] ss:$36 sps:$4 sm:$0xff]  }
 0x4b4   :  { %9358 = vmatpush2.bf16.msra.mxu0 %v13753_v3  ;;  %v13816_v3 = vld [vmem:[#allocation8 + $0x1260] ss:$36 sps:$4 sm:$0xff]  }
 0x4b5   :  { %9359 = vmatprep.subr.bf16.mxu0 %v13761_v32  ;;  %v13824_v32 = vld [vmem:[#allocation8 + $0x121c] ss:$36 sps:$4 sm:$0xff]  }
 0x4b6   :  { %9401 = vmatpush2.bf16.msra.mxu1 %v13756_v56  ;;  %v13819_v56 = vld [vmem:[#allocation8 + $0xde0] ss:$36 sps:$4 sm:$0xff]  }
 0x4b7   :  { %9402 = vmatprep.subr.bf16.mxu1 %v13764_v62  ;;  %v13827_v62 = vld [vmem:[#allocation8 + $0xd9c] ss:$36 sps:$4 sm:$0xff]  }
 0x4b8   :  { %9360 = vmatpush2.bf16.msra.mxu0 %v13759_v28  ;;  %v13822_v28 = vld [vmem:[#allocation8 + $0x1218] ss:$36 sps:$4 sm:$0xff]  }
 0x4b9   :  { %9361 = vmatprep.subr.bf16.mxu0 %v13767_v34  ;;  %v13828_v34 = vld [vmem:[#allocation8 + $0x8d8] ss:$36 sps:$4 sm:$0xff]  }
 0x4ba   :  { %9403 = vmatpush2.bf16.msra.mxu1 %v13762_v42  ;;  %v13825_v42 = vld [vmem:[#allocation8 + $0xd98] ss:$36 sps:$4 sm:$0xff]  }
 0x4bb   :  { %9404 = vmatprep.subr.bf16.mxu1 %v13770_v36  ;;  %v13831_v36 = vld [vmem:[#allocation8 + $0x11d4] ss:$36 sps:$4 sm:$0xff]  }
 0x4bc   :  { %9362 = vmatpush2.bf16.msra.mxu0 %v13765_v45  ;;  %v13832_v45 = vld [vmem:[#allocation8 + $0x698] ss:$36 sps:$4 sm:$0xff]  }
 0x4bd   :  { %9363 = vmatprep.subr.bf16.mxu0 %v13773_v63  ;;  %v13833_v63 = vld [vmem:[#allocation8 + $0x890] ss:$36 sps:$4 sm:$0xff]  }
 0x4be   :  { %9405 = vmatpush2.bf16.msra.mxu1 %v13768_v48  ;;  %v14491_v48 = vld [vmem:[#allocation10] sm:$0xff] }
 0x4bf   :  { %9406 = vmatprep.subr.bf16.mxu1 %v13776_v55  ;;  %v5341_v55 = vrot.slane %v14491_v48, %v793_v54 }
 0x4c0   :  { %9364 = vmatpush2.bf16.msra.mxu0 %v13771_v20  ;;  %v13829_v20 = vld [vmem:[#allocation8 + $0x11d0] ss:$36 sps:$4 sm:$0xff]  }
 0x4c1   :  { %9365 = vmatprep.subr.bf16.mxu0 %v13779_v21  ;;  %v13836_v21 = vld [vmem:[#allocation8 + $0x118c] ss:$36 sps:$4 sm:$0xff]  }
 0x4c2   :  { %9407 = vmatpush2.bf16.msra.mxu1 %v13774_v13  ;;  %v5345_v13 = vrot.slane %v14491_v48, %v797_v59  ;;  %v13839_v59 = vld [vmem:[#allocation8 + $0x1140] ss:$36 sps:$4 sm:$0xff]  }
 0x4c3   :  { %9458 = vmatprep.subr.bf16.mxu1 %v13782_v57  ;;  %v13837_v57 = vld [vmem:[#allocation8 + $0x650] ss:$36 sps:$4 sm:$0xff]  }
 0x4c4   :  { %9366 = vmatpush2.bf16.msra.mxu0 %v13777_v58 }
 0x4c5   :  { %v14483_v51 = vpop.f32.mrf.mxu1  ;;  %9409 = vmatmul.mubr.bf16.vlgmr.msra.gmra.mxu1 %v14392_v53  ;;  %9417 = vmatprep.subr.bf16.mxu0 %v13785_v40  ;;  %v13838_v40 = vld [vmem:[#allocation8 + $0x848] ss:$36 sps:$4 sm:$0xff]  }
 0x4c6   :  { %9459 = vmatpush1.bf16.msra.mxu1 %v13780_v61  ;;  %9490 = vmatprep.mubr.bf16.mxu1 %v14181_v60  ;;  %v13795_v60 = vld [vmem:[#allocation8 + $0xf00] ss:$36 sps:$4 sm:$0xff]  }
 0x4c7   :  { %9368 = vmatmul.mubr.bf16.vlgmr.msra.gmra.mxu0 %v14368_v6  ;;  %v14488_v2 = vpop.f32.mrf.mxu1  ;;  %9460 = vmatprep.subr.bf16.mxu1 %v13788_v0  ;;  %v13834_v0 = vld [vmem:[#allocation8 + $0x1188] ss:$36 sps:$4 sm:$0xff]  }
 0x4c8   :  { %9418 = vmatpush1.bf16.msra.mxu0 %v13783_v5  ;;  %9449 = vmatprep.mubr.bf16.mxu0 %v14398_v35  ;;  %v13841_v5 = vld [vmem:[#allocation8 + $0x1144] ss:$36 sps:$4 sm:$0xff]  }
 0x4c9   :  { %v9168_v4 = vpop.f32.mrf.mxu1  ;;  %9419 = vmatprep.subr.bf16.mxu0 %v13791_v37 }
 0x4ca   :  { %9461 = vmatpush1.bf16.msra.mxu1 %v13786_v1  ;;  %v13842_v1 = vld [vmem:[#allocation8 + $0x608] ss:$36 sps:$4 sm:$0xff]  }
 0x4cb   :  { %v9169_v41 = vpop.f32.mrf.mxu1  ;;  %9462 = vmatprep.subr.bf16.mxu1 %v13794_v44 }
 0x4cc   :  { %9420 = vmatpush1.bf16.msra.mxu0 %v13789_v14  ;;  %v13843_v14 = vld [vmem:[#allocation8 + $0x800] ss:$36 sps:$4 sm:$0xff]  }
 0x4cd   :  { %9421 = vmatprep.subr.bf16.mxu0 %v13797_v7  ;;  %v13847_v41 = vld [vmem:[#allocation8 + $0x5c0] ss:$36 sps:$4 sm:$0xff]  }
 0x4ce   :  { %9463 = vmatpush1.bf16.msra.mxu1 %v13792_v24  ;;  %v13846_v24 = vld [vmem:[#allocation8 + $0x10fc] ss:$36 sps:$4 sm:$0xff]  }
 0x4cf   :  { %9464 = vmatprep.subr.bf16.mxu1 %v13800_v10  ;;  %v13848_v10 = vld [vmem:[#allocation8 + $0x7b8] ss:$36 sps:$4 sm:$0xff]  }
 0x4d0   :  { %9422 = vmatpush1.bf16.msra.mxu0 %v13795_v60  ;;  %v13844_v60 = vld [vmem:[#allocation8 + $0x10f8] ss:$36 sps:$4 sm:$0xff]  }
 0x4d1   :  { %9423 = vmatprep.subr.bf16.mxu0 %v13803_v8  ;;  %v13852_v8 = vld [vmem:[#allocation8 + $0x578] ss:$36 sps:$4 sm:$0xff]  }
 0x4d2   :  { %9465 = vmatpush1.bf16.msra.mxu1 %v13798_v11  ;;  %v13853_v11 = vld [vmem:[#allocation8 + $0x770] ss:$36 sps:$4 sm:$0xff]  }
 0x4d3   :  { %9466 = vmatprep.subr.bf16.mxu1 %v13806_v12  ;;  %v13849_v12 = vld [vmem:[#allocation8 + $0x10b0] ss:$36 sps:$4 sm:$0xff]  }
 0x4d4   :  { %9424 = vmatpush1.bf16.msra.mxu0 %v13801_v17  ;;  %v13857_v17 = vld [vmem:[#allocation8 + $0x530] ss:$36 sps:$4 sm:$0xff]  }
 0x4d5   :  { %9425 = vmatprep.subr.bf16.mxu0 %v13809_v22  ;;  %v13858_v22 = vld [vmem:[#allocation8 + $0x728] ss:$36 sps:$4 sm:$0xff]  }
 0x4d6   :  { %9467 = vmatpush1.bf16.msra.mxu1 %v13804_v23  ;;  %v13854_v23 = vld [vmem:[#allocation8 + $0x1068] ss:$36 sps:$4 sm:$0xff]  }
 0x4d7   :  { %9468 = vmatprep.subr.bf16.mxu1 %v13812_v29  ;;  %v13861_v29 = vld [vmem:[#allocation8 + $0x1024] ss:$36 sps:$4 sm:$0xff]  }
 0x4d8   :  { %9426 = vmatpush1.bf16.msra.mxu0 %v13807_v30  ;;  %v13862_v30 = vld [vmem:[#allocation8 + $0x4e8] ss:$36 sps:$4 sm:$0xff]  }
 0x4d9   :  { %9427 = vmatprep.subr.bf16.mxu0 %v13815_v39  ;;  %v13863_v39 = vld [vmem:[#allocation8 + $0x6e0] ss:$36 sps:$4 sm:$0xff]  }
 0x4da   :  { %9469 = vmatpush1.bf16.msra.mxu1 %v13810_v31  ;;  %v13859_v31 = vld [vmem:[#allocation8 + $0x1020] ss:$36 sps:$4 sm:$0xff]  }
 0x4db   :  { %9470 = vmatprep.subr.bf16.mxu1 %v13818_v49  ;;  %v13866_v49 = vld [vmem:[#allocation8 + $0xfdc] ss:$36 sps:$4 sm:$0xff]  }
 0x4dc   :  { %9428 = vmatpush1.bf16.msra.mxu0 %v13813_v52  ;;  %v13867_v52 = vld [vmem:[#allocation8 + $0x4a0] ss:$36 sps:$4 sm:$0xff]  }
 0x4dd   :  { %9429 = vmatprep.subr.bf16.mxu0 %v13821_v19  ;;  %v13868_v19 = vld [vmem:[#allocation8 + $0x11d8] ss:$36 sps:$4 sm:$0xff]  }
 0x4de   :  { %9471 = vmatpush1.bf16.msra.mxu1 %v13816_v3  ;;  %v13864_v3 = vld [vmem:[#allocation8 + $0xfd8] ss:$36 sps:$4 sm:$0xff]  }
 0x4df   :  { %9472 = vmatprep.subr.bf16.mxu1 %v13824_v32  ;;  %v13869_v32 = vld [vmem:[#allocation8 + $0x458] ss:$36 sps:$4 sm:$0xff]  }
 0x4e0   :  { %9430 = vmatpush1.bf16.msra.mxu0 %v13819_v56  ;;  %v13870_v56 = vld [vmem:[#allocation8 + $0xf98] ss:$36 sps:$4 sm:$0xff]  }
 0x4e1   :  { %9431 = vmatprep.subr.bf16.mxu0 %v13827_v62  ;;  %v13872_v62 = vld [vmem:[#allocation8 + $0x1190] ss:$36 sps:$4 sm:$0xff]  }
 0x4e2   :  { %9473 = vmatpush1.bf16.msra.mxu1 %v13822_v28  ;;  %v13871_v28 = vld [vmem:[#allocation8 + $0x218] ss:$36 sps:$4 sm:$0xff]  }
 0x4e3   :  { %11929 = vmatprep.subr.bf16.mxu1 %v13828_v34 }
 0x4e4   :  { %9432 = vmatpush1.bf16.msra.mxu0 %v13825_v42  ;;  %v13873_v42 = vld [vmem:[#allocation8 + $0x410] ss:$36 sps:$4 sm:$0xff]  }
 0x4e5   :  { %9491 = vmatmul.mubr.bf16.vlgmr.msra.gmra.mxu1 %v14405_v47  ;;  %9433 = vmatprep.subr.bf16.mxu0 %v13831_v36  ;;  %v13874_v36 = vld [vmem:[#allocation8 + $0xf50] ss:$36 sps:$4 sm:$0xff]  }
 0x4e6   :  { %11930 = vmatpush3.bf16.msra.mxu1 %v13832_v45  ;;  %9571 = vmatprep.mubr.bf16.mxu1 %v14348_v46 }
 0x4e7   :  { %v9123_v58 = vpop.f32.mrf.mxu0  ;;  %11931 = vmatprep.subr.bf16.mxu1 %v13833_v63  ;;  %v13876_v63 = vld [vmem:[#allocation8 + $0x1148] ss:$36 sps:$4 sm:$0xff]  }
 0x4e8   :  { %v9124_v61 = vadd.f32 %v9123_v58, %v5341_v55  ;;  %9434 = vmatpush2.bf16.msra.mxu0 %v13829_v20  ;;  %v13875_v55 = vld [vmem:[#allocation8 + $0x1d0] ss:$36 sps:$4 sm:$0xff]   ;;  %v13881_v58 = vld [vmem:[#allocation8 + $0x380] ss:$36 sps:$4 sm:$0xff]  }
 0x4e9   :  { %v9125_v54 = vpop.f32.mrf.mxu0  ;;  %9435 = vmatprep.subr.bf16.mxu0 %v13836_v21  ;;  %v13877_v21 = vld [vmem:[#allocation8 + $0x3c8] ss:$36 sps:$4 sm:$0xff]  }
 0x4ea   :  { %v9126_v37 = vadd.f32 %v9125_v54, %v5345_v13  ;;  %11932 = vmatpush3.bf16.msra.mxu1 %v13837_v57  ;;  %v14502_v44 = vadd.f32 %v14483_v51, %v9124_v61  ;;  %v13851_v51 = vld [vmem:[#allocation8 + $0x10b4] ss:$36 sps:$4 sm:$0xff]   ;;  %v13880_v57 = vld [vmem:[#allocation8 + $0x1100] ss:$36 sps:$4 sm:$0xff]  }
 0x4eb   :  { %v9127_v46 = vpop.f32.mrf.mxu0  ;;  %11933 = vmatprep.subr.bf16.mxu1 %v13838_v40  ;;  %v13882_v40 = vld [vmem:[#allocation8 + $0xec0] ss:$36 sps:$4 sm:$0xff]   ;;  %v13884_v61 = vld [vmem:[#allocation8 + $0x10b8] ss:$36 sps:$4 sm:$0xff]  }
 0x4ec   :  { %9436 = vmatpush2.bf16.msra.mxu0 %v13834_v0  ;;  %v14505_v4 = vadd.f32 %v14488_v2, %v9126_v37  ;;  %v13856_v2 = vld [vmem:[#allocation8 + $0x106c] ss:$36 sps:$4 sm:$0xff]   ;;  %v13883_v0 = vld [vmem:[#allocation8 + $0x140] ss:$36 sps:$4 sm:$0xff]   ;;  %v13886_v54 = vld [vmem:[#allocation8 + $0xe78] ss:$36 sps:$4 sm:$0xff]  }
 0x4ed   :  { %v9128_v7 = vpop.f32.mrf.mxu0  ;;  %9437 = vmatprep.subr.bf16.mxu0 %v13841_v5  ;;  %v13888_v5 = vld [vmem:[#allocation8 + $0x1070] ss:$36 sps:$4 sm:$0xff]   ;;  %v13887_v37 = vld [vmem:[#allocation8 + $0xf8] ss:$36 sps:$4 sm:$0xff]  }
 0x4ee   :  { %11934 = vmatpush3.bf16.msra.mxu1 %v13842_v1  ;;  %v13889_v1 = vld [vmem:[#allocation8 + $0x2f0] ss:$36 sps:$4 sm:$0xff]   ;;  %v13893_v7 = vld [vmem:[#allocation8 + $0x2a8] ss:$36 sps:$4 sm:$0xff]  }
 0x4ef   :  { %11935 = vmatprep.subr.bf16.mxu1 %v13843_v14  ;;  %v13890_v46 = vld [vmem:[#allocation8 + $0xe30] ss:$36 sps:$4 sm:$0xff]   ;;  %v13892_v14 = vld [vmem:[#allocation8 + $0x1028] ss:$36 sps:$4 sm:$0xff]  }
 0x4f0   :  { %9438 = vmatpush2.bf16.msra.mxu0 %v13839_v59  ;;  %v13891_v59 = vld [vmem:[#allocation8 + $0xb0] ss:$36 sps:$4 sm:$0xff]  }
 0x4f1   :  { %9439 = vmatprep.subr.bf16.mxu0 %v13846_v24  ;;  %v13894_v24 = vld [vmem:[#allocation8 + $0xde8] ss:$36 sps:$4 sm:$0xff]  }
 0x4f2   :  { %11936 = vmatpush3.bf16.msra.mxu1 %v13847_v41  ;;  %v13896_v41 = vld [vmem:[#allocation8 + $0xfe0] ss:$36 sps:$4 sm:$0xff]  }
 0x4f3   :  { %11937 = vmatprep.subr.bf16.mxu1 %v13848_v10  ;;  %v13895_v10 = vld [vmem:[#allocation8 + $0x68] ss:$36 sps:$4 sm:$0xff]  }
 0x4f4   :  { %9440 = vmatpush2.bf16.msra.mxu0 %v13844_v60  ;;  %v13897_v60 = vld [vmem:[#allocation8 + $0x260] ss:$36 sps:$4 sm:$0xff]  }
 0x4f5   :  { %9441 = vmatprep.subr.bf16.mxu0 %v13851_v51  ;;  %v13898_v51 = vld [vmem:[#allocation8 + $0xda0] ss:$36 sps:$4 sm:$0xff]  }
 0x4f6   :  { %11938 = vmatpush3.bf16.msra.mxu1 %v13852_v8  ;;  %v13900_v8 = vld [vmem:[#allocation11 + $0x78] sm:$0xff]  }
 0x4f7   :  { %11939 = vmatprep.subr.bf16.mxu1 %v13853_v11  ;;  %v9700_v11 = vmax.f32 %v14449_v16, 0.0  ;;  %v13908_v16 = vld [vmem:[#allocation11 + $0x68] sm:$0xff]  }
 0x4f8   :  { %9442 = vmatpush2.bf16.msra.mxu0 %v13849_v12  ;;  %v13899_v12 = vld [vmem:[#allocation8 + $0x20] ss:$36 sps:$4 sm:$0xff]  }
 0x4f9   :  { %9443 = vmatprep.subr.bf16.mxu0 %v13856_v2  ;;  %v13901_v2 = vld [vmem:[#allocation8 + $0xd58] ss:$36 sps:$4 sm:$0xff]  }
 0x4fa   :  { %11940 = vmatpush3.bf16.msra.mxu1 %v13857_v17  ;;  %v13902_v17 = vld [vmem:[#allocation11 + $0x38] sm:$0xff]  }
 0x4fb   :  { %11941 = vmatprep.subr.bf16.mxu1 %v13858_v22  ;;  %v13904_v22 = vld [vmem:[#allocation11 + $0x70] sm:$0xff]  }
 0x4fc   :  { %9444 = vmatpush2.bf16.msra.mxu0 %v13854_v23  ;;  %v9709_v23 = vpack.c.bf16 %v9700_v11, %v9700_v11 }
 0x4fd   :  { %9445 = vmatprep.subr.bf16.mxu0 %v13861_v29  ;;  %v13903_v29 = vld [vmem:[#allocation8 + $0xb18] ss:$36 sps:$4 sm:$0xff]  }
 0x4fe   :  { %11942 = vmatpush3.bf16.msra.mxu1 %v13862_v30  ;;  %v13905_v30 = vld [vmem:[#allocation8 + $0xd10] ss:$36 sps:$4 sm:$0xff]  }
 0x4ff   :  { %11943 = vmatprep.subr.bf16.mxu1 %v13863_v39  ;;  %v13906_v39 = vld [vmem:[#allocation11 + $0x30] sm:$0xff]  }
 0x500   :  { %9446 = vmatpush2.bf16.msra.mxu0 %v13859_v31 }
 0x501   :  { %9447 = vmatprep.subr.bf16.mxu0 %v13866_v49 }
 0x502   :  { %11944 = vmatpush3.bf16.msra.mxu1 %v13867_v52  ;;  %v13907_v52 = vld [vmem:[#allocation8 + $0xad0] ss:$36 sps:$4 sm:$0xff]  }
 0x503   :  { %11973 = vmatprep.subr.bf16.mxu1 %v13868_v19 }
 0x504   :  { %9448 = vmatpush2.bf16.msra.mxu0 %v13864_v3  ;;  %v13909_v3 = vld [vmem:[#allocation8 + $0xcc8] ss:$36 sps:$4 sm:$0xff]  }
 0x505   :  { %v14507_v34 = vpop.f32.mrf.mxu1  ;;  %9572 = vmatmul.mubr.bf16.vlgmr.msra.gmra.mxu1 %v14368_v6  ;;  %11907 = vmatprep.subr.bf16.mxu0 %v13869_v32  ;;  %v13878_v6 = vld [vmem:[#allocation8 + $0xf08] ss:$36 sps:$4 sm:$0xff]   ;;  %v13910_v32 = vld [vmem:[#allocation11 + $0x28] sm:$0xff]  }
 0x506   :  { %11974 = vmatpush3.bf16.msra.mxu1 %v13870_v56  ;;  %9651 = vmatprep.mubr.bf16.mxu1 %v14398_v35  ;;  %v13879_v35 = vld [vmem:[#allocation8 + $0x188] ss:$36 sps:$4 sm:$0xff]  }
 0x507   :  { %9450 = vmatmul.mubr.bf16.vlgmr.msra.gmra.mxu0 %v14400_v15  ;;  %v14512_v45 = vpop.f32.mrf.mxu1  ;;  %11975 = vmatprep.subr.bf16.mxu1 %v13872_v62 }
 0x508   :  { %11908 = vmatpush3.bf16.msra.mxu0 %v13871_v28  ;;  %9531 = vmatprep.mubr.bf16.mxu0 %v14346_v43  ;;  %v13885_v43 = vld [vmem:[#allocation8 + $0x338] ss:$36 sps:$4 sm:$0xff]   ;;  %v13911_v28 = vld [vmem:[#allocation8 + $0xa88] ss:$36 sps:$4 sm:$0xff]  }
 0x509   :  { %v9250_v20 = vpop.f32.mrf.mxu1  ;;  %11909 = vmatprep.subr.bf16.mxu0 %v13873_v42  ;;  %v13913_v42 = vld [vmem:[#allocation8 + $0xc80] ss:$36 sps:$4 sm:$0xff]  }
 0x50a   :  { %11976 = vmatpush3.bf16.msra.mxu1 %v13874_v36  ;;  %v13914_v36 = vld [vmem:[#allocation11 + $0x20] sm:$0xff]   ;;  %v13920_v20 = vld [vmem:[#allocation11 + $0x50] sm:$0xff]  }
 0x50b   :  { %v9251_v13 = vpop.f32.mrf.mxu1  ;;  %11977 = vmatprep.subr.bf16.mxu1 %v13876_v63  ;;  %v13915_v63 = vld [vmem:[#allocation8 + $0xa40] ss:$36 sps:$4 sm:$0xff]  }
 0x50c   :  { %11910 = vmatpush3.bf16.msra.mxu0 %v13875_v55  ;;  %v13918_v55 = vld [vmem:[#allocation11 + $0x18] sm:$0xff]   ;;  %v13924_v13 = vld [vmem:[#allocation11 + $0x48] sm:$0xff]  }
 0x50d   :  { %11911 = vmatprep.subr.bf16.mxu0 %v13877_v21  ;;  %v13919_v21 = vld [vmem:[#allocation8 + $0x9f8] ss:$36 sps:$4 sm:$0xff]  }
 0x50e   :  { %11978 = vmatpush3.bf16.msra.mxu1 %v13878_v6  ;;  %v13922_v6 = vld [vmem:[#allocation11 + $0x10] sm:$0xff]  }
 0x50f   :  { %11979 = vmatprep.subr.bf16.mxu1 %v13880_v57  ;;  %v13923_v57 = vld [vmem:[#allocation8 + $0x9b0] ss:$36 sps:$4 sm:$0xff]  }
 0x510   :  { %11912 = vmatpush3.bf16.msra.mxu0 %v13879_v35  ;;  %v13925_v35 = vld [vmem:[#allocation8 + $0xba8] ss:$36 sps:$4 sm:$0xff]  }
 0x511   :  { %11913 = vmatprep.subr.bf16.mxu0 %v13881_v58  ;;  %v13926_v58 = vld [vmem:[#allocation11 + $0x8] sm:$0xff]  }
 0x512   :  { %11980 = vmatpush3.bf16.msra.mxu1 %v13882_v40  ;;  %v13928_v40 = vld [vmem:[#allocation11 + $0x40] sm:$0xff]  }
 0x513   :  { %11981 = vmatprep.subr.bf16.mxu1 %v13884_v61  ;;  %v13927_v61 = vld [vmem:[#allocation8 + $0x968] ss:$36 sps:$4 sm:$0xff]  }
 0x514   :  { %11914 = vmatpush3.bf16.msra.mxu0 %v13883_v0  ;;  %v13929_v0 = vld [vmem:[#allocation8 + $0xb60] ss:$36 sps:$4 sm:$0xff]  }
 0x515   :  { %11915 = vmatprep.subr.bf16.mxu0 %v13885_v43  ;;  %v13930_v43 = vld [vmem:[#allocation11] sm:$0xff]  }
 0x516   :  { %11982 = vmatpush3.bf16.msra.mxu1 %v13886_v54  ;;  %v9699_v54 = vmax.f32 %v14445_v50, 0.0  ;;  %v13936_v50 = vld [vmem:[#allocation11 + $0x130] sm:$0xff]  }
 0x517   :  { %11983 = vmatprep.subr.bf16.mxu1 %v13888_v5  ;;  %v13932_v5 = vld [vmem:[#allocation11 + $0x178] sm:$0xff]  }
 0x518   :  { %11916 = vmatpush3.bf16.msra.mxu0 %v13887_v37  ;;  %v13931_v37 = vld [vmem:[#allocation8 + $0x920] ss:$36 sps:$4 sm:$0xff]  }
 0x519   :  { %11917 = vmatprep.subr.bf16.mxu0 %v13889_v1  ;;  %v13933_v1 = vld [vmem:[#allocation11 + $0x138] sm:$0xff]  }
 0x51a   :  { %11984 = vmatpush3.bf16.msra.mxu1 %v13890_v46  ;;  %v9708_v46 = vpack.c.bf16 %v9699_v54, %v9699_v54  ;;  %v13971_v54 = vld [vmem:[#allocation11 + $0x80] sm:$0xff]  }
 0x51b   :  { %11985 = vmatprep.subr.bf16.mxu1 %v13892_v14  ;;  %v13935_v14 = vld [vmem:[#allocation11 + $0x170] sm:$0xff]  }
 0x51c   :  { %11918 = vmatpush3.bf16.msra.mxu0 %v13891_v59  ;;  %v13934_v59 = vld [vmem:[#allocation8 + $0x1418] ss:$36 sps:$4 sm:$0xff]  }
 0x51d   :  { %11919 = vmatprep.subr.bf16.mxu0 %v13893_v7 }
 0x51e   :  { %11986 = vmatpush3.bf16.msra.mxu1 %v13894_v24  ;;  %v14182_v24 = vmov 0.0  }
 0x51f   :  { %11987 = vmatprep.subr.bf16.mxu1 %v13896_v41 }
 0x520   :  { %11920 = vmatpush3.bf16.msra.mxu0 %v13895_v10 }
 0x521   :  { %11921 = vmatprep.subr.bf16.mxu0 %v13897_v60  ;;  %v13938_v60 = vld [vmem:[#allocation11 + $0x168] sm:$0xff]  }
 0x522   :  { %11988 = vmatpush3.bf16.msra.mxu1 %v13898_v51  ;;  %v13937_v51 = vld [vmem:[#allocation8 + $0x13d0] ss:$36 sps:$4 sm:$0xff]  }
 0x523   :  { %12004 = vmatprep.subr.bf16.mxu1 %v13900_v8 }
 0x524   :  { %11922 = vmatpush3.bf16.msra.mxu0 %v13899_v12 }
 0x525   :  { %9652 = vmatmul.mubr.bf16.vlgmr.msra.gmra.mxu1 %v14400_v15  ;;  %11951 = vmatprep.subr.bf16.mxu0 %v13901_v2  ;;  %v13939_v2 = vld [vmem:[#allocation11 + $0x128] sm:$0xff]  }
 0x526   :  { %12005 = vmatpush3.bf16.msra.mxu1 %v13902_v17  ;;  %10332 = vmatprep.mubr.bf16.mxu1 %v9709_v23 }
 0x527   :  { %v9205_v31 = vpop.f32.mrf.mxu0  ;;  %9532 = vmatmul.mubr.bf16.vlgmr.msra.gmra.mxu0 %v14366_v9  ;;  %12006 = vmatprep.subr.bf16.mxu1 %v13904_v22  ;;  %v13912_v9 = vld [vmem:[#allocation11 + $0x60] sm:$0xff]  }
 0x528   :  { %v9206_v49 = vadd.f32 %v9205_v31, %v14502_v44  ;;  %11952 = vmatpush3.bf16.msra.mxu0 %v13903_v29  ;;  %9611 = vmatprep.mubr.bf16.mxu0 %v14370_v27  ;;  %v13941_v22 = vld [vmem:[#allocation11 + $0x160] sm:$0xff]  }
 0x529   :  { %v9207_v19 = vpop.f32.mrf.mxu0  ;;  %11953 = vmatprep.subr.bf16.mxu0 %v13905_v30  ;;  %v13940_v29 = vld [vmem:[#allocation8 + $0x1388] ss:$36 sps:$4 sm:$0xff]  }
 0x52a   :  { %v9208_v15 = vadd.f32 %v9207_v19, %v14505_v4  ;;  %12007 = vmatpush3.bf16.msra.mxu1 %v13906_v39  ;;  %v14522_v56 = vadd.f32 %v14507_v34, %v9206_v49  ;;  %v13916_v4 = vld [vmem:[#allocation11 + $0x58] sm:$0xff]   ;;  %v13917_v34 = vld [vmem:[#allocation8 + $0xc38] ss:$36 sps:$4 sm:$0xff]   ;;  %v13942_v31 = vld [vmem:[#allocation11 + $0x120] sm:$0xff]  }
 0x52b   :  { %v9209_v62 = vpop.f32.mrf.mxu0  ;;  %12008 = vmatprep.subr.bf16.mxu1 %v13908_v16  ;;  %v13944_v16 = vld [vmem:[#allocation11 + $0x158] sm:$0xff]   ;;  %v13947_v19 = vld [vmem:[#allocation11 + $0x150] sm:$0xff]  }
 0x52c   :  { %11954 = vmatpush3.bf16.msra.mxu0 %v13907_v52  ;;  %v14525_v44 = vadd.f32 %v14512_v45, %v9208_v15  ;;  %v13921_v45 = vld [vmem:[#allocation8 + $0xbf0] ss:$36 sps:$4 sm:$0xff]   ;;  %v13943_v49 = vld [vmem:[#allocation8 + $0x1340] ss:$36 sps:$4 sm:$0xff]  }
 0x52d   :  { %v9210_v27 = vpop.f32.mrf.mxu0  ;;  %11955 = vmatprep.subr.bf16.mxu0 %v13909_v3  ;;  %v13945_v52 = vld [vmem:[#allocation11 + $0x118] sm:$0xff]   ;;  %v13946_v3 = vld [vmem:[#allocation8 + $0x12f8] ss:$36 sps:$4 sm:$0xff]   ;;  %v13949_v62 = vld [vmem:[#allocation8 + $0x12b0] ss:$36 sps:$4 sm:$0xff]  }
 0x52e   :  { %12009 = vmatpush3.bf16.msra.mxu1 %v13910_v32  ;;  %v13948_v15 = vld [vmem:[#allocation11 + $0x110] sm:$0xff]   ;;  %v13950_v32 = vld [vmem:[#allocation11 + $0x148] sm:$0xff]   ;;  %v13952_v27 = vld [vmem:[#allocation8 + $0x1268] ss:$36 sps:$4 sm:$0xff]  }
 0x52f   :  { %12010 = vmatprep.subr.bf16.mxu1 %v13912_v9  ;;  %v13951_v9 = vld [vmem:[#allocation11 + $0x108] sm:$0xff]  }
 0x530   :  { %11956 = vmatpush3.bf16.msra.mxu0 %v13911_v28 }
 0x531   :  { %11957 = vmatprep.subr.bf16.mxu0 %v13913_v42  ;;  %v13954_v42 = vld [vmem:[#allocation11 + $0x100] sm:$0xff]  }
 0x532   :  { %12011 = vmatpush3.bf16.msra.mxu1 %v13914_v36 }
 0x533   :  { %12012 = vmatprep.subr.bf16.mxu1 %v13916_v4  ;;  %v13955_v4 = vld [vmem:[#allocation8 + $0x1220] ss:$36 sps:$4 sm:$0xff]  }
 0x534   :  { %11958 = vmatpush3.bf16.msra.mxu0 %v13915_v63  ;;  %v13956_v63 = vld [vmem:[#allocation11 + $0xf8] sm:$0xff]  }
 0x535   :  { %11959 = vmatprep.subr.bf16.mxu0 %v13917_v34  ;;  %v9702_v34 = vmax.f32 %v14481_v38, 0.0  ;;  %v13960_v38 = vld [vmem:[#allocation11 + $0xe8] sm:$0xff]  }
 0x536   :  { %12013 = vmatpush3.bf16.msra.mxu1 %v13918_v55 }
 0x537   :  { %12014 = vmatprep.subr.bf16.mxu1 %v13920_v20  ;;  %v13958_v20 = vld [vmem:[#allocation11 + $0xf0] sm:$0xff]  }
 0x538   :  { %11960 = vmatpush3.bf16.msra.mxu0 %v13919_v21  ;;  %v9711_v21 = vpack.c.bf16 %v9702_v34, %v9702_v34 }
 0x539   :  { %11961 = vmatprep.subr.bf16.mxu0 %v13921_v45  ;;  %v13959_v45 = vld [vmem:[#allocation11 + $0xb0] sm:$0xff]  }
 0x53a   :  { %12015 = vmatpush3.bf16.msra.mxu1 %v13922_v6  ;;  %v13961_v6 = vld [vmem:[#allocation11 + $0xa8] sm:$0xff]  }
 0x53b   :  { %12016 = vmatprep.subr.bf16.mxu1 %v13924_v13  ;;  %v13962_v13 = vld [vmem:[#allocation11 + $0xe0] sm:$0xff]  }
 0x53c   :  { %11962 = vmatpush3.bf16.msra.mxu0 %v13923_v57  ;;  %v13963_v57 = vld [vmem:[#allocation11 + $0xa0] sm:$0xff]  }
 0x53d   :  { %11963 = vmatprep.subr.bf16.mxu0 %v13925_v35  ;;  %v13964_v35 = vld [vmem:[#allocation11 + $0xd8] sm:$0xff]  }
 0x53e   :  { %12017 = vmatpush3.bf16.msra.mxu1 %v13926_v58  ;;  %v13965_v58 = vld [vmem:[#allocation11 + $0x98] sm:$0xff]  }
 0x53f   :  { %12018 = vmatprep.subr.bf16.mxu1 %v13928_v40  ;;  %v13966_v40 = vld [vmem:[#allocation11 + $0xd0] sm:$0xff]  }
 0x540   :  { %11964 = vmatpush3.bf16.msra.mxu0 %v13927_v61  ;;  %v13967_v61 = vld [vmem:[#allocation11 + $0x90] sm:$0xff]  }
 0x541   :  { %11965 = vmatprep.subr.bf16.mxu0 %v13929_v0  ;;  %v13969_v0 = vld [vmem:[#allocation11 + $0x88] sm:$0xff]  }
 0x542   :  { %12019 = vmatpush3.bf16.msra.mxu1 %v13930_v43  ;;  %v13970_v43 = vld [vmem:[#allocation11 + $0xc0] sm:$0xff]  }
 0x543   :  { %12048 = vmatprep.subr.bf16.mxu1 %v13932_v5  ;;  %v9701_v5 = vmax.f32 %v14477_v18, 0.0 }
 0x544   :  { %11966 = vmatpush3.bf16.msra.mxu0 %v13931_v37  ;;  %v13972_v37 = vld [vmem:[#allocation11 + $0x1f8] sm:$0xff]  }
 0x545   :  { %v14528_v7 = vpop.f32.mrf.mxu1  ;;  %10333 = vmatmul.mubr.bf16.vlgmr.msra.gmra.mxu1 %v9708_v46  ;;  %12101 = vmatprep.subr.bf16.mxu0 %v14182_v24  ;;  %v5353_v46 = vrot.slane %v14491_v48, %v805_v26  ;;  %v13976_v26 = vld [vmem:[#allocation11 + $0x1e8] sm:$0xff]  }
 0x546   :  { %12049 = vmatpush3.bf16.msra.mxu1 %v13933_v1  ;;  %v5349_v1 = vrot.slane %v14491_v48, %v801_v25  ;;  %v13975_v25 = vld [vmem:[#allocation11 + $0x1b0] sm:$0xff]  }
 0x547   :  { %v9287_v41 = vpop.f32.mrf.mxu0  ;;  %9612 = vmatmul.mubr.bf16.vlgmr.msra.gmra.mxu0 %v14392_v53  ;;  %v14532_v10 = vpop.f32.mrf.mxu1  ;;  %12050 = vmatprep.subr.bf16.mxu1 %v13935_v14  ;;  %v13973_v14 = vld [vmem:[#allocation11 + $0x1b8] sm:$0xff]  }
 0x548   :  { %12102 = vmatpush3.bf16.msra.mxu0 %v13934_v59  ;;  %12117 = vmatprep.mubr.msk.bf16.mxu0 %vm14183_vm0, %v14182_v24  ;;  %v9288_v28 = vadd.f32 %v9287_v41, %v14522_v56  ;;  %v13957_v56 = vld [vmem:[#allocation11 + $0xb8] sm:$0xff]   ;;  %v9710_v59 = vpack.c.bf16 %v9701_v5, %v9701_v5  ;;  %v13974_v41 = vld [vmem:[#allocation11 + $0x1f0] sm:$0xff]  }
 0x549   :  { %v9289_v8 = vpop.f32.mrf.mxu0  ;;  %v9332_v11 = vpop.f32.mrf.mxu1  ;;  %12103 = vmatprep.subr.bf16.mxu0 %v14182_v24 }
 0x54a   :  { %v9290_v12 = vadd.f32 %v9289_v8, %v14525_v44  ;;  %12051 = vmatpush3.bf16.msra.mxu1 %v13936_v50  ;;  %v13953_v44 = vld [vmem:[#allocation11 + $0x140] sm:$0xff]   ;;  %v9703_v36 = vmax.f32 %v9288_v28, 0.0  ;;  %v9331_v8 = vadd.f32 %v14532_v10, %v5353_v46  ;;  %v13989_v10 = vld [vmem:[#allocation11 + $0x230] sm:$0xff]  }
 0x54b   :  { %v9291_v17 = vpop.f32.mrf.mxu0  ;;  %v9333_v53 = vpop.f32.mrf.mxu1  ;;  %12052 = vmatprep.subr.bf16.mxu1 %v13938_v60  ;;  %v9329_v60 = vadd.f32 %v14528_v7, %v5349_v1  ;;  %v13993_v28 = vld [vmem:[#allocation11 + $0x210] sm:$0xff]  }
 0x54c   :  { %v9704_v23 = vmax.f32 %v9290_v12, 0.0  ;;  %12104 = vmatpush3.bf16.msra.mxu0 %v13937_v51  ;;  %v9712_v55 = vpack.c.bf16 %v9703_v36, %v9703_v36 }
 0x54d   :  { %v9292_v30 = vpop.f32.mrf.mxu0  ;;  %12105 = vmatprep.subr.bf16.mxu0 %v14182_v24 }
 0x54e   :  { %v9713_v39 = vpack.c.bf16 %v9704_v23, %v9704_v23  ;;  %12053 = vmatpush3.bf16.msra.mxu1 %v13939_v2  ;;  %v13988_v30 = vld [vmem:[#allocation11 + $0x238] sm:$0xff]  }
 0x54f   :  { %12054 = vmatprep.subr.bf16.mxu1 %v13941_v22  ;;  %v13977_v22 = vld [vmem:[#allocation11 + $0x1a8] sm:$0xff]  }
 0x550   :  { %12106 = vmatpush3.bf16.msra.mxu0 %v13940_v29  ;;  %10412 = vmatprep.mubr.bf16.mxu1 %v9713_v39  ;;  %v13978_v29 = vld [vmem:[#allocation11 + $0x1e0] sm:$0xff]  }
 0x551   :  { %12107 = vmatprep.subr.bf16.mxu0 %v14182_v24  ;;  %v13979_v39 = vld [vmem:[#allocation11 + $0x1a0] sm:$0xff]  }
 0x552   :  { %12055 = vmatpush3.bf16.msra.mxu1 %v13942_v31  ;;  %v13980_v31 = vld [vmem:[#allocation11 + $0x1d8] sm:$0xff]  }
 0x553   :  { %12056 = vmatprep.subr.bf16.mxu1 %v13944_v16  ;;  %v13990_v16 = vld [vmem:[#allocation11 + $0x228] sm:$0xff]  }
 0x554   :  { %12108 = vmatpush3.bf16.msra.mxu0 %v13943_v49  ;;  %v13981_v49 = vld [vmem:[#allocation11 + $0x198] sm:$0xff]  }
 0x555   :  { %12109 = vmatprep.subr.bf16.mxu0 %v14182_v24 }
 0x556   :  { %12057 = vmatpush3.bf16.msra.mxu1 %v13945_v52  ;;  %v13982_v52 = vld [vmem:[#allocation11 + $0x1d0] sm:$0xff]  }
 0x557   :  { %12058 = vmatprep.subr.bf16.mxu1 %v13947_v19  ;;  %v13991_v19 = vld [vmem:[#allocation11 + $0x220] sm:$0xff]  }
 0x558   :  { %12110 = vmatpush3.bf16.msra.mxu0 %v13946_v3  ;;  %v13983_v3 = vld [vmem:[#allocation11 + $0x190] sm:$0xff]  }
 0x559   :  { %12111 = vmatprep.subr.bf16.mxu0 %v14182_v24 }
 0x55a   :  { %12059 = vmatpush3.bf16.msra.mxu1 %v13948_v15  ;;  %v13984_v15 = vld [vmem:[#allocation11 + $0x1c8] sm:$0xff]  }
 0x55b   :  { %12060 = vmatprep.subr.bf16.mxu1 %v13950_v32  ;;  %v13992_v32 = vld [vmem:[#allocation11 + $0x218] sm:$0xff]  }
 0x55c   :  { %12112 = vmatpush3.bf16.msra.mxu0 %v13949_v62  ;;  %v13985_v62 = vld [vmem:[#allocation11 + $0x188] sm:$0xff]  }
 0x55d   :  { %12113 = vmatprep.subr.bf16.mxu0 %v14182_v24 }
 0x55e   :  { %12061 = vmatpush3.bf16.msra.mxu1 %v13951_v9  ;;  %v13986_v9 = vld [vmem:[#allocation11 + $0x1c0] sm:$0xff]  }
 0x55f   :  { %12062 = vmatprep.subr.bf16.mxu1 %v13953_v44  ;;  %v13987_v44 = vld [vmem:[#allocation11 + $0x180] sm:$0xff]  }
 0x560   :  { %12114 = vmatpush3.bf16.msra.mxu0 %v13952_v27 }
 0x561   :  { %12115 = vmatprep.subr.bf16.mxu0 %v14182_v24 }
 0x562   :  { %12063 = vmatpush3.bf16.msra.mxu1 %v13954_v42  ;;  %v13994_v42 = vld [vmem:[#allocation11 + $0x208] sm:$0xff]  }
 0x563   :  { %12121 = vmatprep.subr.bf16.mxu1 %v14182_v24 }
 0x564   :  { %12116 = vmatpush3.bf16.msra.mxu0 %v13955_v4 }
 0x565   :  { %10413 = vmatmul.mubr.bf16.vlgmr.msra.gmra.mxu1 %v9712_v55  ;;  %12026 = vmatprep.subr.bf16.mxu0 %v13956_v63  ;;  %v13995_v63 = vld [vmem:[#allocation11 + $0x200] sm:$0xff]  }
 0x566   :  { %12137 = vmatprep.mubr.msk.bf16.mxu1 %vm14183_vm0, %v14182_v24  ;;  %12122 = vmatpush3.bf16.msra.mxu1 %v13988_v30 }
 0x567   :  { %12118 = vmatmul.mubr.bf16.vlgmr.msra.gmra.mxu0 %v14405_v47  ;;  %v13968_v47 = vld [vmem:[#allocation11 + $0xc8] sm:$0xff]   ;;  %12123 = vmatprep.subr.bf16.mxu1 %v14182_v24 }
 0x568   :  { %12027 = vmatpush3.bf16.msra.mxu0 %v13957_v56  ;;  %10372 = vmatprep.mubr.bf16.mxu0 %v9711_v21 }
 0x569   :  { %12028 = vmatprep.subr.bf16.mxu0 %v13958_v20 }
 0x56a   :  { %12124 = vmatpush3.bf16.msra.mxu1 %v13989_v10 }
 0x56b   :  { %12125 = vmatprep.subr.bf16.mxu1 %v14182_v24 }
 0x56c   :  { %12029 = vmatpush3.bf16.msra.mxu0 %v13959_v45 }
 0x56d   :  { %12030 = vmatprep.subr.bf16.mxu0 %v13960_v38 }
 0x56e   :  { %12126 = vmatpush3.bf16.msra.mxu1 %v13990_v16 }
 0x56f   :  { %12127 = vmatprep.subr.bf16.mxu1 %v14182_v24 }
 0x570   :  { %12031 = vmatpush3.bf16.msra.mxu0 %v13961_v6 }
 0x571   :  { %12032 = vmatprep.subr.bf16.mxu0 %v13962_v13 }
 0x572   :  { %12128 = vmatpush3.bf16.msra.mxu1 %v13991_v19 }
 0x573   :  { %12129 = vmatprep.subr.bf16.mxu1 %v14182_v24 }
 0x574   :  { %12033 = vmatpush3.bf16.msra.mxu0 %v13963_v57 }
 0x575   :  { %12034 = vmatprep.subr.bf16.mxu0 %v13964_v35 }
 0x576   :  { %12130 = vmatpush3.bf16.msra.mxu1 %v13992_v32 }
 0x577   :  { %12131 = vmatprep.subr.bf16.mxu1 %v14182_v24 }
 0x578   :  { %12035 = vmatpush3.bf16.msra.mxu0 %v13965_v58 }
 0x579   :  { %12036 = vmatprep.subr.bf16.mxu0 %v13966_v40 }
 0x57a   :  { %12132 = vmatpush3.bf16.msra.mxu1 %v13993_v28 }
 0x57b   :  { %12133 = vmatprep.subr.bf16.mxu1 %v14182_v24 }
 0x57c   :  { %12037 = vmatpush3.bf16.msra.mxu0 %v13967_v61 }
 0x57d   :  { %12038 = vmatprep.subr.bf16.mxu0 %v13968_v47 }
 0x57e   :  { %12134 = vmatpush3.bf16.msra.mxu1 %v13994_v42 }
 0x57f   :  { %12135 = vmatprep.subr.bf16.mxu1 %v14182_v24 }
 0x580   :  { %12039 = vmatpush3.bf16.msra.mxu0 %v13969_v0 }
 0x581   :  { %12040 = vmatprep.subr.bf16.mxu0 %v13970_v43 }
 0x582   :  { %12136 = vmatpush3.bf16.msra.mxu1 %v13995_v63 }
 0x584   :  { %12041 = vmatpush3.bf16.msra.mxu0 %v13971_v54 }
 0x585   :  { %v9410_v50 = vpop.f32.mrf.mxu1  ;;  %12070 = vmatprep.subr.bf16.mxu0 %v13972_v37 }
 0x587   :  { %v9369_v51 = vpop.f32.mrf.mxu0  ;;  %10373 = vmatmul.mubr.bf16.vlgmr.msra.gmra.mxu0 %v9710_v59  ;;  %v9412_v18 = vpop.f32.mrf.mxu1 }
 0x588   :  { %v9370_v11 = vadd.f32 %v9369_v51, %v9329_v60  ;;  %12071 = vmatpush3.bf16.msra.mxu0 %v13973_v14 }
 0x589   :  { %v9371_v12 = vpop.f32.mrf.mxu0  ;;  %v9414_v33 = vpop.f32.mrf.mxu1  ;;  %12072 = vmatprep.subr.bf16.mxu0 %v13974_v41 }
 0x58a   :  { %v9372_v48 = vadd.f32 %v9371_v12, %v9331_v8  ;;  %v9411_v2 = vadd.f32 %v9410_v50, %v9370_v11 }
 0x58b   :  { %v9373_v17 = vpop.f32.mrf.mxu0  ;;  %v9415_v53 = vpop.f32.mrf.mxu1 }
 0x58c   :  { %12073 = vmatpush3.bf16.msra.mxu0 %v13975_v25  ;;  %v9413_v23 = vadd.f32 %v9412_v18, %v9372_v48  ;;  %v11097_v48 = vld [vmem:[#allocation10 + $0x8] ss:$0 sm:$0xff] }
 0x58d   :  { %v9374_v7 = vpop.f32.mrf.mxu0  ;;  %12074 = vmatprep.subr.bf16.mxu0 %v13976_v26 }
 0x590   :  { %12075 = vmatpush3.bf16.msra.mxu0 %v13977_v22 }
 0x591   :  { %12076 = vmatprep.subr.bf16.mxu0 %v13978_v29 }
 0x594   :  { %12077 = vmatpush3.bf16.msra.mxu0 %v13979_v39 }
 0x595   :  { %12078 = vmatprep.subr.bf16.mxu0 %v13980_v31 }
 0x598   :  { %12079 = vmatpush3.bf16.msra.mxu0 %v13981_v49 }
 0x599   :  { %12080 = vmatprep.subr.bf16.mxu0 %v13982_v52 }
 0x59c   :  { %12081 = vmatpush3.bf16.msra.mxu0 %v13983_v3 }
 0x59d   :  { %12082 = vmatprep.subr.bf16.mxu0 %v13984_v15 }
 0x5a0   :  { %12083 = vmatpush3.bf16.msra.mxu0 %v13985_v62  ;;  %v11746_v62 = vld [vmem:[#allocation13] ss:$0 sm:$0xff] }
 0x5a1   :  { %12084 = vmatprep.subr.bf16.mxu0 %v13986_v9 }
 0x5a4   :  { %12085 = vmatpush3.bf16.msra.mxu0 %v13987_v44 }
 0x5a5   :  { %v9492_v27 = vpop.f32.mrf.mxu1 }
 0x5a7   :  { %v9494_v36 = vpop.f32.mrf.mxu1 }
 0x5a9   :  { %v9496_v4 = vpop.f32.mrf.mxu1 }
 0x5ab   :  { %v9497_v34 = vpop.f32.mrf.mxu1 }
 0x5c5   :  { %v11945_v55 = vpop.f32.mrf.mxu1 }
 0x5c7   :  { %v9451_v56 = vpop.f32.mrf.mxu0  ;;  %v11946_v20 = vpop.f32.mrf.mxu1 }
 0x5c8   :  { %v9452_v21 = vadd.f32 %v9451_v56, %v9411_v2  ;;  %v11947_v45 = vadd.f32 %v11946_v20, %v11945_v55 }
 0x5c9   :  { %v9453_v38 = vpop.f32.mrf.mxu0  ;;  %v11948_v6 = vpop.f32.mrf.mxu1 }
 0x5ca   :  { %v9493_v13 = vadd.f32 %v9492_v27, %v9452_v21  ;;  %v9454_v57 = vadd.f32 %v9453_v38, %v9413_v23 }
 0x5cb   :  { %v9455_v35 = vpop.f32.mrf.mxu0  ;;  %v11949_v58 = vpop.f32.mrf.mxu1 }
 0x5cc   :  { %v9495_v40 = vadd.f32 %v9494_v36, %v9454_v57  ;;  %v9705_v61 = vmax.f32 %v9493_v13, 0.0 }
 0x5cd   :  { %v9456_v47 = vpop.f32.mrf.mxu0 }
 0x5ce   :  { %v9706_v0 = vmax.f32 %v9495_v40, 0.0  ;;  %v9714_v43 = vpack.c.bf16 %v9705_v61, %v9705_v61 }
 0x5d0   :  { %v9715_v24 = vpack.c.bf16 %v9706_v0, %v9706_v0 }
 0x5d2   :  { %10452 = vmatprep.mubr.bf16.mxu0 %v9715_v24 }
 0x5d3   :  { %10453 = vmatmul.mubr.bf16.vlgmr.msra.gmra.mxu0 %v9714_v43 }
 0x5e5   :  { %v11989_v54 = vpop.f32.mrf.mxu1 }
 0x5e7   :  { %v11923_v5 = vpop.f32.mrf.mxu0  ;;  %v11990_v37 = vpop.f32.mrf.mxu1 }
 0x5e8   :  { %v11991_v23 = vadd.f32 %v11990_v37, %v11989_v54 }
 0x5e9   :  { %v11924_v1 = vpop.f32.mrf.mxu0  ;;  %v11992_v46 = vpop.f32.mrf.mxu1 }
 0x5ea   :  { %v11925_v26 = vadd.f32 %v11924_v1, %v11923_v5 }
 0x5eb   :  { %v11926_v14 = vpop.f32.mrf.mxu0  ;;  %v11993_v59 = vpop.f32.mrf.mxu1 }
 0x5ec   :  { %v9534_v2 = vadd.f32 %v11925_v26, %v11097_v48 }
 0x5ed   :  { %v11927_v50 = vpop.f32.mrf.mxu0 }
 0x5ee   :  { %v9574_v53 = vadd.f32 %v11947_v45, %v9534_v2 }
 0x605   :  { %v12020_v41 = vpop.f32.mrf.mxu1 }
 0x607   :  { %v11967_v60 = vpop.f32.mrf.mxu0  ;;  %v12021_v51 = vpop.f32.mrf.mxu1 }
 0x608   :  { %v12022_v18 = vadd.f32 %v12021_v51, %v12020_v41 }
 0x609   :  { %v11968_v8 = vpop.f32.mrf.mxu0  ;;  %v12023_v11 = vpop.f32.mrf.mxu1 }
 0x60a   :  { %v11969_v17 = vadd.f32 %v11968_v8, %v11967_v60  ;;  %v10335_v44 = vadd.f32 %v12022_v18, %v11746_v62 }
 0x60b   :  { %v11970_v25 = vpop.f32.mrf.mxu0  ;;  %v12024_v12 = vpop.f32.mrf.mxu1 }
 0x60c   :  { %v9614_v22 = vadd.f32 %v11969_v17, %v9574_v53 }
 0x60d   :  { %v11971_v33 = vpop.f32.mrf.mxu0 }
 0x60e   :  { %v9654_v29 = vadd.f32 %v11991_v23, %v9614_v22 }
 0x625   :  { %v12064_v7 = vpop.f32.mrf.mxu1 }
 0x627   :  { %v9693_v30 = vpop.f32.mrf.mxu0  ;;  %v12065_v10 = vpop.f32.mrf.mxu1 }
 0x628   :  { %v9694_v39 = vadd.f32 %v9693_v30, %v9654_v29  ;;  %v12066_v31 = vadd.f32 %v12065_v10, %v12064_v7 }
 0x629   :  { %v12119_v16 = vpop.f32.mrf.mxu0  ;;  %v12067_v49 = vpop.f32.mrf.mxu1 }
 0x62a   :  { %v9707_v52 = vmax.f32 %v9694_v39, 0.0 }
 0x62b   :  { %v9696_v19 = vpop.f32.mrf.mxu0  ;;  %v12068_v3 = vpop.f32.mrf.mxu1 }
 0x62c   :  { %v9716_v15 = vpack.c.bf16 %v9707_v52, %v9707_v52 }
 0x62d   :  { %v12120_v32 = vpop.f32.mrf.mxu0 }
 0x62e   :  { %12138 = vmatmul.mubr.bf16.vlgmr.msra.gmra.mxu1 %v9716_v15 }
 0x647   :  { %v12042_v9 = vpop.f32.mrf.mxu0 }
 0x649   :  { %v12043_v28 = vpop.f32.mrf.mxu0 }
 0x64a   :  { %v12044_v27 = vadd.f32 %v12043_v28, %v12042_v9 }
 0x64b   :  { %v12045_v42 = vpop.f32.mrf.mxu0 }
 0x64c   :  { %v10375_v36 = vadd.f32 %v12044_v27, %v10335_v44 }
 0x64d   :  { %v12046_v4 = vpop.f32.mrf.mxu0 }
 0x64e   :  { %v10415_v63 = vadd.f32 %v12066_v31, %v10375_v36 }
 0x693   :  { %v12086_v34 = vpop.f32.mrf.mxu0 }
 0x695   :  { %v12087_v55 = vpop.f32.mrf.mxu0 }
 0x696   :  { %v12088_v56 = vadd.f32 %v12087_v55, %v12086_v34 }
 0x697   :  { %v12089_v20 = vpop.f32.mrf.mxu0 }
 0x698   :  { %v10455_v21 = vadd.f32 %v12088_v56, %v10415_v63 }
 0x699   :  { %v12090_v45 = vpop.f32.mrf.mxu0 }
 0x6ee   :  { %v10494_v38 = vpop.f32.mrf.mxu1 }
 0x6ef   :  { %v10495_v6 = vadd.f32 %v10494_v38, %v10455_v21 }
 0x6f0   :  { %v12139_v13 = vpop.f32.mrf.mxu1 }
 0x6f1   :  { %v10500_v57 = vmax.f32 %v10495_v6, 0.0 }
 0x6f2   :  { %v10497_v35 = vpop.f32.mrf.mxu1 }
 0x6f3   :  { %10501 = vst [vmem:[#allocation14] sm:$0xff] %v10500_v57 }
 0x6f4   :  { %v12140_v58 = vpop.f32.mrf.mxu1 }
 0x6f5   :  { %14151 = shalt.err (!%p14148_p11)
}
 0x6f6   :  { %10511 = dma.vmem_to_hbm [thread:$0]  %s10509_s6, 128, %s14576_s7, [#allocation4]  }
 0x6f7   :  { %14168 = dma.done.wait [#allocation4], 128  }
 0x6f8   :  { %14169 = vsyncadd [#allocation4], 4294967168 }
 0x6f9   :  { %10515 = vsyncpa [#allocation3], 1 }
 0x6fa   :  { %10516 = vsyncpa [#allocation6], 1 }
 0x6fb   :  { %10517 = vsyncpa [#allocation9], 1 }
 0x6fc   :  { %10518 = vsyncpa [#allocation12], 1 }
 0x6fd   :  { %10519 = vsyncpa [#allocation4], 1 }

</bundles_post_ra>
